<compile_context>
chip_gen: v5e
topology: v5e:2x2
jax: 0.10.0
libtpu: 0.0.40
codegen_flags: <defaults>
</compile_context>

<pallas_src>
import jax
import jax.numpy as jnp
import numpy as np
from jax.experimental import pallas as pl
from jax.experimental.pallas import tpu as pltpu

K = 4            # kernel size of every ConvTranspose2d
NEG_SLOPE = 0.1  # LeakyReLU slope
W = 16           # common flattened width of every padded activation buffer

N2 = 224         # p2 buffer rows (layer-1 out, pair-dup -> 128 lanes)
N3 = 280         # p3 buffer rows (layer-2 out, quad-dup -> 128 lanes)
N4 = 240         # p4 buffer rows (layer-3 out, pair-dup -> 32 lanes)

MAX_BT = 8       # batch elements processed per grid step


def _lrelu(t):
    return jnp.maximum(t, NEG_SLOPE * t)


def _decoder_kernel(a_ref, w1_ref, w2_ref, b2_ref, w3_ref, b3_ref, w4_ref, b4_ref,
                    out_ref, p2_ref, p3_ref, p4_ref):
    f32 = jnp.float32
    nb = a_ref.shape[0]          # batch elements in this grid step (static)

    # ---- per-step (loop-invariant) pad-strip zeroing.  Only the rows the layer-3 /
    # layer-4 shifted windows actually read are zeroed; valid bands are rewritten
    # for every batch element inside the loop.
    p3_ref[16:65, :] = jnp.zeros((49, 128), f32)
    p3_ref[222:274, :] = jnp.zeros((52, 128), f32)
    p4_ref[0:16, :] = jnp.zeros((16, 32), f32)
    p4_ref[225:240, :] = jnp.zeros((15, 32), f32)

    # ---- loop-invariant masks / biases (hoisted: JAX does not CSE broadcasts).
    col2 = jax.lax.broadcasted_iota(jnp.int32, (160, 1), 0) & 15
    m2 = (col2 >= 3) & (col2 <= 12)
    r3 = jax.lax.broadcasted_iota(jnp.int32, (210, 1), 0)
    c3 = r3 & 15
    m3 = (r3 < 208) & (c3 >= 1) & (c3 <= 13)
    b2v = b2_ref[...]
    b3v = b3_ref[...]
    b4v = b4_ref[...]

    def body(b, carry):
        # ---- layer 1: latent -> p2 (7x7x64 valid at (row 4, col 3), pair-dup).
        # Single dense matmul; bias folded into the LHS validity columns, so pad
        # rows come out exactly 0 and the FULL buffer is written in one store.
        p2_ref[...] = _lrelu(jnp.dot(a_ref[b], w1_ref[...],
                                     preferred_element_type=f32))

        # ---- layer 2: p2 -> p3 (10x10x32 valid, quad-duplicated).
        # 8 fused taps (kh x kw-pair); K=128 because p2 lanes hold [ch(f), ch(f+1)].
        acc2 = jnp.dot(p2_ref[13:173, :], w2_ref[0], preferred_element_type=f32)
        for t in range(1, 8):
            kh, kwp = t // 2, t % 2
            d = 13 + 16 * kh + 2 * kwp
            acc2 = acc2 + jnp.dot(p2_ref[d:d + 160, :], w2_ref[t],
                                  preferred_element_type=f32)
        act2 = jnp.where(m2, _lrelu(acc2 + b2v), 0.0)
        # wide band store (valid region shifted by +1 row vs rev 2 so that the
        # layer-3 tap offsets below are sublane aligned).
        p3_ref[65:222, :] = jnp.concatenate(
            [act2[s:s + 157, :] for s in range(4)], axis=1)

        # ---- layer 3: p3 -> p4 (13x13x16 valid at (row 1, col 1), pair-dup).
        # 4 fused taps (kh only): kw is fused into the quad-dup lanes -> K=128.
        # Tap offsets 16/32/48/64 are multiples of 8 -> aligned sublane loads.
        acc3 = jnp.dot(p3_ref[16:226, :], w3_ref[0], preferred_element_type=f32)
        for kh in range(1, 4):
            d = 16 + 16 * kh
            acc3 = acc3 + jnp.dot(p3_ref[d:d + 210, :], w3_ref[kh],
                                  preferred_element_type=f32)
        act3 = jnp.where(m3, _lrelu(acc3 + b3v), 0.0)
        p4_ref[16:225, :] = jnp.concatenate(
            [act3[s:s + 209, :] for s in range(2)], axis=1)

        # ---- layer 4: ConvTranspose2d(16,1,4,stride=2) + Sigmoid via parity
        # decomposition; 2 fused taps (u only), v fused into pair-dup lanes.
        acc4 = jnp.dot(p4_ref[0:224, :], w4_ref[0], preferred_element_type=f32)
        acc4 = acc4 + jnp.dot(p4_ref[16:240, :], w4_ref[1],
                              preferred_element_type=f32)
        out_ref[b] = jax.nn.sigmoid(acc4 + b4v)
        return carry

    jax.lax.fori_loop(0, nb, body, 0)


def _flip_taps(Wt):
    # (Cin, Cout, K, K) -> (K, K, Cin, Cout), spatially flipped
    return jnp.transpose(jnp.flip(Wt, (2, 3)), (2, 3, 0, 1))


def _prepare_params(params):
    W1, b1, W2, b2, W3, b3, W4, b4 = [jnp.asarray(p, jnp.float32) for p in params]

    # layer 1: (16 taps + 2 bias/validity columns) -> pair-duplicated 128 out lanes
    W1f = _flip_taps(W1).reshape(16, 64)                         # (tap, cout)
    w1d = jnp.zeros((34, 128), jnp.float32)
    w1d = w1d.at[0:16, 0:64].set(W1f).at[16:32, 64:128].set(W1f)
    w1d = w1d.at[32, 0:64].set(b1).at[33, 64:128].set(b1)

    # layer 2: pair-fused taps -> (kh*2+kwp, 128, 32);  K = [cin(kw), cin(kw+1)]
    w2f = _flip_taps(W2).reshape(8, 128, 32)

    # layer 3: quad-fused taps -> (kh, 128, 16);        K = [cin(kw=0..3)]
    w3f = _flip_taps(W3).reshape(4, 128, 16)

    # layer 4 (stride 2): w4f[u][16*v + ci, 2*py+px] = W4[ci,0,2-2u+py,2-2v+px]
    w4f = jnp.stack([
        jnp.concatenate([
            jnp.stack([W4[:, 0, 2 - 2 * u + py, 2 - 2 * v + px]
                       for py in range(2) for px in range(2)], axis=-1)
            for v in range(2)], axis=0)
        for u in range(2)], axis=0)                              # (2, 32, 4)

    return (w1d, w2f, b2.reshape(1, 32), w3f, b3.reshape(1, 16),
            w4f, jnp.full((1, 4), b4[0], jnp.float32))


def _build_lhs(x4):
    """x4: (B,1,4,4) -> (B,224,34) im2col LHS for the folded layer-1 matmul."""
    B = x4.shape[0]
    f32 = jnp.float32
    xp = jnp.zeros((B, 10, 10), f32).at[:, 3:7, 3:7].set(x4[:, 0])     # pad 3
    patches = jnp.stack([xp[:, kh:kh + 7, kw:kw + 7]
                         for kh in range(4) for kw in range(4)], axis=-1)  # (B,7,7,16)
    a = jnp.zeros((B, 14, 16, 16), f32).at[:, 4:11, 3:10, :].set(patches)
    a = a.reshape(B, 224, 16)
    valid = jnp.zeros((14, 16), f32).at[4:11, 3:10].set(1.0).reshape(224)
    a_next = jnp.concatenate([a[:, 1:, :], jnp.zeros((B, 1, 16), f32)], axis=1)
    v = jnp.broadcast_to(valid[None, :, None], (B, 224, 1))
    v_next = jnp.broadcast_to(
        jnp.concatenate([valid[1:], jnp.zeros((1,), f32)])[None, :, None],
        (B, 224, 1))
    return jnp.concatenate([a, a_next, v, v_next], axis=2)              # (B,224,34)


def _const_spec(*shape):
    return pl.BlockSpec(shape, lambda i: (0,) * len(shape))


def decoder_forward(inp, params):
    """Matches Decoder.forward: inp -> view(-1,1,4,4) -> decode -> (B,1,28,28)."""
    x4 = inp.reshape(-1, 1, 4, 4).astype(jnp.float32)
    B = x4.shape[0]
    bt = min(MAX_BT, B)                      # batch elements per grid step
    g = pl.cdiv(B, bt)
    bpad = g * bt

    a = _build_lhs(x4)                       # (B, 224, 34)
    if bpad != B:
        a = jnp.concatenate(
            [a, jnp.zeros((bpad - B, 224, 34), jnp.float32)], axis=0)

    w1d, w2f, b2r, w3f, b3r, w4f, b4r = _prepare_params(params)

    out = pl.pallas_call(
        _decoder_kernel,
        grid=(g,),
        out_shape=jax.ShapeDtypeStruct((bpad, 224, 4), jnp.float32),
        in_specs=[
            pl.BlockSpec((bt, 224, 34), lambda i: (i, 0, 0)),  # per-step im2col LHS
            _const_spec(34, 128),                              # w1 (+bias rows)
            _const_spec(8, 128, 32),                           # w2 pair-fused taps
            _const_spec(1, 32),                                # b2
            _const_spec(4, 128, 16),                           # w3 quad-fused taps
            _const_spec(1, 16),                                # b3
            _const_spec(2, 32, 4),                             # w4 parity taps
            _const_spec(1, 4),                                 # b4
        ],
        out_specs=pl.BlockSpec((bt, 224, 4), lambda i: (i, 0, 0)),
        scratch_shapes=[
            pltpu.VMEM((N2, 128), jnp.float32),   # p2: layer-1 out, pair-dup
            pltpu.VMEM((N3, 128), jnp.float32),   # p3: layer-2 out, quad-dup
            pltpu.VMEM((N4, 32), jnp.float32),    # p4: layer-3 out, pair-dup
        ],
        compiler_params=pltpu.CompilerParams(
            dimension_semantics=("parallel",),
            vmem_limit_bytes=32 * 1024 * 1024,    # well under v7x's 64 MiB VMEM
        ),
    )(a, w1d, w2f, b2r, w3f, b3r, w4f, b4r)

    out = out[:B]
    # glue: out[b, 16*m + n, 2*py + px] == img[b, 2m+py, 2n+px]  (n < 14 valid)
    o = out.reshape(B, 14, 16, 2, 2)[:, :, :14, :, :]        # (B, m, n, py, px)
    o = jnp.transpose(o, (0, 1, 3, 2, 4)).reshape(B, 28, 28)
    return o[:, None, :, :]                                   # (B, 1, 28, 28)


def reference_forward(inp, params):
    """Pure-JAX reference with identical semantics (for validation)."""
    W1, b1, W2, b2, W3, b3, W4, b4 = params
    a = inp.reshape(-1, 1, 4, 4).astype(jnp.float32)

    def deconv(a, Wt, bias, stride):
        wt = jnp.transpose(jnp.flip(Wt, (2, 3)), (1, 0, 2, 3))   # OIHW, flipped
        y = jax.lax.conv_general_dilated(
            a, wt, window_strides=(1, 1),
            padding=((K - 1, K - 1), (K - 1, K - 1)),
            lhs_dilation=(stride, stride),
            dimension_numbers=("NCHW", "OIHW", "NCHW"),
            precision=jax.lax.Precision.HIGHEST)
        return y + bias.reshape(1, -1, 1, 1)

    lrelu = lambda t: jnp.where(t >= 0, t, NEG_SLOPE * t)
    a = lrelu(deconv(a, W1, b1, 1))
    a = lrelu(deconv(a, W2, b2, 1))
    a = lrelu(deconv(a, W3, b3, 1))
    a = jax.nn.sigmoid(deconv(a, W4, b4, 2))
    return a.reshape(-1, 1, 28, 28)


if __name__ == "__main__":
    key = jax.random.PRNGKey(0)
    keys = jax.random.split(key, 9)
    B = 2

    def uinit(k, shape, fan):
        bound = 1.0 / (fan ** 0.5)
        return jax.random.uniform(k, shape, jnp.float32, -bound, bound)

    # ConvTranspose2d weight layout is (in_channels, out_channels, kH, kW)
    W1 = uinit(keys[0], (1, 64, 4, 4), 1 * 16);   b1 = uinit(keys[1], (64,), 1 * 16)
    W2 = uinit(keys[2], (64, 32, 4, 4), 64 * 16); b2 = uinit(keys[3], (32,), 64 * 16)
    W3 = uinit(keys[4], (32, 16, 4, 4), 32 * 16); b3 = uinit(keys[5], (16,), 32 * 16)
    W4 = uinit(keys[6], (16, 1, 4, 4), 16 * 16);  b4 = uinit(keys[7], (1,), 16 * 16)
    params = (W1, b1, W2, b2, W3, b3, W4, b4)

    x = jax.random.normal(keys[8], (B, 16), jnp.float32)   # latent z=16 -> view(-1,1,4,4)

    out = jax.jit(decoder_forward)(x, params)
    out = jax.block_until_ready(out)
    assert out.shape == (B, 1, 28, 28), out.shape

    ref = jax.block_until_ready(reference_forward(x, params))
    np.testing.assert_allclose(np.asarray(out), np.asarray(ref), atol=3e-3, rtol=3e-3)

    print("KERNEL_OK")
</pallas_src>

<mosaic_0001>
module attributes {stable_mosaic.version = 11 : i64} {
  func.func @_decoder_kernel(%arg0: i32, %arg1: memref<2x224x34xf32, #tpu.memory_space<vmem>>, %arg2: memref<34x128xf32, #tpu.memory_space<vmem>>, %arg3: memref<8x128x32xf32, #tpu.memory_space<vmem>>, %arg4: memref<1x32xf32, #tpu.memory_space<vmem>>, %arg5: memref<4x128x16xf32, #tpu.memory_space<vmem>>, %arg6: memref<1x16xf32, #tpu.memory_space<vmem>>, %arg7: memref<2x32x4xf32, #tpu.memory_space<vmem>>, %arg8: memref<1x4xf32, #tpu.memory_space<vmem>>, %arg9: memref<2x224x4xf32, #tpu.memory_space<vmem>>, %arg10: memref<224x128xf32, #tpu.memory_space<vmem>>, %arg11: memref<280x128xf32, #tpu.memory_space<vmem>>, %arg12: memref<240x32xf32, #tpu.memory_space<vmem>>) attributes {dimension_semantics = [#tpu.dimension_semantics<parallel>], iteration_bounds = array<i64: 1>, scalar_prefetch = 0 : i64, scratch_operands = 3 : i64, tpu.core_type = #tpu.core_type<tc>, window_params = [{transform_indices = @transform_0, window_bounds = array<i64: 2, 224, 34>}, {pipeline_mode = #tpu.pipeline_mode<synchronous>, transform_indices = @transform_1, window_bounds = array<i64: 34, 128>}, {pipeline_mode = #tpu.pipeline_mode<synchronous>, transform_indices = @transform_2, window_bounds = array<i64: 8, 128, 32>}, {pipeline_mode = #tpu.pipeline_mode<synchronous>, transform_indices = @transform_3, window_bounds = array<i64: 1, 32>}, {pipeline_mode = #tpu.pipeline_mode<synchronous>, transform_indices = @transform_4, window_bounds = array<i64: 4, 128, 16>}, {pipeline_mode = #tpu.pipeline_mode<synchronous>, transform_indices = @transform_5, window_bounds = array<i64: 1, 16>}, {pipeline_mode = #tpu.pipeline_mode<synchronous>, transform_indices = @transform_6, window_bounds = array<i64: 2, 32, 4>}, {pipeline_mode = #tpu.pipeline_mode<synchronous>, transform_indices = @transform_7, window_bounds = array<i64: 1, 4>}, {transform_indices = @transform_8, window_bounds = array<i64: 2, 224, 4>}]} {
    %cst = arith.constant 0.000000e+00 : f32
    %0 = vector.broadcast %cst : f32 to vector<49x128xf32>
    %c16 = arith.constant 16 : index
    %c0 = arith.constant 0 : index
    %1 = vector.load %arg11[%c16, %c0] : memref<280x128xf32, #tpu.memory_space<vmem>>, vector<49x128xf32>
    tpu.vector_store %arg11[%c16, %c0], %0 {strides = array<i32>} : memref<280x128xf32, #tpu.memory_space<vmem>>, vector<49x128xf32>,
    %cst_0 = arith.constant 0.000000e+00 : f32
    %2 = vector.broadcast %cst_0 : f32 to vector<52x128xf32>
    %c222 = arith.constant 222 : index
    %c0_1 = arith.constant 0 : index
    %3 = vector.load %arg11[%c222, %c0_1] : memref<280x128xf32, #tpu.memory_space<vmem>>, vector<52x128xf32>
    tpu.vector_store %arg11[%c222, %c0_1], %2 {strides = array<i32>} : memref<280x128xf32, #tpu.memory_space<vmem>>, vector<52x128xf32>,
    %cst_2 = arith.constant 0.000000e+00 : f32
    %4 = vector.broadcast %cst_2 : f32 to vector<16x32xf32>
    %c0_3 = arith.constant 0 : index
    %c0_4 = arith.constant 0 : index
    %5 = vector.load %arg12[%c0_3, %c0_4] : memref<240x32xf32, #tpu.memory_space<vmem>>, vector<16x32xf32>
    tpu.vector_store %arg12[%c0_3, %c0_4], %4 {strides = array<i32>} : memref<240x32xf32, #tpu.memory_space<vmem>>, vector<16x32xf32>,
    %cst_5 = arith.constant 0.000000e+00 : f32
    %6 = vector.broadcast %cst_5 : f32 to vector<15x32xf32>
    %c225 = arith.constant 225 : index
    %c0_6 = arith.constant 0 : index
    %7 = vector.load %arg12[%c225, %c0_6] : memref<240x32xf32, #tpu.memory_space<vmem>>, vector<15x32xf32>
    tpu.vector_store %arg12[%c225, %c0_6], %6 {strides = array<i32>} : memref<240x32xf32, #tpu.memory_space<vmem>>, vector<15x32xf32>,
    %8 = tpu.iota {dimensions = array<i32: 0>} : vector<160x1xi32>
    %c15_i32 = arith.constant 15 : i32
    %9 = vector.broadcast %c15_i32 : i32 to vector<160x1xi32>
    %10 = arith.andi %8, %9 : vector<160x1xi32>
    %c3_i32 = arith.constant 3 : i32
    %11 = vector.broadcast %c3_i32 : i32 to vector<160x1xi32>
    %12 = arith.cmpi sge, %10, %11 : vector<160x1xi32>
    %c12_i32 = arith.constant 12 : i32
    %13 = vector.broadcast %c12_i32 : i32 to vector<160x1xi32>
    %14 = arith.cmpi sle, %10, %13 : vector<160x1xi32>
    %15 = arith.andi %12, %14 : vector<160x1xi1>
    %16 = tpu.iota {dimensions = array<i32: 0>} : vector<210x1xi32>
    %c15_i32_7 = arith.constant 15 : i32
    %17 = vector.broadcast %c15_i32_7 : i32 to vector<210x1xi32>
    %18 = arith.andi %16, %17 : vector<210x1xi32>
    %c208_i32 = arith.constant 208 : i32
    %19 = vector.broadcast %c208_i32 : i32 to vector<210x1xi32>
    %20 = arith.cmpi slt, %16, %19 : vector<210x1xi32>
    %c1_i32 = arith.constant 1 : i32
    %21 = vector.broadcast %c1_i32 : i32 to vector<210x1xi32>
    %22 = arith.cmpi sge, %18, %21 : vector<210x1xi32>
    %23 = arith.andi %20, %22 : vector<210x1xi1>
    %c13_i32 = arith.constant 13 : i32
    %24 = vector.broadcast %c13_i32 : i32 to vector<210x1xi32>
    %25 = arith.cmpi sle, %18, %24 : vector<210x1xi32>
    %26 = arith.andi %23, %25 : vector<210x1xi1>
    %c0_8 = arith.constant 0 : index
    %c0_9 = arith.constant 0 : index
    %27 = vector.load %arg4[%c0_8, %c0_9] : memref<1x32xf32, #tpu.memory_space<vmem>>, vector<1x32xf32>
    %c0_10 = arith.constant 0 : index
    %c0_11 = arith.constant 0 : index
    %28 = vector.load %arg6[%c0_10, %c0_11] : memref<1x16xf32, #tpu.memory_space<vmem>>, vector<1x16xf32>
    %c0_12 = arith.constant 0 : index
    %c0_13 = arith.constant 0 : index
    %29 = vector.load %arg8[%c0_12, %c0_13] : memref<1x4xf32, #tpu.memory_space<vmem>>, vector<1x4xf32>
    %c0_i32 = arith.constant 0 : i32
    %c2_i32 = arith.constant 2 : i32
    %30 = arith.addi %c0_i32, %c2_i32 : i32
    %c1_i32_14 = arith.constant 1 : i32
    scf.for %arg13 = %c0_i32 to %30 step %c1_i32_14  : i32 {
      %31 = arith.index_cast %arg13 : i32 to index
      %c0_16 = arith.constant 0 : index
      %c0_17 = arith.constant 0 : index
      %32 = vector.load %arg1[%31, %c0_16, %c0_17] : memref<2x224x34xf32, #tpu.memory_space<vmem>>, vector<1x224x34xf32>
      %33 = vector.shape_cast %32 : vector<1x224x34xf32> to vector<224x34xf32>
      %c0_18 = arith.constant 0 : index
      %c0_19 = arith.constant 0 : index
      %34 = vector.load %arg2[%c0_18, %c0_19] : memref<34x128xf32, #tpu.memory_space<vmem>>, vector<34x128xf32>
      %cst_20 = arith.constant dense<0.000000e+00> : vector<224x128xf32>
      %35 = tpu.matmul %33, %34, %cst_20 {dimension_numbers = #tpu.dot_dimension_numbers<[1], [0], [0], [1], [0, 0, 1, 1], [], []>} : vector<224x34xf32>, vector<34x128xf32>, vector<224x128xf32> -> vector<224x128xf32>
      %cst_21 = arith.constant 1.000000e-01 : f32
      %36 = vector.broadcast %cst_21 : f32 to vector<224x128xf32>
      %37 = arith.mulf %36, %35 : vector<224x128xf32>
      %38 = arith.maximumf %35, %37 : vector<224x128xf32>
      %c0_22 = arith.constant 0 : index
      %c0_23 = arith.constant 0 : index
      %39 = vector.load %arg10[%c0_22, %c0_23] : memref<224x128xf32, #tpu.memory_space<vmem>>, vector<224x128xf32>
      tpu.vector_store %arg10[%c0_22, %c0_23], %38 {strides = array<i32>} : memref<224x128xf32, #tpu.memory_space<vmem>>, vector<224x128xf32>,
      %c13 = arith.constant 13 : index
      %c0_24 = arith.constant 0 : index
      %40 = vector.load %arg10[%c13, %c0_24] : memref<224x128xf32, #tpu.memory_space<vmem>>, vector<160x128xf32>
      %c0_25 = arith.constant 0 : index
      %c0_26 = arith.constant 0 : index
      %c0_27 = arith.constant 0 : index
      %41 = vector.load %arg3[%c0_25, %c0_26, %c0_27] : memref<8x128x32xf32, #tpu.memory_space<vmem>>, vector<1x128x32xf32>
      %42 = vector.shape_cast %41 : vector<1x128x32xf32> to vector<128x32xf32>
      %cst_28 = arith.constant dense<0.000000e+00> : vector<160x32xf32>
      %43 = tpu.matmul %40, %42, %cst_28 {dimension_numbers = #tpu.dot_dimension_numbers<[1], [0], [0], [1], [0, 0, 1, 1], [], []>} : vector<160x128xf32>, vector<128x32xf32>, vector<160x32xf32> -> vector<160x32xf32>
      %c15 = arith.constant 15 : index
      %c0_29 = arith.constant 0 : index
      %44 = vector.load %arg10[%c15, %c0_29] : memref<224x128xf32, #tpu.memory_space<vmem>>, vector<160x128xf32>
      %c1 = arith.constant 1 : index
      %c0_30 = arith.constant 0 : index
      %c0_31 = arith.constant 0 : index
      %45 = vector.load %arg3[%c1, %c0_30, %c0_31] : memref<8x128x32xf32, #tpu.memory_space<vmem>>, vector<1x128x32xf32>
      %46 = vector.shape_cast %45 : vector<1x128x32xf32> to vector<128x32xf32>
      %cst_32 = arith.constant dense<0.000000e+00> : vector<160x32xf32>
      %47 = tpu.matmul %44, %46, %cst_32 {dimension_numbers = #tpu.dot_dimension_numbers<[1], [0], [0], [1], [0, 0, 1, 1], [], []>} : vector<160x128xf32>, vector<128x32xf32>, vector<160x32xf32> -> vector<160x32xf32>
      %48 = arith.addf %43, %47 : vector<160x32xf32>
      %c29 = arith.constant 29 : index
      %c0_33 = arith.constant 0 : index
      %49 = vector.load %arg10[%c29, %c0_33] : memref<224x128xf32, #tpu.memory_space<vmem>>, vector<160x128xf32>
      %c2 = arith.constant 2 : index
      %c0_34 = arith.constant 0 : index
      %c0_35 = arith.constant 0 : index
      %50 = vector.load %arg3[%c2, %c0_34, %c0_35] : memref<8x128x32xf32, #tpu.memory_space<vmem>>, vector<1x128x32xf32>
      %51 = vector.shape_cast %50 : vector<1x128x32xf32> to vector<128x32xf32>
      %cst_36 = arith.constant dense<0.000000e+00> : vector<160x32xf32>
      %52 = tpu.matmul %49, %51, %cst_36 {dimension_numbers = #tpu.dot_dimension_numbers<[1], [0], [0], [1], [0, 0, 1, 1], [], []>} : vector<160x128xf32>, vector<128x32xf32>, vector<160x32xf32> -> vector<160x32xf32>
      %53 = arith.addf %48, %52 : vector<160x32xf32>
      %c31 = arith.constant 31 : index
      %c0_37 = arith.constant 0 : index
      %54 = vector.load %arg10[%c31, %c0_37] : memref<224x128xf32, #tpu.memory_space<vmem>>, vector<160x128xf32>
      %c3 = arith.constant 3 : index
      %c0_38 = arith.constant 0 : index
      %c0_39 = arith.constant 0 : index
      %55 = vector.load %arg3[%c3, %c0_38, %c0_39] : memref<8x128x32xf32, #tpu.memory_space<vmem>>, vector<1x128x32xf32>
      %56 = vector.shape_cast %55 : vector<1x128x32xf32> to vector<128x32xf32>
      %cst_40 = arith.constant dense<0.000000e+00> : vector<160x32xf32>
      %57 = tpu.matmul %54, %56, %cst_40 {dimension_numbers = #tpu.dot_dimension_numbers<[1], [0], [0], [1], [0, 0, 1, 1], [], []>} : vector<160x128xf32>, vector<128x32xf32>, vector<160x32xf32> -> vector<160x32xf32>
      %58 = arith.addf %53, %57 : vector<160x32xf32>
      %c45 = arith.constant 45 : index
      %c0_41 = arith.constant 0 : index
      %59 = vector.load %arg10[%c45, %c0_41] : memref<224x128xf32, #tpu.memory_space<vmem>>, vector<160x128xf32>
      %c4 = arith.constant 4 : index
      %c0_42 = arith.constant 0 : index
      %c0_43 = arith.constant 0 : index
      %60 = vector.load %arg3[%c4, %c0_42, %c0_43] : memref<8x128x32xf32, #tpu.memory_space<vmem>>, vector<1x128x32xf32>
      %61 = vector.shape_cast %60 : vector<1x128x32xf32> to vector<128x32xf32>
      %cst_44 = arith.constant dense<0.000000e+00> : vector<160x32xf32>
      %62 = tpu.matmul %59, %61, %cst_44 {dimension_numbers = #tpu.dot_dimension_numbers<[1], [0], [0], [1], [0, 0, 1, 1], [], []>} : vector<160x128xf32>, vector<128x32xf32>, vector<160x32xf32> -> vector<160x32xf32>
      %63 = arith.addf %58, %62 : vector<160x32xf32>
      %c47 = arith.constant 47 : index
      %c0_45 = arith.constant 0 : index
      %64 = vector.load %arg10[%c47, %c0_45] : memref<224x128xf32, #tpu.memory_space<vmem>>, vector<160x128xf32>
      %c5 = arith.constant 5 : index
      %c0_46 = arith.constant 0 : index
      %c0_47 = arith.constant 0 : index
      %65 = vector.load %arg3[%c5, %c0_46, %c0_47] : memref<8x128x32xf32, #tpu.memory_space<vmem>>, vector<1x128x32xf32>
      %66 = vector.shape_cast %65 : vector<1x128x32xf32> to vector<128x32xf32>
      %cst_48 = arith.constant dense<0.000000e+00> : vector<160x32xf32>
      %67 = tpu.matmul %64, %66, %cst_48 {dimension_numbers = #tpu.dot_dimension_numbers<[1], [0], [0], [1], [0, 0, 1, 1], [], []>} : vector<160x128xf32>, vector<128x32xf32>, vector<160x32xf32> -> vector<160x32xf32>
      %68 = arith.addf %63, %67 : vector<160x32xf32>
      %c61 = arith.constant 61 : index
      %c0_49 = arith.constant 0 : index
      %69 = vector.load %arg10[%c61, %c0_49] : memref<224x128xf32, #tpu.memory_space<vmem>>, vector<160x128xf32>
      %c6 = arith.constant 6 : index
      %c0_50 = arith.constant 0 : index
      %c0_51 = arith.constant 0 : index
      %70 = vector.load %arg3[%c6, %c0_50, %c0_51] : memref<8x128x32xf32, #tpu.memory_space<vmem>>, vector<1x128x32xf32>
      %71 = vector.shape_cast %70 : vector<1x128x32xf32> to vector<128x32xf32>
      %cst_52 = arith.constant dense<0.000000e+00> : vector<160x32xf32>
      %72 = tpu.matmul %69, %71, %cst_52 {dimension_numbers = #tpu.dot_dimension_numbers<[1], [0], [0], [1], [0, 0, 1, 1], [], []>} : vector<160x128xf32>, vector<128x32xf32>, vector<160x32xf32> -> vector<160x32xf32>
      %73 = arith.addf %68, %72 : vector<160x32xf32>
      %c63 = arith.constant 63 : index
      %c0_53 = arith.constant 0 : index
      %74 = vector.load %arg10[%c63, %c0_53] : memref<224x128xf32, #tpu.memory_space<vmem>>, vector<160x128xf32>
      %c7 = arith.constant 7 : index
      %c0_54 = arith.constant 0 : index
      %c0_55 = arith.constant 0 : index
      %75 = vector.load %arg3[%c7, %c0_54, %c0_55] : memref<8x128x32xf32, #tpu.memory_space<vmem>>, vector<1x128x32xf32>
      %76 = vector.shape_cast %75 : vector<1x128x32xf32> to vector<128x32xf32>
      %cst_56 = arith.constant dense<0.000000e+00> : vector<160x32xf32>
      %77 = tpu.matmul %74, %76, %cst_56 {dimension_numbers = #tpu.dot_dimension_numbers<[1], [0], [0], [1], [0, 0, 1, 1], [], []>} : vector<160x128xf32>, vector<128x32xf32>, vector<160x32xf32> -> vector<160x32xf32>
      %78 = arith.addf %73, %77 : vector<160x32xf32>
      %79 = vector.broadcast %27 : vector<1x32xf32> to vector<160x32xf32>
      %80 = arith.addf %78, %79 : vector<160x32xf32>
      %cst_57 = arith.constant 1.000000e-01 : f32
      %81 = vector.broadcast %cst_57 : f32 to vector<160x32xf32>
      %82 = arith.mulf %81, %80 : vector<160x32xf32>
      %83 = arith.maximumf %80, %82 : vector<160x32xf32>
      %cst_58 = arith.constant 0.000000e+00 : f32
      %84 = vector.shape_cast %15 : vector<160x1xi1> to vector<160x1xi1>
      %85 = vector.broadcast %84 : vector<160x1xi1> to vector<160x32xi1>
      %86 = vector.broadcast %cst_58 : f32 to vector<160x32xf32>
      %87 = arith.select %85, %83, %86 : vector<160x32xi1>, vector<160x32xf32>
      %88 = vector.extract_strided_slice %87 {offsets = [0, 0], sizes = [157, 32], strides = [1, 1]} : vector<160x32xf32> to vector<157x32xf32>
      %89 = vector.extract_strided_slice %87 {offsets = [1, 0], sizes = [157, 32], strides = [1, 1]} : vector<160x32xf32> to vector<157x32xf32>
      %90 = vector.extract_strided_slice %87 {offsets = [2, 0], sizes = [157, 32], strides = [1, 1]} : vector<160x32xf32> to vector<157x32xf32>
      %91 = vector.extract_strided_slice %87 {offsets = [3, 0], sizes = [157, 32], strides = [1, 1]} : vector<160x32xf32> to vector<157x32xf32>
      %92 = tpu.concatenate %88, %89, %90, %91 in 1 : vector<157x32xf32>, vector<157x32xf32>, vector<157x32xf32>, vector<157x32xf32> -> vector<157x128xf32>
      %c65 = arith.constant 65 : index
      %c0_59 = arith.constant 0 : index
      %93 = vector.load %arg11[%c65, %c0_59] : memref<280x128xf32, #tpu.memory_space<vmem>>, vector<157x128xf32>
      tpu.vector_store %arg11[%c65, %c0_59], %92 {strides = array<i32>} : memref<280x128xf32, #tpu.memory_space<vmem>>, vector<157x128xf32>,
      %c16_60 = arith.constant 16 : index
      %c0_61 = arith.constant 0 : index
      %94 = vector.load %arg11[%c16_60, %c0_61] : memref<280x128xf32, #tpu.memory_space<vmem>>, vector<210x128xf32>
      %c0_62 = arith.constant 0 : index
      %c0_63 = arith.constant 0 : index
      %c0_64 = arith.constant 0 : index
      %95 = vector.load %arg5[%c0_62, %c0_63, %c0_64] : memref<4x128x16xf32, #tpu.memory_space<vmem>>, vector<1x128x16xf32>
      %96 = vector.shape_cast %95 : vector<1x128x16xf32> to vector<128x16xf32>
      %cst_65 = arith.constant dense<0.000000e+00> : vector<210x16xf32>
      %97 = tpu.matmul %94, %96, %cst_65 {dimension_numbers = #tpu.dot_dimension_numbers<[1], [0], [0], [1], [0, 0, 1, 1], [], []>} : vector<210x128xf32>, vector<128x16xf32>, vector<210x16xf32> -> vector<210x16xf32>
      %c32 = arith.constant 32 : index
      %c0_66 = arith.constant 0 : index
      %98 = vector.load %arg11[%c32, %c0_66] : memref<280x128xf32, #tpu.memory_space<vmem>>, vector<210x128xf32>
      %c1_67 = arith.constant 1 : index
      %c0_68 = arith.constant 0 : index
      %c0_69 = arith.constant 0 : index
      %99 = vector.load %arg5[%c1_67, %c0_68, %c0_69] : memref<4x128x16xf32, #tpu.memory_space<vmem>>, vector<1x128x16xf32>
      %100 = vector.shape_cast %99 : vector<1x128x16xf32> to vector<128x16xf32>
      %cst_70 = arith.constant dense<0.000000e+00> : vector<210x16xf32>
      %101 = tpu.matmul %98, %100, %cst_70 {dimension_numbers = #tpu.dot_dimension_numbers<[1], [0], [0], [1], [0, 0, 1, 1], [], []>} : vector<210x128xf32>, vector<128x16xf32>, vector<210x16xf32> -> vector<210x16xf32>
      %102 = arith.addf %97, %101 : vector<210x16xf32>
      %c48 = arith.constant 48 : index
      %c0_71 = arith.constant 0 : index
      %103 = vector.load %arg11[%c48, %c0_71] : memref<280x128xf32, #tpu.memory_space<vmem>>, vector<210x128xf32>
      %c2_72 = arith.constant 2 : index
      %c0_73 = arith.constant 0 : index
      %c0_74 = arith.constant 0 : index
      %104 = vector.load %arg5[%c2_72, %c0_73, %c0_74] : memref<4x128x16xf32, #tpu.memory_space<vmem>>, vector<1x128x16xf32>
      %105 = vector.shape_cast %104 : vector<1x128x16xf32> to vector<128x16xf32>
      %cst_75 = arith.constant dense<0.000000e+00> : vector<210x16xf32>
      %106 = tpu.matmul %103, %105, %cst_75 {dimension_numbers = #tpu.dot_dimension_numbers<[1], [0], [0], [1], [0, 0, 1, 1], [], []>} : vector<210x128xf32>, vector<128x16xf32>, vector<210x16xf32> -> vector<210x16xf32>
      %107 = arith.addf %102, %106 : vector<210x16xf32>
      %c64 = arith.constant 64 : index
      %c0_76 = arith.constant 0 : index
      %108 = vector.load %arg11[%c64, %c0_76] : memref<280x128xf32, #tpu.memory_space<vmem>>, vector<210x128xf32>
      %c3_77 = arith.constant 3 : index
      %c0_78 = arith.constant 0 : index
      %c0_79 = arith.constant 0 : index
      %109 = vector.load %arg5[%c3_77, %c0_78, %c0_79] : memref<4x128x16xf32, #tpu.memory_space<vmem>>, vector<1x128x16xf32>
      %110 = vector.shape_cast %109 : vector<1x128x16xf32> to vector<128x16xf32>
      %cst_80 = arith.constant dense<0.000000e+00> : vector<210x16xf32>
      %111 = tpu.matmul %108, %110, %cst_80 {dimension_numbers = #tpu.dot_dimension_numbers<[1], [0], [0], [1], [0, 0, 1, 1], [], []>} : vector<210x128xf32>, vector<128x16xf32>, vector<210x16xf32> -> vector<210x16xf32>
      %112 = arith.addf %107, %111 : vector<210x16xf32>
      %113 = vector.broadcast %28 : vector<1x16xf32> to vector<210x16xf32>
      %114 = arith.addf %112, %113 : vector<210x16xf32>
      %cst_81 = arith.constant 1.000000e-01 : f32
      %115 = vector.broadcast %cst_81 : f32 to vector<210x16xf32>
      %116 = arith.mulf %115, %114 : vector<210x16xf32>
      %117 = arith.maximumf %114, %116 : vector<210x16xf32>
      %cst_82 = arith.constant 0.000000e+00 : f32
      %118 = vector.shape_cast %26 : vector<210x1xi1> to vector<210x1xi1>
      %119 = vector.broadcast %118 : vector<210x1xi1> to vector<210x16xi1>
      %120 = vector.broadcast %cst_82 : f32 to vector<210x16xf32>
      %121 = arith.select %119, %117, %120 : vector<210x16xi1>, vector<210x16xf32>
      %122 = vector.extract_strided_slice %121 {offsets = [0, 0], sizes = [209, 16], strides = [1, 1]} : vector<210x16xf32> to vector<209x16xf32>
      %123 = vector.extract_strided_slice %121 {offsets = [1, 0], sizes = [209, 16], strides = [1, 1]} : vector<210x16xf32> to vector<209x16xf32>
      %124 = tpu.concatenate %122, %123 in 1 : vector<209x16xf32>, vector<209x16xf32> -> vector<209x32xf32>
      %c16_83 = arith.constant 16 : index
      %c0_84 = arith.constant 0 : index
      %125 = vector.load %arg12[%c16_83, %c0_84] : memref<240x32xf32, #tpu.memory_space<vmem>>, vector<209x32xf32>
      tpu.vector_store %arg12[%c16_83, %c0_84], %124 {strides = array<i32>} : memref<240x32xf32, #tpu.memory_space<vmem>>, vector<209x32xf32>,
      %c0_85 = arith.constant 0 : index
      %c0_86 = arith.constant 0 : index
      %126 = vector.load %arg12[%c0_85, %c0_86] : memref<240x32xf32, #tpu.memory_space<vmem>>, vector<224x32xf32>
      %c0_87 = arith.constant 0 : index
      %c0_88 = arith.constant 0 : index
      %c0_89 = arith.constant 0 : index
      %127 = vector.load %arg7[%c0_87, %c0_88, %c0_89] : memref<2x32x4xf32, #tpu.memory_space<vmem>>, vector<1x32x4xf32>
      %128 = vector.shape_cast %127 : vector<1x32x4xf32> to vector<32x4xf32>
      %cst_90 = arith.constant dense<0.000000e+00> : vector<224x4xf32>
      %129 = tpu.matmul %126, %128, %cst_90 {dimension_numbers = #tpu.dot_dimension_numbers<[1], [0], [0], [1], [0, 0, 1, 1], [], []>} : vector<224x32xf32>, vector<32x4xf32>, vector<224x4xf32> -> vector<224x4xf32>
      %c16_91 = arith.constant 16 : index
      %c0_92 = arith.constant 0 : index
      %130 = vector.load %arg12[%c16_91, %c0_92] : memref<240x32xf32, #tpu.memory_space<vmem>>, vector<224x32xf32>
      %c1_93 = arith.constant 1 : index
      %c0_94 = arith.constant 0 : index
      %c0_95 = arith.constant 0 : index
      %131 = vector.load %arg7[%c1_93, %c0_94, %c0_95] : memref<2x32x4xf32, #tpu.memory_space<vmem>>, vector<1x32x4xf32>
      %132 = vector.shape_cast %131 : vector<1x32x4xf32> to vector<32x4xf32>
      %cst_96 = arith.constant dense<0.000000e+00> : vector<224x4xf32>
      %133 = tpu.matmul %130, %132, %cst_96 {dimension_numbers = #tpu.dot_dimension_numbers<[1], [0], [0], [1], [0, 0, 1, 1], [], []>} : vector<224x32xf32>, vector<32x4xf32>, vector<224x4xf32> -> vector<224x4xf32>
      %134 = arith.addf %129, %133 : vector<224x4xf32>
      %135 = vector.broadcast %29 : vector<1x4xf32> to vector<224x4xf32>
      %136 = arith.addf %134, %135 : vector<224x4xf32>
      %137 = arith.negf %136 : vector<224x4xf32>
      %138 = math.exp %137 : vector<224x4xf32>
      %cst_97 = arith.constant 1.000000e+00 : f32
      %139 = vector.broadcast %cst_97 : f32 to vector<224x4xf32>
      %140 = arith.addf %139, %138 : vector<224x4xf32>
      %141 = arith.divf %139, %140 : vector<224x4xf32>
      %142 = arith.index_cast %arg13 : i32 to index
      %c0_98 = arith.constant 0 : index
      %c0_99 = arith.constant 0 : index
      %143 = vector.load %arg9[%142, %c0_98, %c0_99] : memref<2x224x4xf32, #tpu.memory_space<vmem>>, vector<1x224x4xf32>
      %144 = vector.shape_cast %143 : vector<1x224x4xf32> to vector<224x4xf32>
      %145 = vector.shape_cast %141 : vector<224x4xf32> to vector<1x224x4xf32>
      tpu.vector_store %arg9[%142, %c0_98, %c0_99], %145 {strides = array<i32>} : memref<2x224x4xf32, #tpu.memory_space<vmem>>, vector<1x224x4xf32>,
    }
    %c2_i32_15 = arith.constant 2 : i32
    return
  }
  func.func @transform_0(%arg0: i32) -> (i32, i32, i32) {
    %c0_i32 = arith.constant 0 : i32
    %c0_i32_0 = arith.constant 0 : i32
    %c0_i32_1 = arith.constant 0 : i32
    return %arg0, %c0_i32, %c0_i32_0 : i32, i32, i32
  }
  func.func @transform_1(%arg0: i32) -> (i32, i32) {
    %c0_i32 = arith.constant 0 : i32
    %c0_i32_0 = arith.constant 0 : i32
    %c0_i32_1 = arith.constant 0 : i32
    return %c0_i32, %c0_i32_0 : i32, i32
  }
  func.func @transform_2(%arg0: i32) -> (i32, i32, i32) {
    %c0_i32 = arith.constant 0 : i32
    %c0_i32_0 = arith.constant 0 : i32
    %c0_i32_1 = arith.constant 0 : i32
    %c0_i32_2 = arith.constant 0 : i32
    return %c0_i32, %c0_i32_0, %c0_i32_1 : i32, i32, i32
  }
  func.func @transform_3(%arg0: i32) -> (i32, i32) {
    %c0_i32 = arith.constant 0 : i32
    %c0_i32_0 = arith.constant 0 : i32
    %c0_i32_1 = arith.constant 0 : i32
    return %c0_i32, %c0_i32_0 : i32, i32
  }
  func.func @transform_4(%arg0: i32) -> (i32, i32, i32) {
    %c0_i32 = arith.constant 0 : i32
    %c0_i32_0 = arith.constant 0 : i32
    %c0_i32_1 = arith.constant 0 : i32
    %c0_i32_2 = arith.constant 0 : i32
    return %c0_i32, %c0_i32_0, %c0_i32_1 : i32, i32, i32
  }
  func.func @transform_5(%arg0: i32) -> (i32, i32) {
    %c0_i32 = arith.constant 0 : i32
    %c0_i32_0 = arith.constant 0 : i32
    %c0_i32_1 = arith.constant 0 : i32
    return %c0_i32, %c0_i32_0 : i32, i32
  }
  func.func @transform_6(%arg0: i32) -> (i32, i32, i32) {
    %c0_i32 = arith.constant 0 : i32
    %c0_i32_0 = arith.constant 0 : i32
    %c0_i32_1 = arith.constant 0 : i32
    %c0_i32_2 = arith.constant 0 : i32
    return %c0_i32, %c0_i32_0, %c0_i32_1 : i32, i32, i32
  }
  func.func @transform_7(%arg0: i32) -> (i32, i32) {
    %c0_i32 = arith.constant 0 : i32
    %c0_i32_0 = arith.constant 0 : i32
    %c0_i32_1 = arith.constant 0 : i32
    return %c0_i32, %c0_i32_0 : i32, i32
  }
  func.func @transform_8(%arg0: i32) -> (i32, i32, i32) {
    %c0_i32 = arith.constant 0 : i32
    %c0_i32_0 = arith.constant 0 : i32
    %c0_i32_1 = arith.constant 0 : i32
    return %arg0, %c0_i32, %c0_i32_0 : i32, i32, i32
  }
}

</mosaic_0001>

<bundles_post_ra>
// kernel: decoder_forward.1
= control target key start
LH: loop header
LB: loop body
LE: loop exit
PB: predicated region body
PF: predicated region fallthrough
CT: control target
= control target key end

     0   :  { %v49_v0 = vlaneseq  ;;  %v4532_v1 = vmov 0.0   ;;  %vm7045_vm0 = vcmask 261120   ;;  %v7096_v45 = vmov 0  ;;  %s7036_s0 = inlined_call_operand.vmem [shape: f32[2,224,34], index: 0, kind: input, shape index: {}]   ;;  %s7037_s1 = inlined_call_operand.vmem [shape: f32[34,128], index: 1, kind: input, shape index: {}]   ;;  %s7038_s2 = inlined_call_operand.vmem [shape: f32[8,128,32], index: 2, kind: input, shape index: {}]   ;;  %s7039_s3 = inlined_call_operand.vmem [shape: f32[1,32], index: 3, kind: input, shape index: {}]   ;;  %s7040_s4 = inlined_call_operand.vmem [shape: f32[4,128,16], index: 4, kind: input, shape index: {}]   ;;  %s7041_s5 = inlined_call_operand.vmem [shape: f32[1,16], index: 5, kind: input, shape index: {}]   ;;  %s7042_s6 = inlined_call_operand.vmem [shape: f32[2,32,4], index: 6, kind: input, shape index: {}]   ;;  %s7043_s7 = inlined_call_operand.vmem [shape: f32[1,4], index: 7, kind: input, shape index: {}]   ;;  %s7044_s8 = inlined_call_operand.vmem [shape: f32[2,224,4], index: 8, kind: output, shape index: {}]  }
   0x1   :  { %29 = vst [vmem:[#allocation3 + $0x10] sm:$0xff] %v4532_v1  ;;  %v4587_v2 = vld [vmem:[%s7039_s3] sm:$0x1]  ;;  %v7098_v46 = vmov 0  ;;  %v7100_v47 = vmov 0  ;;  %v7102_v48 = vmov 0 }
   0x2   :  { %v4592_v3 = vld [vmem:[%s7041_s5] sm:$0x1]  ;;  %30 = vst [vmem:[#allocation3 + $0x18] sm:$0xff] %v4532_v1  ;;  %v4595_v4 = vshrl.u32 %v49_v0, 7  ;;  %v7105_v49 = vmov 0  ;;  %v7108_v50 = vmov 0 }
   0x3   :  { %7094 = vst [vmem:[#allocation5_spill] sm:$0xff] %v4592_v3  ;;  %v4600_v5 = vld [vmem:[%s7043_s7] sm:$0x1]  ;;  %v7111_v51 = vmov 0  ;;  %v7114_v52 = vmov 0  ;;  %v7117_v53 = vmov 0 }
   0x4   :  { %7095 = vst [vmem:[#allocation6_spill] sm:$0xff] %v4600_v5  ;;  %v4605_v6 = vadd.s32 8, %v4595_v4  ;;  %v4608_v7 = vadd.s32 16, %v4595_v4  ;;  %v4611_v8 = vadd.s32 24, %v4595_v4  ;;  %v4614_v9 = vadd.s32 32, %v4595_v4  ;;  %s4917_s3 = smov 0  }
   0x5   :  { %31 = vst [vmem:[#allocation3 + $0x20] sm:$0xff] %v4532_v1  ;;  %v4618_v10 = vadd.s32 40, %v4595_v4  ;;  %v4621_v11 = vadd.s32 48, %v4595_v4  ;;  %v4624_v12 = vadd.s32 56, %v4595_v4  ;;  %v4627_v13 = vadd.s32 64, %v4595_v4 }
   0x6   :  { %32 = vst [vmem:[#allocation3 + $0x28] sm:$0xff] %v4532_v1  ;;  %v4631_v14 = vadd.s32 72, %v4595_v4  ;;  %v4634_v15 = vadd.s32 80, %v4595_v4  ;;  %v4637_v16 = vadd.s32 88, %v4595_v4  ;;  %v4640_v17 = vadd.s32 96, %v4595_v4 }
   0x7   :  { %33 = vst [vmem:[#allocation3 + $0x30] sm:$0xff] %v4532_v1  ;;  %v4644_v18 = vadd.s32 104, %v4595_v4  ;;  %v4647_v19 = vadd.s32 112, %v4595_v4  ;;  %v4650_v20 = vadd.s32 120, %v4595_v4  ;;  %v4653_v21 = vadd.s32 128, %v4595_v4 }
   0x8   :  { %34 = vst [vmem:[#allocation3 + $0x38] sm:$0xff] %v4532_v1  ;;  %v4657_v22 = vadd.s32 136, %v4595_v4  ;;  %v4660_v23 = vadd.s32 144, %v4595_v4  ;;  %v4663_v24 = vadd.s32 152, %v4595_v4  ;;  %v70_v25 = vand.u32 15, %v4595_v4 }
   0x9   :  { %35 = vst [vmem:[#allocation3 + $0x40] sm:$0x1] %v4532_v1  ;;  %v71_v26 = vand.u32 15, %v4605_v6  ;;  %v72_v27 = vand.u32 15, %v4608_v7  ;;  %v73_v28 = vand.u32 15, %v4611_v8  ;;  %v74_v29 = vand.u32 15, %v4614_v9 }
   0xa   :  { %36 = vst [vmem:[#allocation3 + $0xde] sm:$0xff] %v4532_v1  ;;  %v75_v30 = vand.u32 15, %v4618_v10  ;;  %v76_v31 = vand.u32 15, %v4621_v11  ;;  %v77_v32 = vand.u32 15, %v4624_v12  ;;  %v78_v33 = vand.u32 15, %v4627_v13 }
   0xb   :  { %37 = vst [vmem:[#allocation3 + $0xe6] sm:$0xff] %v4532_v1  ;;  %v79_v34 = vand.u32 15, %v4631_v14  ;;  %v80_v35 = vand.u32 15, %v4634_v15  ;;  %v7047_v36 = vand.u32 15, %v4637_v16  ;;  %v82_v37 = vand.u32 15, %v4640_v17 }
   0xc   :  { %38 = vst [vmem:[#allocation3 + $0xee] sm:$0xff] %v4532_v1  ;;  %v7046_v38 = vand.u32 15, %v4644_v18  ;;  %v84_v39 = vand.u32 15, %v4647_v19  ;;  %v85_v40 = vand.u32 15, %v4650_v20  ;;  %v86_v41 = vand.u32 15, %v4653_v21 }
   0xd   :  { %39 = vst [vmem:[#allocation3 + $0xf6] sm:$0xff] %v4532_v1  ;;  %v87_v42 = vand.u32 15, %v4657_v22  ;;  %v88_v43 = vand.u32 15, %v4660_v23  ;;  %v89_v44 = vand.u32 15, %v4663_v24  ;;  %vm4690_vm2 = vcmp.ge.s32.totalorder %v70_v25, 3 }
   0xe   :  { %40 = vst [vmem:[#allocation3 + $0xfe] sm:$0xff] %v4532_v1  ;;  %v7097_v45 = vsel %vm4690_vm2, 4294967295, %v7096_v45  ;;  %vm4695_vm3 = vcmp.ge.s32.totalorder %v72_v27, 3  ;;  %vm4699_vm4 = vcmp.ge.s32.totalorder %v74_v29, 3  ;;  %vm4703_vm5 = vcmp.ge.s32.totalorder %v76_v31, 3 }
   0xf   :  { %41 = vst [vmem:[#allocation3 + $0x106] sm:$0xff] %v4532_v1  ;;  %v7099_v46 = vsel %vm4695_vm3, 4294967295, %v7098_v46  ;;  %v7101_v47 = vsel %vm4699_vm4, 4294967295, %v7100_v47  ;;  %v7103_v48 = vsel %vm4703_vm5, 4294967295, %v7102_v48  ;;  %vm4707_vm6 = vcmp.ge.s32.totalorder %v78_v33, 3 }
  0x10   :  { %42 = vst [vmem:[#allocation3 + $0x10e] sm:$0xf] %v4532_v1  ;;  %v7106_v49 = vsel %vm4707_vm6, 4294967295, %v7105_v49  ;;  %vm4711_vm7 = vcmp.ge.s32.totalorder %v80_v35, 3  ;;  %vm4715_vm8 = vcmp.ge.s32.totalorder %v82_v37, 3  ;;  %vm4719_vm9 = vcmp.ge.s32.totalorder %v84_v39, 3 }
  0x11   :  { %7104 = vst [vmem:[#allocation7_spill] sm:$0xff] %v7103_v48  ;;  %v7109_v50 = vsel %vm4711_vm7, 4294967295, %v7108_v50  ;;  %v7112_v51 = vsel %vm4715_vm8, 4294967295, %v7111_v51  ;;  %v7115_v52 = vsel %vm4719_vm9, 4294967295, %v7114_v52  ;;  %vm4723_vm10 = vcmp.ge.s32.totalorder %v86_v41, 3 }
  0x12   :  { %7107 = vst [vmem:[#allocation8_spill] sm:$0xff] %v7106_v49  ;;  %v7118_v53 = vsel %vm4723_vm10, 4294967295, %v7117_v53  ;;  %vm4729_vm11 = vcmp.ge.s32.totalorder %v88_v43, 3  ;;  %v7120_v54 = vmov 0  ;;  %vm4735_vm12 = vcmp.le.s32.totalorder %v71_v26, 12 }
  0x13   :  { %7110 = vst [vmem:[#allocation9_spill] sm:$0xff] %v7109_v50  ;;  %v7121_v54 = vsel %vm4729_vm11, 4294967295, %v7120_v54  ;;  %vm4741_vm13 = vcmp.le.s32.totalorder %v73_v28, 12  ;;  %vm4747_vm14 = vcmp.le.s32.totalorder %v75_v30, 12  ;;  %vm4755_vm15 = vcmp.le.s32.totalorder %v77_v32, 12 }
  0x14   :  { %7113 = vst [vmem:[#allocation10_spill] sm:$0xff] %v7112_v51  ;;  %v7129_v58 = vmov 0  ;;  %vm4761_vm1 = vcmp.le.s32.totalorder %v79_v34, 12  ;;  %v7132_v59 = vmov 0  ;;  %vm4767_vm11 = vcmp.le.s32.totalorder %v7047_v36, 12 }
  0x15   :  { %7116 = vst [vmem:[#allocation11_spill] sm:$0xff] %v7115_v52  ;;  %v7130_v58 = vsel %vm4755_vm15, 4294967295, %v7129_v58  ;;  %v7133_v59 = vsel %vm4761_vm1, 4294967295, %v7132_v59  ;;  %v7135_v60 = vmov 0  ;;  %v7138_v61 = vmov 0 }
  0x16   :  { %7119 = vst [vmem:[#allocation12_spill] sm:$0xff] %v7118_v53  ;;  %v7136_v60 = vsel %vm4767_vm11, 4294967295, %v7135_v60  ;;  %vm7141_vm10 = vcmask 261120   ;;  %vm4779_vm9 = vcmp.le.s32.totalorder %v85_v40, 12  ;;  %v7142_v62 = vmov 0 }
  0x17   :  { %44 = vst.msk [vmem:[#allocation4] sm:$0xff] %vm7045_vm0, %v4532_v1  ;;  %v7143_v62 = vsel %vm4779_vm9, 4294967295, %v7142_v62  ;;  %vm4783_vm8 = vcmp.le.s32.totalorder %v87_v42, 12  ;;  %v7145_v63 = vmov 0  ;;  %vm4787_vm7 = vcmp.le.s32.totalorder %v89_v44, 12 }
  0x18   :  { %7122 = vst [vmem:[#allocation13_spill] sm:$0xff] %v7121_v54  ;;  %v7146_v63 = vsel %vm4783_vm8, 4294967295, %v7145_v63  ;;  %v7148_v0 = vmov 0  ;;  %v150_v7 = vadd.s32 160, %v4595_v4  ;;  %vm7151_vm11 = vcmask 260096  }
  0x19   :  { %45 = vst.msk [vmem:[#allocation4 + $0x8] sm:$0xff] %vm7045_vm0, %v4532_v1  ;;  %vm4773_vm0 = vcmp.le.s32.totalorder %v7046_v38, 12  ;;  %v7149_v0 = vsel %vm4787_vm7, 4294967295, %v7148_v0  ;;  %v151_v9 = vadd.s32 168, %v4595_v4  ;;  %v152_v11 = vadd.s32 176, %v4595_v4 }
  0x1a   :  { %7131 = vst [vmem:[#allocation14_spill] sm:$0xff] %v7130_v58  ;;  %v7139_v61 = vsel %vm4773_vm0, 4294967295, %v7138_v61  ;;  %v153_v13 = vadd.s32 184, %v4595_v4  ;;  %v154_v15 = vadd.s32 192, %v4595_v4  ;;  %v155_v17 = vadd.s32 200, %v4595_v4 }
  0x1b   :  { %7134 = vst [vmem:[#allocation15_spill] sm:$0xff] %v7133_v59  ;;  %v157_v19 = vand.u32 15, %v150_v7  ;;  %v7152_v20 = vmov 0  ;;  %vm4803_vm7 = vcmp.ge.s32.totalorder %v72_v27, 1  ;;  %v7155_v21 = vmov 0 }
  0x1c   :  { %7137 = vst [vmem:[#allocation16_spill] sm:$0xff] %v7136_v60  ;;  %v7156_v21 = vsel %vm4803_vm7, 4294967295, %v7155_v21  ;;  %v159_v22 = vand.u32 15, %v152_v11  ;;  %v160_v23 = vand.u32 15, %v153_v13  ;;  %v161_v24 = vand.u32 15, %v154_v15 }
  0x1d   :  { %7140 = vst [vmem:[#allocation17_spill] sm:$0xff] %v7139_v61  ;;  %v162_v38 = vand.u32 15, %v155_v17  ;;  %v7158_v36 = vmov 0  ;;  %vm4811_vm8 = vcmp.ge.s32.totalorder %v76_v31, 1  ;;  %v7161_v4 = vmov 0 }
  0x1e   :  { %46 = vst.msk [vmem:[#allocation4 + $0xe1] sm:$0xff] %vm7141_vm10, %v4532_v1  ;;  %vm4799_vm10 = vcmp.ge.s32.totalorder %v70_v25, 1  ;;  %v7162_v4 = vsel %vm4811_vm8, 4294967295, %v7161_v4  ;;  %vm4815_vm9 = vcmp.ge.s32.totalorder %v78_v33, 1  ;;  %v7164_v25 = vmov 0 }
  0x1f   :  { %7144 = vst [vmem:[#allocation18_spill] sm:$0xff] %v7143_v62  ;;  %v7153_v20 = vsel %vm4799_vm10, 4294967295, %v7152_v20  ;;  %v7165_v25 = vsel %vm4815_vm9, 4294967295, %v7164_v25  ;;  %vm4819_vm10 = vcmp.ge.s32.totalorder %v80_v35, 1  ;;  %v7167_v27 = vmov 0 }
  0x20   :  { %7147 = vst [vmem:[#allocation19_spill] sm:$0xff] %v7146_v63  ;;  %v7168_v27 = vsel %vm4819_vm10, 4294967295, %v7167_v27  ;;  %vm4823_vm7 = vcmp.ge.s32.totalorder %v82_v37, 1  ;;  %v7170_v7 = vmov 0  ;;  %vm4827_vm0 = vcmp.ge.s32.totalorder %v84_v39, 1 }
  0x21   :  { %7150 = vst [vmem:[#allocation20_spill] sm:$0xff] %v7149_v0  ;;  %v7171_v7 = vsel %vm4823_vm7, 4294967295, %v7170_v7  ;;  %v7176_v31 = vmov 0  ;;  %vm4835_vm8 = vcmp.ge.s32.totalorder %v88_v43, 1  ;;  %v7179_v33 = vmov 0 }
  0x22   :  { %48 = vst.msk [vmem:[#allocation4 + $0xe9] sm:$0x7f] %vm7151_vm11, %v4532_v1  ;;  %v158_v1 = vand.u32 15, %v151_v9  ;;  %vm4807_vm11 = vcmp.ge.s32.totalorder %v74_v29, 1  ;;  %v7173_v29 = vmov 0  ;;  %v7180_v33 = vsel %vm4835_vm8, 4294967295, %v7179_v33 }
  0x23   :  { %7154 = vst [vmem:[#allocation21_spill] sm:$0xff] %v7153_v20  ;;  %v7159_v36 = vsel %vm4807_vm11, 4294967295, %v7158_v36  ;;  %v7174_v29 = vsel %vm4827_vm0, 4294967295, %v7173_v29  ;;  %vm4831_vm11 = vcmp.ge.s32.totalorder %v86_v41, 1  ;;  %vm4839_vm9 = vcmp.ge.s32.totalorder %v157_v19, 1 }
  0x24   :  { %7157 = vst [vmem:[#allocation22_spill] sm:$0xff] %v7156_v21  ;;  %v7177_v31 = vsel %vm4831_vm11, 4294967295, %v7176_v31  ;;  %v7182_v35 = vmov 0  ;;  %vm4843_vm10 = vcmp.ge.s32.totalorder %v159_v22, 1  ;;  %v7185_v37 = vmov 0 }
  0x25   :  { %7160 = vst [vmem:[#allocation23_spill] sm:$0xff] %v7159_v36  ;;  %v7183_v35 = vsel %vm4839_vm9, 4294967295, %v7182_v35  ;;  %v7186_v37 = vsel %vm4843_vm10, 4294967295, %v7185_v37  ;;  %vm4847_vm7 = vcmp.ge.s32.totalorder %v161_v24, 1  ;;  %v7188_v39 = vmov 0 }
  0x26   :  { %7163 = vst [vmem:[#allocation24_spill] sm:$0xff] %v7162_v4  ;;  %v7189_v39 = vsel %vm4847_vm7, 4294967295, %v7188_v39  ;;  %vm4853_vm0 = vcmp.le.s32.totalorder %v71_v26, 13  ;;  %v7191_v41 = vmov 0  ;;  %vm4859_vm8 = vcmp.le.s32.totalorder %v73_v28, 13 }
  0x27   :  { %7166 = vst [vmem:[#allocation25_spill] sm:$0xff] %v7165_v25  ;;  %v7192_v41 = vsel %vm4853_vm0, 4294967295, %v7191_v41  ;;  %v7194_v43 = vmov 0  ;;  %vm4865_vm9 = vcmp.le.s32.totalorder %v75_v30, 13  ;;  %v7197_v9 = vmov 0 }
  0x28   :  { %7169 = vst [vmem:[#allocation26_spill] sm:$0xff] %v7168_v27  ;;  %v7195_v43 = vsel %vm4859_vm8, 4294967295, %v7194_v43  ;;  %v7198_v9 = vsel %vm4865_vm9, 4294967295, %v7197_v9  ;;  %vm4871_vm7 = vcmp.le.s32.totalorder %v77_v32, 13  ;;  %v7200_v6 = vmov 0 }
  0x29   :  { %7172 = vst [vmem:[#allocation27_spill] sm:$0xff] %v7171_v7  ;;  %v7201_v6 = vsel %vm4871_vm7, 4294967295, %v7200_v6  ;;  %vm4877_vm10 = vcmp.le.s32.totalorder %v79_v34, 13  ;;  %v7203_v8 = vmov 0  ;;  %v7206_v26 = vand.u32 15, %v4637_v16 }
  0x2a   :  { %7175 = vst [vmem:[#allocation28_spill] sm:$0xff] %v7174_v29  ;;  %v7204_v8 = vsel %vm4877_vm10, 4294967295, %v7203_v8  ;;  %v7207_v10 = vmov 0  ;;  %v7210_v28 = vand.u32 15, %v4644_v18  ;;  %v7211_v12 = vmov 0 }
  0x2b   :  { %7178 = vst [vmem:[#allocation29_spill] sm:$0xff] %v7177_v31  ;;  %vm4883_vm11 = vcmp.le.s32.totalorder %v7206_v26, 13  ;;  %vm4893_vm8 = vcmp.le.s32.totalorder %v85_v40, 13  ;;  %v7214_v30 = vmov 0  ;;  %vm4897_vm7 = vcmp.le.s32.totalorder %v87_v42, 13 }
  0x2c   :  { %7181 = vst [vmem:[#allocation30_spill] sm:$0xff] %v7180_v33  ;;  %v7208_v10 = vsel %vm4883_vm11, 4294967295, %v7207_v10  ;;  %vm4889_vm9 = vcmp.le.s32.totalorder %v7210_v28, 13  ;;  %v7215_v30 = vsel %vm4893_vm8, 4294967295, %v7214_v30  ;;  %v7217_v14 = vmov 0 }
  0x2d   :  { %7184 = vst [vmem:[#allocation31_spill] sm:$0xff] %v7183_v35  ;;  %v7212_v12 = vsel %vm4889_vm9, 4294967295, %v7211_v12  ;;  %v7218_v14 = vsel %vm4897_vm7, 4294967295, %v7217_v14  ;;  %vm4901_vm10 = vcmp.le.s32.totalorder %v89_v44, 13  ;;  %v7220_v16 = vmov 0 }
  0x2e   :  { %7187 = vst [vmem:[#allocation32_spill] sm:$0xff] %v7186_v37  ;;  %v7221_v16 = vsel %vm4901_vm10, 4294967295, %v7220_v16  ;;  %vm4905_vm0 = vcmp.le.s32.totalorder %v158_v1, 13  ;;  %v7223_v32 = vmov 0  ;;  %vm4909_vm11 = vcmp.le.s32.totalorder %v160_v23, 13 }
  0x2f   :  { %7190 = vst [vmem:[#allocation33_spill] sm:$0xff] %v7189_v39  ;;  %v7224_v32 = vsel %vm4905_vm0, 4294967295, %v7223_v32  ;;  %v7226_v18 = vmov 0  ;;  %vm4913_vm9 = vcmp.le.s32.totalorder %v162_v38, 13  ;;  %v7229_v34 = vmov 0 }
  0x30   :  { %7193 = vst [vmem:[#allocation34_spill] sm:$0xff] %v7192_v41  ;;  %v7227_v18 = vsel %vm4909_vm11, 4294967295, %v7226_v18  ;;  %v7230_v34 = vsel %vm4913_vm9, 4294967295, %v7229_v34 }
  0x31   :  { %7196 = vst [vmem:[#allocation35_spill] sm:$0xff] %v7195_v43 }
  0x32   :  { %7199 = vst [vmem:[#allocation36_spill] sm:$0xff] %v7198_v9 }
  0x33   :  { %7202 = vst [vmem:[#allocation37_spill] sm:$0xff] %v7201_v6 }
  0x34   :  { %7205 = vst [vmem:[#allocation38_spill] sm:$0xff] %v7204_v8 }
  0x35   :  { %7209 = vst [vmem:[#allocation39_spill] sm:$0xff] %v7208_v10 }
  0x36   :  { %7213 = vst [vmem:[#allocation40_spill] sm:$0xff] %v7212_v12 }
  0x37   :  { %7216 = vst [vmem:[#allocation41_spill] sm:$0xff] %v7215_v30 }
  0x38   :  { %7219 = vst [vmem:[#allocation42_spill] sm:$0xff] %v7218_v14 }
  0x39   :  { %7222 = vst [vmem:[#allocation43_spill] sm:$0xff] %v7221_v16 }
  0x3a   :  { %7225 = vst [vmem:[#allocation44_spill] sm:$0xff] %v7224_v32 }
  0x3b   :  { %7228 = vst [vmem:[#allocation45_spill] sm:$0xff] %v7227_v18 }
  0x3c   :  { %7231 = vst [vmem:[#allocation46_spill] sm:$0xff] %v7230_v34 }
  0x3d LB: > { %v342_v40 = vld [vmem:[%s7037_s1 + $0x20] sm:$0x3]  ;;  %vm428_vm0 = vcmask 1041408   ;;  %v341_v38 = vld [vmem:[%s7037_s1 + $0x18] sm:$0xff]  ;;  %v340_v42 = vld [vmem:[%s7037_s1 + $0x10] sm:$0xff]  ;;  %s308_s15 = smul.u32 224, %s4530_s3  ;;  %vm7262_vm2 = vnez %v7097_v45  ;;  %vm7263_vm3 = vnez %v7099_v46  ;;  %vm7266_vm4 = vnez %v7101_v47  ;;  %s4530_s3 = sphi %s4917_s3, %s307_s3  }
  0x3e   : > { %4089 = vmatpush.msk.msra.mxu0 %vm428_vm0, %v342_v40  ;;  %v339_v44 = vld [vmem:[%s7037_s1 + $0x8] sm:$0xff]  ;;  %v338_v11 = vld [vmem:[%s7037_s1] sm:$0xff]  ;;  %vm343_vm0 = vcmask 277504   ;;  %v4196_v27 = vld [vmem:[%s7038_s2 + $0x2f0] sm:$0xff]  ;;  %vm7089_vm9 = vcmask 1046528   ;;  %s4533_s12 = smov 96  }
  0x3f   : > { %s4940_s20 = scalar_lea.vmem %s7036_s0, %s308_s15  ;;  %v4143_v5 = vld [vmem:[%s7038_s2 + $0x148] sm:$0xff]  ;;  %v4142_v39 = vld [vmem:[%s7038_s2 + $0x140] sm:$0xff]  ;;  %v4200_v0 = vld [vmem:[%s7038_s2 + $0x310] sm:$0xff]  ;;  %s4534_s13 = smov 32  }
  0x40   : > { %444 = vmatpush.msra.mxu0 %v341_v38  ;;  %v310_v13 = vld [vmem:[%s4940_s20] sm:$0xff]  ;;  %v311_v15 = vld [vmem:[%s4940_s20 + $0x8] sm:$0xff]  ;;  %v312_v17 = vld [vmem:[%s4940_s20 + $0x10] sm:$0xff]  ;;  %s4535_s24 = smov 64   ;;  %s4536_s21 = smov 16  }
  0x41   : > { %v313_v19 = vld [vmem:[%s4940_s20 + $0x18] sm:$0xff]  ;;  %v314_v1 = vld [vmem:[%s4940_s20 + $0x20] sm:$0xff]  ;;  %v315_v22 = vld [vmem:[%s4940_s20 + $0x28] sm:$0xff]  ;;  %s307_s3 = sadd.s32 1, %s4530_s3  }
  0x42   : > { %445 = vmatpush.msra.mxu0 %v340_v42  ;;  %v316_v23 = vld [vmem:[%s4940_s20 + $0x30] sm:$0xff]  ;;  %v317_v24 = vld [vmem:[%s4940_s20 + $0x38] sm:$0xff]  ;;  %v318_v26 = vld [vmem:[%s4940_s20 + $0x40] sm:$0xff]  ;;  %p304_p0 = scmp.ge.s32.totalorder %s307_s3, 2  }
  0x43   : > { %v319_v28 = vld [vmem:[%s4940_s20 + $0x48] sm:$0xff]  ;;  %v320_v40 = vld [vmem:[%s4940_s20 + $0x50] sm:$0xff]  ;;  %v321_v38 = vld [vmem:[%s4940_s20 + $0x58] sm:$0xff] }
  0x44   : > { %446 = vmatpush.msra.mxu0 %v339_v44  ;;  %v4133_v42 = vld [vmem:[%s7038_s2 + $0xf8] sm:$0xff]  ;;  %v4132_v44 = vld [vmem:[%s7038_s2 + $0xf0] sm:$0xff]  ;;  %v4179_v31 = vld [vmem:[%s7038_s2 + $0x268] sm:$0xff] }
  0x45   : > { %690 = vmatpush.msra.mxu1 %v4133_v42  ;;  %v4122_v42 = vld [vmem:[%s7038_s2 + $0xa0] sm:$0xff]  ;;  %v4195_v25 = vld [vmem:[%s7038_s2 + $0x2e8] sm:$0xff]  ;;  %v4244_v59 = vld [vmem:[%s7040_s4 + $0xf0] sm:$0xff] }
  0x46   : > { %447 = vmatpush.msra.mxu0 %v338_v11  ;;  %v322_v11 = vld [vmem:[%s4940_s20 + $0x60] sm:$0xff] }
  0x47   : > { %4090 = vmatmul.msk.f32.vlgmr.msra.gmra.mxu0 %vm343_vm0, %v310_v13  ;;  %691 = vmatpush.msra.mxu1 %v4132_v44  ;;  %v4131_v13 = vld [vmem:[%s7038_s2 + $0xe8] sm:$0xff]  ;;  %v4121_v44 = vld [vmem:[%s7038_s2 + $0x98] sm:$0xff] }
  0x49   : > { %692 = vmatpush.msra.mxu1 %v4131_v13  ;;  %v325_v13 = vld [vmem:[%s4940_s20 + $0x78] sm:$0xff] }
  0x4f   : > { %4091 = vmatmul.msk.f32.gmra.mxu0 %vm343_vm0, %v311_v15  ;;  %v4130_v15 = vld [vmem:[%s7038_s2 + $0xe0] sm:$0xff] }
  0x50   : > { %693 = vmatpush.msra.mxu1 %v4130_v15  ;;  %v4119_v15 = vld [vmem:[%s7038_s2 + $0x88] sm:$0xff] }
  0x57   : > { %4092 = vmatmul.msk.f32.gmra.mxu0 %vm343_vm0, %v312_v17  ;;  %v4129_v17 = vld [vmem:[%s7038_s2 + $0xd8] sm:$0xff] }
  0x58   : > { %694 = vmatpush.msra.mxu1 %v4129_v17  ;;  %v4118_v17 = vld [vmem:[%s7038_s2 + $0x80] sm:$0xff] }
  0x5f   : > { %4093 = vmatmul.msk.f32.gmra.mxu0 %vm343_vm0, %v313_v19  ;;  %v4128_v19 = vld [vmem:[%s7038_s2 + $0xd0] sm:$0xff] }
  0x60   : > { %695 = vmatpush.msra.mxu1 %v4128_v19  ;;  %v651_v19 = vld [vmem:[%s7038_s2 + $0x70] sm:$0xff] }
  0x67   : > { %4094 = vmatmul.msk.f32.gmra.mxu0 %vm343_vm0, %v314_v1  ;;  %v323_v1 = vld [vmem:[%s4940_s20 + $0x68] sm:$0xff] }
  0x6f   : > { %4095 = vmatmul.msk.f32.gmra.mxu0 %vm343_vm0, %v315_v22  ;;  %v4127_v22 = vld [vmem:[%s7038_s2 + $0xc8] sm:$0xff] }
  0x70   : > { %696 = vmatpush.msra.mxu1 %v4127_v22 }
  0x77   : > { %4096 = vmatmul.msk.f32.gmra.mxu0 %vm343_vm0, %v316_v23  ;;  %v4126_v23 = vld [vmem:[%s7038_s2 + $0xc0] sm:$0xff] }
  0x78   : > { %697 = vmatpush.msra.mxu1 %v4126_v23  ;;  %v326_v23 = vld [vmem:[%s4940_s20 + $0x80] sm:$0xff] }
  0x7f   : > { %4097 = vmatmul.msk.f32.gmra.mxu0 %vm343_vm0, %v317_v24  ;;  %v652_v24 = vld [vmem:[%s7038_s2 + $0x78] sm:$0xff] }
  0x80   : > { %767 = vmatpush.msrb.mxu0 %v652_v24  ;;  %4366 = vmatpush.msra.mxu2 %v652_v24  ;;  %v650_v24 = vld [vmem:[%s7038_s2 + $0x68] sm:$0xff] }
  0x82   : > { %768 = vmatpush.msrb.mxu0 %v651_v19  ;;  %4367 = vmatpush.msra.mxu2 %v651_v19  ;;  %v649_v19 = vld [vmem:[%s7038_s2 + $0x60] sm:$0xff] }
  0x84   : > { %769 = vmatpush.msrb.mxu0 %v650_v24  ;;  %4368 = vmatpush.msra.mxu2 %v650_v24 }
  0x86   : > { %770 = vmatpush.msrb.mxu0 %v649_v19  ;;  %4369 = vmatpush.msra.mxu2 %v649_v19 }
  0x87   : > { %4098 = vmatmul.msk.f32.gmra.mxu0 %vm343_vm0, %v318_v26  ;;  %v4125_v26 = vld [vmem:[%s7038_s2 + $0xb8] sm:$0xff] }
  0x88   : > { %698 = vmatpush.msra.mxu1 %v4125_v26  ;;  %v4164_v26 = vld [vmem:[%s7038_s2 + $0x1f0] sm:$0xff] }
  0x8f   : > { %4099 = vmatmul.msk.f32.gmra.mxu0 %vm343_vm0, %v319_v28  ;;  %v4124_v28 = vld [vmem:[%s7038_s2 + $0xb0] sm:$0xff] }
  0x90   : > { %699 = vmatpush.msra.mxu1 %v4124_v28 }
  0x97   : > { %4100 = vmatmul.msk.f32.gmra.mxu0 %vm343_vm0, %v320_v40  ;;  %v324_v40 = vld [vmem:[%s4940_s20 + $0x70] sm:$0xff] }
  0x9f   : > { %4101 = vmatmul.msk.f32.gmra.mxu0 %vm343_vm0, %v321_v38  ;;  %v4123_v38 = vld [vmem:[%s7038_s2 + $0xa8] sm:$0xff] }
  0xa0   : > { %700 = vmatpush.msra.mxu1 %v4123_v38 }
  0xa2   : > { %701 = vmatpush.msra.mxu1 %v4122_v42 }
  0xa4   : > { %702 = vmatpush.msra.mxu1 %v4121_v44 }
  0xa7   : > { %4102 = vmatmul.msk.f32.gmra.mxu0 %vm343_vm0, %v322_v11  ;;  %v4120_v11 = vld [vmem:[%s7038_s2 + $0x90] sm:$0xff] }
  0xa8   : > { %703 = vmatpush.msra.mxu1 %v4120_v11  ;;  %v328_v11 = vld [vmem:[%s4940_s20 + $0x90] sm:$0xff] }
  0xaa   : > { %704 = vmatpush.msra.mxu1 %v4119_v15 }
  0xac   : > { %705 = vmatpush.msra.mxu1 %v4118_v17  ;;  %v4163_v17 = vld [vmem:[%s7038_s2 + $0x1e8] sm:$0xff] }
  0xaf   : > { %4103 = vmatmul.msk.f32.gmra.mxu0 %vm343_vm0, %v323_v1  ;;  %v4165_v1 = vld [vmem:[%s7038_s2 + $0x1f8] sm:$0xff] }
  0xb0   : > { %1015 = vmatpush.msrb.mxu1 %v4165_v1 }
  0xb2   : > { %1016 = vmatpush.msrb.mxu1 %v4164_v26 }
  0xb4   : > { %1017 = vmatpush.msrb.mxu1 %v4163_v17  ;;  %v645_v17 = vld [vmem:[%s7038_s2 + $0x40] sm:$0xff] }
  0xb7   : > { %4104 = vmatmul.msk.f32.gmra.mxu0 %vm343_vm0, %v324_v40  ;;  %v327_v40 = vld [vmem:[%s4940_s20 + $0x88] sm:$0xff] }
  0xbf   : > { %4105 = vmatmul.msk.f32.gmra.mxu0 %vm343_vm0, %v325_v13 }
  0xc4   : > { %v449_v22 = vpop.f32.mrf.mxu0 }
  0xc5   : > { %v329_v22 = vld [vmem:[%s4940_s20 + $0x98] sm:$0xff] }
  0xc7   : > { %4106 = vmatmul.msk.f32.gmra.mxu0 %vm343_vm0, %v326_v23 }
  0xcc   : > { %v452_v28 = vpop.f32.mrf.mxu0 }
  0xcd   : > { %v534_v38 = vmul.f32 0.1, %v452_v28 }
  0xcf   : > { %v562_v42 = vmax.f32 %v452_v28, %v534_v38  ;;  %4107 = vmatmul.msk.f32.gmra.mxu0 %vm343_vm0, %v327_v40  ;;  %v4162_v28 = vld [vmem:[%s7038_s2 + $0x1e0] sm:$0xff]  ;;  %v648_v40 = vld [vmem:[%s7038_s2 + $0x58] sm:$0xff]  ;;  %v647_v38 = vld [vmem:[%s7038_s2 + $0x50] sm:$0xff] }
  0xd0   : > { %1018 = vmatpush.msrb.mxu1 %v4162_v28  ;;  %4370 = vmatpush.msra.mxu2 %v648_v40 }
  0xd1   : > { %590 = vst [vmem:[#allocation2 + $0x8] sm:$0xff] %v562_v42  ;;  %771 = vmatpush.msrb.mxu0 %v648_v40  ;;  %v331_v40 = vld [vmem:[%s4940_s20 + $0xa8] sm:$0xff] }
  0xd2   : > { %4371 = vmatpush.msra.mxu2 %v647_v38 }
  0xd3   : > { %772 = vmatpush.msrb.mxu0 %v647_v38 }
  0xd4   : > { %v455_v44 = vpop.f32.mrf.mxu0 }
  0xd5   : > { %v535_v13 = vmul.f32 0.1, %v455_v44 }
  0xd7   : > { %v563_v15 = vmax.f32 %v455_v44, %v535_v13  ;;  %4108 = vmatmul.msk.f32.gmra.mxu0 %vm343_vm0, %v328_v11  ;;  %v330_v44 = vld [vmem:[%s4940_s20 + $0xa0] sm:$0xff]  ;;  %v646_v13 = vld [vmem:[%s7038_s2 + $0x48] sm:$0xff] }
  0xd8   : > { %4372 = vmatpush.msra.mxu2 %v646_v13  ;;  %773 = vmatpush.msrb.mxu0 %v646_v13  ;;  %v641_v13 = vld [vmem:[%s7038_s2 + $0x20] sm:$0xff] }
  0xd9   : > { %591 = vst [vmem:[#allocation2 + $0x10] sm:$0xff] %v563_v15 }
  0xda   : > { %4373 = vmatpush.msra.mxu2 %v645_v17  ;;  %774 = vmatpush.msrb.mxu0 %v645_v17 }
  0xdc   : > { %v458_v1 = vpop.f32.mrf.mxu0 }
  0xdd   : > { %v536_v23 = vmul.f32 0.1, %v458_v1 }
  0xdf   : > { %v564_v24 = vmax.f32 %v458_v1, %v536_v23  ;;  %4109 = vmatmul.msk.f32.gmra.mxu0 %vm343_vm0, %v329_v22  ;;  %v4161_v1 = vld [vmem:[%s7038_s2 + $0x1d8] sm:$0xff] }
  0xe0   : > { %v653_v26 = vld [vmem:[#allocation2 + $0xf] sm:$0xff]  ;;  %v644_v22 = vld [vmem:[%s7038_s2 + $0x38] sm:$0xff]  ;;  %1019 = vmatpush.msrb.mxu1 %v4161_v1 }
  0xe1   : > { %592 = vst [vmem:[#allocation2 + $0x18] sm:$0xff] %v564_v24  ;;  %706 = vmatmul.f32.vlgmr.msra.gmra.mxu1 %v653_v26  ;;  %v5080_v23 = vld [vmem:[%s7038_s2 + $0x178] sm:$0xff]  ;;  %4374 = vmatpush.msra.mxu2 %v644_v22  ;;  %v643_v24 = vld [vmem:[%s7038_s2 + $0x30] sm:$0xff] }
  0xe2   : > { %4382 = vmatpush.msra.mxu3 %v5080_v23  ;;  %v5089_v26 = vld [vmem:[%s7038_s2 + $0x170] sm:$0xff]  ;;  %775 = vmatpush.msrb.mxu0 %v644_v22  ;;  %v5121_v1 = vld [vmem:[%s7038_s2 + $0x158] sm:$0xff] }
  0xe3   : > { %4375 = vmatpush.msra.mxu2 %v643_v24  ;;  %v4160_v22 = vld [vmem:[%s7038_s2 + $0x1d0] sm:$0xff] }
  0xe4   : > { %v461_v42 = vpop.f32.mrf.mxu0  ;;  %4383 = vmatpush.msra.mxu3 %v5089_v26  ;;  %776 = vmatpush.msrb.mxu0 %v643_v24  ;;  %v639_v24 = vld [vmem:[%s7038_s2 + $0x10] sm:$0xff] }
  0xe5   : > { %v537_v11 = vmul.f32 0.1, %v461_v42  ;;  %1020 = vmatpush.msrb.mxu1 %v4160_v22  ;;  %v638_v22 = vld [vmem:[%s7038_s2 + $0x8] sm:$0xff] }
  0xe7   : > { %v565_v15 = vmax.f32 %v461_v42, %v537_v11  ;;  %4110 = vmatmul.msk.f32.gmra.mxu0 %vm343_vm0, %v330_v44  ;;  %v642_v42 = vld [vmem:[%s7038_s2 + $0x28] sm:$0xff] }
  0xe8   : > { %v654_v19 = vld [vmem:[#allocation2 + $0x17] sm:$0xff]  ;;  %v5099_v44 = vld [vmem:[%s7038_s2 + $0x168] sm:$0xff]  ;;  %4376 = vmatpush.msra.mxu2 %v642_v42  ;;  %777 = vmatpush.msrb.mxu0 %v642_v42  ;;  %v637_v42 = vld [vmem:[%s7038_s2] sm:$0xff] }
  0xe9   : > { %593 = vst [vmem:[#allocation2 + $0x20] sm:$0xff] %v565_v15  ;;  %709 = vmatmul.f32.gmra.mxu1 %v654_v19  ;;  %4384 = vmatpush.msra.mxu3 %v5099_v44  ;;  %v5109_v15 = vld [vmem:[%s7038_s2 + $0x160] sm:$0xff]  ;;  %v640_v19 = vld [vmem:[%s7038_s2 + $0x18] sm:$0xff] }
  0xea   : > { %4377 = vmatpush.msra.mxu2 %v641_v13  ;;  %778 = vmatpush.msrb.mxu0 %v641_v13  ;;  %v4141_v13 = vld [vmem:[%s7038_s2 + $0x138] sm:$0xff] }
  0xeb   : > { %4385 = vmatpush.msra.mxu3 %v5109_v15 }
  0xec   : > { %v464_v28 = vpop.f32.mrf.mxu0  ;;  %4378 = vmatpush.msra.mxu2 %v640_v19  ;;  %779 = vmatpush.msrb.mxu0 %v640_v19 }
  0xed   : > { %v538_v38 = vmul.f32 0.1, %v464_v28  ;;  %4386 = vmatpush.msra.mxu3 %v5121_v1 }
  0xee   : > { %4379 = vmatpush.msra.mxu2 %v639_v24  ;;  %780 = vmatpush.msrb.mxu0 %v639_v24  ;;  %v4138_v24 = vld [vmem:[%s7038_s2 + $0x120] sm:$0xff] }
  0xef   : > { %v566_v11 = vmax.f32 %v464_v28, %v538_v38  ;;  %4111 = vmatmul.msk.f32.gmra.mxu0 %vm343_vm0, %v331_v40  ;;  %v5133_v28 = vld [vmem:[%s7038_s2 + $0x150] sm:$0xff] }
  0xf0   : > { %v5111_v17 = vld [vmem:[#allocation2 + $0x1f] sm:$0xff]  ;;  %v332_v38 = vld [vmem:[%s4940_s20 + $0xb0] sm:$0xff]  ;;  %4387 = vmatpush.msra.mxu3 %v5133_v28  ;;  %4380 = vmatpush.msra.mxu2 %v638_v22 }
  0xf1   : > { %594 = vst [vmem:[#allocation2 + $0x28] sm:$0xff] %v566_v11  ;;  %712 = vmatmul.f32.gmra.mxu1 %v5111_v17  ;;  %781 = vmatpush.msrb.mxu0 %v638_v22  ;;  %v4159_v22 = vld [vmem:[%s7038_s2 + $0x1c8] sm:$0xff] }
  0xf2   : > { %4388 = vmatpush.msra.mxu3 %v4143_v5  ;;  %4381 = vmatpush.msra.mxu2 %v637_v42 }
  0xf3   : > { %782 = vmatpush.msrb.mxu0 %v637_v42  ;;  %1021 = vmatpush.msrb.mxu1 %v4159_v22 }
  0xf4   : > { %v467_v40 = vpop.f32.mrf.mxu0  ;;  %4389 = vmatpush.msra.mxu3 %v4142_v39 }
  0xf5   : > { %v539_v11 = vmul.f32 0.1, %v467_v40  ;;  %881 = vmatpush.msra.mxu0 %v5080_v23  ;;  %v4136_v23 = vld [vmem:[%s7038_s2 + $0x110] sm:$0xff] }
  0xf6   : > { %4390 = vmatpush.msra.mxu3 %v4141_v13 }
  0xf7   : > { %v567_v34 = vmax.f32 %v467_v40, %v539_v11  ;;  %4112 = vmatmul.msk.f32.gmra.mxu0 %vm343_vm0, %v332_v38  ;;  %v4140_v40 = vld [vmem:[%s7038_s2 + $0x130] sm:$0xff]  ;;  %v333_v11 = vld [vmem:[%s4940_s20 + $0xb8] sm:$0xff] }
  0xf8   : > { %v5150_v18 = vld [vmem:[#allocation2 + $0x27] sm:$0xff]  ;;  %4391 = vmatpush.msra.mxu3 %v4140_v40  ;;  %882 = vmatpush.msra.mxu0 %v5089_v26 }
  0xf9   : > { %595 = vst [vmem:[#allocation2 + $0x30] sm:$0xff] %v567_v34  ;;  %715 = vmatmul.f32.gmra.mxu1 %v5150_v18  ;;  %v4139_v34 = vld [vmem:[%s7038_s2 + $0x128] sm:$0xff]  ;;  %v4134_v26 = vld [vmem:[%s7038_s2 + $0x100] sm:$0xff] }
  0xfa   : > { %4392 = vmatpush.msra.mxu3 %v4139_v34  ;;  %883 = vmatpush.msra.mxu0 %v5099_v44  ;;  %v4158_v44 = vld [vmem:[%s7038_s2 + $0x1c0] sm:$0xff] }
  0xfb   : > { %1022 = vmatpush.msrb.mxu1 %v4158_v44  ;;  %v336_v44 = vld [vmem:[%s4940_s20 + $0xd0] sm:$0xff] }
  0xfc   : > { %v470_v38 = vpop.f32.mrf.mxu0  ;;  %4393 = vmatpush.msra.mxu3 %v4138_v24  ;;  %884 = vmatpush.msra.mxu0 %v5109_v15 }
  0xfd   : > { %v540_v37 = vmul.f32 0.1, %v470_v38 }
  0xfe   : > { %885 = vmatpush.msra.mxu0 %v5121_v1 }
  0xff   : > { %v568_v19 = vmax.f32 %v470_v38, %v540_v37  ;;  %4113 = vmatmul.msk.f32.gmra.mxu0 %vm343_vm0, %v333_v11  ;;  %v4137_v37 = vld [vmem:[%s7038_s2 + $0x118] sm:$0xff]  ;;  %v334_v38 = vld [vmem:[%s4940_s20 + $0xc0] sm:$0xff] }
 0x100   : > { %v5167_v32 = vld [vmem:[#allocation2 + $0x2f] sm:$0xff]  ;;  %4394 = vmatpush.msra.mxu3 %v4137_v37  ;;  %886 = vmatpush.msra.mxu0 %v5133_v28 }
 0x101   : > { %596 = vst [vmem:[#allocation2 + $0x38] sm:$0xff] %v568_v19  ;;  %718 = vmatmul.f32.gmra.mxu1 %v5167_v32  ;;  %v4135_v19 = vld [vmem:[%s7038_s2 + $0x108] sm:$0xff] }
 0x102   : > { %4395 = vmatpush.msra.mxu3 %v4136_v23  ;;  %887 = vmatpush.msra.mxu0 %v4143_v5  ;;  %v5278_v14 = vld [vmem:[#allocation2 + $0x2d] sm:$0xff] }
 0x104   : > { %v473_v42 = vpop.f32.mrf.mxu0  ;;  %4396 = vmatpush.msra.mxu3 %v4135_v19  ;;  %888 = vmatpush.msra.mxu0 %v4142_v39 }
 0x105   : > { %v541_v11 = vmul.f32 0.1, %v473_v42 }
 0x106   : > { %4397 = vmatpush.msra.mxu3 %v4134_v26  ;;  %889 = vmatpush.msra.mxu0 %v4141_v13 }
 0x107   : > { %v569_v22 = vmax.f32 %v473_v42, %v541_v11  ;;  %4114 = vmatmul.msk.f32.gmra.mxu0 %vm343_vm0, %v334_v38  ;;  %v335_v42 = vld [vmem:[%s4940_s20 + $0xc8] sm:$0xff] }
 0x108   : > { %v5191_v35 = vld [vmem:[#allocation2 + $0x37] sm:$0xff]  ;;  %890 = vmatpush.msra.mxu0 %v4140_v40 }
 0x109   : > { %597 = vst [vmem:[#allocation2 + $0x40] sm:$0xff] %v569_v22  ;;  %721 = vmatmul.f32.gmra.mxu1 %v5191_v35  ;;  %v4157_v22 = vld [vmem:[%s7038_s2 + $0x1b8] sm:$0xff]  ;;  %v4156_v40 = vld [vmem:[%s7038_s2 + $0x1b0] sm:$0xff] }
 0x10a   : > { %1023 = vmatpush.msrb.mxu1 %v4157_v22  ;;  %891 = vmatpush.msra.mxu0 %v4139_v34  ;;  %v5300_v12 = vld [vmem:[#allocation2 + $0x35] sm:$0xff] }
 0x10c   : > { %v476_v15 = vpop.f32.mrf.mxu0  ;;  %892 = vmatpush.msra.mxu0 %v4138_v24  ;;  %1024 = vmatpush.msrb.mxu1 %v4156_v40  ;;  %v337_v24 = vld [vmem:[%s4940_s20 + $0xd8] sm:$0xff]  ;;  %s6891_s20 = scalar_lea.vmem %s7044_s8, %s308_s15 }
 0x10d   : > { %v542_v38 = vmul.f32 0.1, %v476_v15 }
 0x10e   : > { %893 = vmatpush.msra.mxu0 %v4137_v37 }
 0x10f   : > { %v570_v11 = vmax.f32 %v476_v15, %v542_v38  ;;  %4115 = vmatmul.msk.f32.gmra.mxu0 %vm343_vm0, %v335_v42 }
 0x110   : > { %v5201_v1 = vld [vmem:[#allocation2 + $0x3f] sm:$0xff]  ;;  %894 = vmatpush.msra.mxu0 %v4136_v23 }
 0x111   : > { %598 = vst [vmem:[#allocation2 + $0x48] sm:$0xff] %v570_v11  ;;  %724 = vmatmul.f32.gmra.mxu1 %v5201_v1  ;;  %v5331_v8 = vld [vmem:[#allocation2 + $0x3d] sm:$0xff] }
 0x112   : > { %895 = vmatpush.msra.mxu0 %v4135_v19 }
 0x114   : > { %v479_v28 = vpop.f32.mrf.mxu0  ;;  %896 = vmatpush.msra.mxu0 %v4134_v26 }
 0x115   : > { %v543_v5 = vmul.f32 0.1, %v479_v28 }
 0x117   : > { %v571_v39 = vmax.f32 %v479_v28, %v543_v5  ;;  %4116 = vmatmul.msk.f32.gmra.mxu0 %vm343_vm0, %v336_v44  ;;  %v617_v28 = vld [vmem:[#allocation2 + $0xd] sm:$0xff] }
 0x118   : > { %v5209_v15 = vld [vmem:[#allocation2 + $0x47] sm:$0xff] }
 0x119   : > { %v5211_v13 = vld [vmem:[#allocation2 + $0x45] sm:$0xff]  ;;  %599 = vst [vmem:[#allocation2 + $0x50] sm:$0xff] %v571_v39  ;;  %727 = vmatmul.f32.gmra.mxu1 %v5209_v15 }
 0x11a   : > { %804 = vmatmul.f32.vlgmr.msra.gmra.mxu2 %v5211_v13  ;;  %v4155_v5 = vld [vmem:[%s7038_s2 + $0x1a8] sm:$0xff] }
 0x11b   : > { %1025 = vmatpush.msrb.mxu1 %v4155_v5 }
 0x11c   : > { %v482_v34 = vpop.f32.mrf.mxu0 }
 0x11d   : > { %v544_v42 = vmul.f32 0.1, %v482_v34 }
 0x11f   : > { %v572_v38 = vmax.f32 %v482_v34, %v544_v42  ;;  %4117 = vmatmul.msk.f32.gmra.mxu0 %vm343_vm0, %v337_v24  ;;  %v618_v34 = vld [vmem:[#allocation2 + $0x15] sm:$0xff]  ;;  %vm7088_vm0 = vcmask 1044480  }
 0x120   : > { %v5220_v37 = vld [vmem:[#allocation2 + $0x4f] sm:$0xff] }
 0x121   : > { %v5222_v11 = vld [vmem:[#allocation2 + $0x4d] sm:$0xff]  ;;  %600 = vst [vmem:[#allocation2 + $0x58] sm:$0xff] %v572_v38  ;;  %730 = vmatmul.f32.gmra.mxu1 %v5220_v37 }
 0x122   : > { %807 = vmatmul.f32.gmra.mxu2 %v5222_v11 }
 0x124   : > { %v485_v22 = vpop.f32.mrf.mxu0 }
 0x125   : > { %v545_v23 = vmul.f32 0.1, %v485_v22 }
 0x127   : > { %v573_v44 = vmax.f32 %v485_v22, %v545_v23  ;;  %783 = vmatmul.f32.vlgmr.msrb.gmra.mxu0 %v617_v28  ;;  %v4154_v22 = vld [vmem:[%s7038_s2 + $0x1a0] sm:$0xff] }
 0x128   : > { %v5226_v19 = vld [vmem:[#allocation2 + $0x57] sm:$0xff]  ;;  %1026 = vmatpush.msrb.mxu1 %v4154_v22 }
 0x129   : > { %v5228_v26 = vld [vmem:[#allocation2 + $0x55] sm:$0xff]  ;;  %601 = vst [vmem:[#allocation2 + $0x60] sm:$0xff] %v573_v44  ;;  %733 = vmatmul.f32.gmra.mxu1 %v5226_v19  ;;  %v5246_v44 = vld [vmem:[#allocation2 + $0x1d] sm:$0xff] }
 0x12a   : > { %810 = vmatmul.f32.gmra.mxu2 %v5228_v26  ;;  %918 = vmatmul.f32.vlgmr.msra.gmra.mxu3 %v5228_v26 }
 0x12c   : > { %v488_v39 = vpop.f32.mrf.mxu0 }
 0x12d   : > { %v546_v40 = vmul.f32 0.1, %v488_v39 }
 0x12f   : > { %v574_v24 = vmax.f32 %v488_v39, %v546_v40  ;;  %786 = vmatmul.f32.gmra.mxu0 %v618_v34  ;;  %v4153_v34 = vld [vmem:[%s7038_s2 + $0x198] sm:$0xff] }
 0x130   : > { %v5236_v42 = vld [vmem:[#allocation2 + $0x5f] sm:$0xff]  ;;  %1027 = vmatpush.msrb.mxu1 %v4153_v34 }
 0x131   : > { %v5238_v38 = vld [vmem:[#allocation2 + $0x5d] sm:$0xff]  ;;  %602 = vst [vmem:[#allocation2 + $0x68] sm:$0xff] %v574_v24  ;;  %736 = vmatmul.f32.gmra.mxu1 %v5236_v42 }
 0x132   : > { %813 = vmatmul.f32.gmra.mxu2 %v5238_v38  ;;  %921 = vmatmul.f32.gmra.mxu3 %v5238_v38  ;;  %v4181_v34 = vld [vmem:[%s7038_s2 + $0x278] sm:$0xff] }
 0x133   : > { %1149 = vmatpush.msrb.mxu2 %v4181_v34 }
 0x134   : > { %v491_v23 = vpop.f32.mrf.mxu0 }
 0x135   : > { %v547_v28 = vmul.f32 0.1, %v491_v23 }
 0x137   : > { %v575_v5 = vmax.f32 %v491_v23, %v547_v28  ;;  %789 = vmatmul.f32.gmra.mxu0 %v5246_v44  ;;  %v5259_v23 = vld [vmem:[#allocation2 + $0x25] sm:$0xff] }
 0x138   : > { %v5249_v39 = vld [vmem:[#allocation2 + $0x67] sm:$0xff] }
 0x139   : > { %v5251_v40 = vld [vmem:[#allocation2 + $0x65] sm:$0xff]  ;;  %603 = vst [vmem:[#allocation2 + $0x70] sm:$0xff] %v575_v5  ;;  %739 = vmatmul.f32.gmra.mxu1 %v5249_v39 }
 0x13a   : > { %816 = vmatmul.f32.gmra.mxu2 %v5251_v40  ;;  %924 = vmatmul.f32.gmra.mxu3 %v5251_v40 }
 0x13c   : > { %v494_v24 = vpop.f32.mrf.mxu0 }
 0x13d   : > { %v548_v22 = vmul.f32 0.1, %v494_v24 }
 0x13f   : > { %v576_v28 = vmax.f32 %v494_v24, %v548_v22  ;;  %792 = vmatmul.f32.gmra.mxu0 %v5259_v23  ;;  %v4152_v24 = vld [vmem:[%s7038_s2 + $0x190] sm:$0xff] }
 0x140   : > { %v5262_v16 = vld [vmem:[#allocation2 + $0x6f] sm:$0xff]  ;;  %1028 = vmatpush.msrb.mxu1 %v4152_v24  ;;  %v4178_v24 = vld [vmem:[%s7038_s2 + $0x260] sm:$0xff] }
 0x141   : > { %v5264_v5 = vld [vmem:[#allocation2 + $0x6d] sm:$0xff]  ;;  %604 = vst [vmem:[#allocation2 + $0x78] sm:$0xff] %v576_v28  ;;  %742 = vmatmul.f32.gmra.mxu1 %v5262_v16 }
 0x142   : > { %819 = vmatmul.f32.gmra.mxu2 %v5264_v5  ;;  %927 = vmatmul.f32.gmra.mxu3 %v5264_v5  ;;  %v4180_v28 = vld [vmem:[%s7038_s2 + $0x270] sm:$0xff] }
 0x143   : > { %1150 = vmatpush.msrb.mxu2 %v4180_v28 }
 0x144   : > { %v497_v22 = vpop.f32.mrf.mxu0 }
 0x145   : > { %v549_v33 = vmul.f32 0.1, %v497_v22  ;;  %1151 = vmatpush.msrb.mxu2 %v4179_v31  ;;  %v4177_v31 = vld [vmem:[%s7038_s2 + $0x258] sm:$0xff] }
 0x147   : > { %v577_v30 = vmax.f32 %v497_v22, %v549_v33  ;;  %795 = vmatmul.f32.gmra.mxu0 %v5278_v14  ;;  %1152 = vmatpush.msrb.mxu2 %v4178_v24  ;;  %v4176_v22 = vld [vmem:[%s7038_s2 + $0x250] sm:$0xff] }
 0x148   : > { %v5284_v29 = vld [vmem:[#allocation2 + $0x77] sm:$0xff] }
 0x149   : > { %v5286_v34 = vld [vmem:[#allocation2 + $0x75] sm:$0xff]  ;;  %605 = vst [vmem:[#allocation2 + $0x80] sm:$0xff] %v577_v30  ;;  %745 = vmatmul.f32.gmra.mxu1 %v5284_v29  ;;  %1153 = vmatpush.msrb.mxu2 %v4177_v31  ;;  %v4175_v30 = vld [vmem:[%s7038_s2 + $0x248] sm:$0xff]  ;;  %v4174_v31 = vld [vmem:[%s7038_s2 + $0x240] sm:$0xff] }
 0x14a   : > { %822 = vmatmul.f32.gmra.mxu2 %v5286_v34  ;;  %930 = vmatmul.f32.gmra.mxu3 %v5286_v34 }
 0x14b   : > { %1154 = vmatpush.msrb.mxu2 %v4176_v22  ;;  %v4173_v22 = vld [vmem:[%s7038_s2 + $0x238] sm:$0xff] }
 0x14c   : > { %v500_v33 = vpop.f32.mrf.mxu0 }
 0x14d   : > { %v550_v28 = vmul.f32 0.1, %v500_v33  ;;  %1155 = vmatpush.msrb.mxu2 %v4175_v30  ;;  %v4172_v30 = vld [vmem:[%s7038_s2 + $0x230] sm:$0xff] }
 0x14f   : > { %v578_v7 = vmax.f32 %v500_v33, %v550_v28  ;;  %798 = vmatmul.f32.gmra.mxu0 %v5300_v12  ;;  %v4151_v33 = vld [vmem:[%s7038_s2 + $0x188] sm:$0xff]  ;;  %v4197_v28 = vld [vmem:[%s7038_s2 + $0x2f8] sm:$0xff]  ;;  %1156 = vmatpush.msrb.mxu2 %v4174_v31 }
 0x150   : > { %v5306_v24 = vld [vmem:[#allocation2 + $0x7f] sm:$0xff]  ;;  %1029 = vmatpush.msrb.mxu1 %v4151_v33  ;;  %1283 = vmatpush.msrb.mxu3 %v4197_v28  ;;  %v4171_v28 = vld [vmem:[%s7038_s2 + $0x228] sm:$0xff] }
 0x151   : > { %v5308_v10 = vld [vmem:[#allocation2 + $0x7d] sm:$0xff]  ;;  %606 = vst [vmem:[#allocation2 + $0x88] sm:$0xff] %v578_v7  ;;  %748 = vmatmul.f32.gmra.mxu1 %v5306_v24  ;;  %1157 = vmatpush.msrb.mxu2 %v4173_v22 }
 0x152   : > { %825 = vmatmul.f32.gmra.mxu2 %v5308_v10  ;;  %933 = vmatmul.f32.gmra.mxu3 %v5308_v10  ;;  %v4150_v22 = vld [vmem:[%s7038_s2 + $0x180] sm:$0xff] }
 0x153   : > { %1284 = vmatpush.msrb.mxu3 %v4196_v27  ;;  %1158 = vmatpush.msrb.mxu2 %v4172_v30  ;;  %v4170_v27 = vld [vmem:[%s7038_s2 + $0x220] sm:$0xff]  ;;  %v4193_v30 = vld [vmem:[%s7038_s2 + $0x2d8] sm:$0xff] }
 0x154   : > { %v503_v7 = vpop.f32.mrf.mxu0  ;;  %1030 = vmatpush.msrb.mxu1 %v4150_v22  ;;  %v4168_v22 = vld [vmem:[%s7038_s2 + $0x210] sm:$0xff]  ;;  %v1522_v51 = vld [vmem:[#allocation2 + $0x7f] sm:$0xff] }
 0x155   : > { %v551_v33 = vmul.f32 0.1, %v503_v7  ;;  %1285 = vmatpush.msrb.mxu3 %v4195_v25  ;;  %v4213_v25 = vld [vmem:[%s7038_s2 + $0x378] sm:$0xff]  ;;  %1159 = vmatpush.msrb.mxu2 %v4171_v28  ;;  %v4192_v28 = vld [vmem:[%s7038_s2 + $0x2d0] sm:$0xff] }
 0x156   : > { %1417 = vmatpush.msrb.mxu0 %v4213_v25  ;;  %v4167_v25 = vld [vmem:[%s7038_s2 + $0x208] sm:$0xff] }
 0x157   : > { %v579_v31 = vmax.f32 %v503_v7, %v551_v33  ;;  %801 = vmatmul.f32.gmra.mxu0 %v5331_v8  ;;  %v4194_v7 = vld [vmem:[%s7038_s2 + $0x2e0] sm:$0xff]  ;;  %v4169_v33 = vld [vmem:[%s7038_s2 + $0x218] sm:$0xff]  ;;  %1160 = vmatpush.msrb.mxu2 %v4170_v27 }
 0x158   : > { %v5340_v6 = vld [vmem:[#allocation2 + $0x87] sm:$0xff]  ;;  %1286 = vmatpush.msrb.mxu3 %v4194_v7 }
 0x159   : > { %v5342_v4 = vld [vmem:[#allocation2 + $0x85] sm:$0xff]  ;;  %607 = vst [vmem:[#allocation2 + $0x90] sm:$0xff] %v579_v31  ;;  %751 = vmatmul.f32.gmra.mxu1 %v5340_v6  ;;  %v4212_v31 = vld [vmem:[%s7038_s2 + $0x370] sm:$0xff]  ;;  %1161 = vmatpush.msrb.mxu2 %v4169_v33  ;;  %v4209_v33 = vld [vmem:[%s7038_s2 + $0x358] sm:$0xff] }
 0x15a   : > { %828 = vmatmul.f32.gmra.mxu2 %v5342_v4  ;;  %936 = vmatmul.f32.gmra.mxu3 %v5342_v4  ;;  %v4211_v7 = vld [vmem:[%s7038_s2 + $0x368] sm:$0xff] }
 0x15b   : > { %1287 = vmatpush.msrb.mxu3 %v4193_v30  ;;  %1418 = vmatpush.msrb.mxu0 %v4212_v31  ;;  %v4191_v30 = vld [vmem:[%s7038_s2 + $0x2c8] sm:$0xff]  ;;  %v4229_v31 = vld [vmem:[%s7038_s2 + $0x3f8] sm:$0xff] }
 0x15c   : > { %v506_v9 = vpop.f32.mrf.mxu0  ;;  %1162 = vmatpush.msrb.mxu2 %v4168_v22  ;;  %1551 = vmatpush.msra.mxu1 %v4229_v31  ;;  %v4189_v22 = vld [vmem:[%s7038_s2 + $0x2b8] sm:$0xff]  ;;  %v4228_v31 = vld [vmem:[%s7038_s2 + $0x3f0] sm:$0xff]  ;;  %v1523_v60 = vld [vmem:[#allocation2 + $0x87] sm:$0xff] }
 0x15d   : > { %v552_v36 = vmul.f32 0.1, %v506_v9  ;;  %1288 = vmatpush.msrb.mxu3 %v4192_v28  ;;  %1419 = vmatpush.msrb.mxu0 %v4211_v7 }
 0x15e   : > { %v5377_v43 = vpop.f32.mrf.mxu1  ;;  %1163 = vmatpush.msrb.mxu2 %v4167_v25  ;;  %1552 = vmatpush.msra.mxu1 %v4228_v31 }
 0x15f   : > { %v580_v27 = vmax.f32 %v506_v9, %v552_v36  ;;  %897 = vmatmul.f32.vlgmr.msra.gmra.mxu0 %v5246_v44  ;;  %v4210_v36 = vld [vmem:[%s7038_s2 + $0x360] sm:$0xff]  ;;  %1289 = vmatpush.msrb.mxu3 %v4191_v30  ;;  %v4207_v30 = vld [vmem:[%s7038_s2 + $0x348] sm:$0xff] }
 0x160   : > { %v5386_v21 = vld [vmem:[#allocation2 + $0x8f] sm:$0xff]  ;;  %v4166_v9 = vld [vmem:[%s7038_s2 + $0x200] sm:$0xff]  ;;  %1420 = vmatpush.msrb.mxu0 %v4210_v36 }
 0x161   : > { %v5388_v41 = vld [vmem:[#allocation2 + $0x8d] sm:$0xff]  ;;  %608 = vst [vmem:[#allocation2 + $0x98] sm:$0xff] %v580_v27  ;;  %754 = vmatmul.f32.gmra.mxu1 %v5386_v21  ;;  %v4190_v44 = vld [vmem:[%s7038_s2 + $0x2c0] sm:$0xff]  ;;  %1164 = vmatpush.msrb.mxu2 %v4166_v9 }
 0x162   : > { %831 = vmatmul.f32.gmra.mxu2 %v5388_v41  ;;  %939 = vmatmul.f32.gmra.mxu3 %v5388_v41  ;;  %v4208_v27 = vld [vmem:[%s7038_s2 + $0x350] sm:$0xff] }
 0x163   : > { %1290 = vmatpush.msrb.mxu3 %v4190_v44  ;;  %1421 = vmatpush.msrb.mxu0 %v4209_v33  ;;  %v4188_v44 = vld [vmem:[%s7038_s2 + $0x2b0] sm:$0xff]  ;;  %v4187_v33 = vld [vmem:[%s7038_s2 + $0x2a8] sm:$0xff] }
 0x164   : > { %v509_v28 = vpop.f32.mrf.mxu0  ;;  %v1524_v50 = vld [vmem:[#allocation2 + $0x8f] sm:$0xff] }
 0x165   : > { %v553_v7 = vmul.f32 0.1, %v509_v28  ;;  %1291 = vmatpush.msrb.mxu3 %v4189_v22  ;;  %1422 = vmatpush.msrb.mxu0 %v4208_v27  ;;  %v4186_v22 = vld [vmem:[%s7038_s2 + $0x2a0] sm:$0xff]  ;;  %v4204_v27 = vld [vmem:[%s7038_s2 + $0x330] sm:$0xff] }
 0x166   : > { %v5414_v25 = vpop.f32.mrf.mxu1 }
 0x167   : > { %v581_v20 = vmax.f32 %v509_v28, %v553_v7  ;;  %900 = vmatmul.f32.gmra.mxu0 %v5259_v23  ;;  %v4206_v23 = vld [vmem:[%s7038_s2 + $0x340] sm:$0xff]  ;;  %1292 = vmatpush.msrb.mxu3 %v4188_v44 }
 0x168   : > { %v5420_v36 = vld [vmem:[#allocation2 + $0x97] sm:$0xff]  ;;  %1423 = vmatpush.msrb.mxu0 %v4207_v30 }
 0x169   : > { %v5422_v9 = vld [vmem:[#allocation2 + $0x95] sm:$0xff]  ;;  %609 = vst [vmem:[#allocation2 + $0xa0] sm:$0xff] %v581_v20  ;;  %757 = vmatmul.f32.gmra.mxu1 %v5420_v36  ;;  %1293 = vmatpush.msrb.mxu3 %v4187_v33 }
 0x16a   : > { %834 = vmatmul.f32.gmra.mxu2 %v5422_v9  ;;  %942 = vmatmul.f32.gmra.mxu3 %v5422_v9  ;;  %v4205_v20 = vld [vmem:[%s7038_s2 + $0x338] sm:$0xff] }
 0x16b   : > { %1424 = vmatpush.msrb.mxu0 %v4206_v23  ;;  %1294 = vmatpush.msrb.mxu3 %v4186_v22  ;;  %v4203_v23 = vld [vmem:[%s7038_s2 + $0x328] sm:$0xff]  ;;  %v4185_v33 = vld [vmem:[%s7038_s2 + $0x298] sm:$0xff] }
 0x16c   : > { %v512_v28 = vpop.f32.mrf.mxu0  ;;  %v4201_v22 = vld [vmem:[%s7038_s2 + $0x318] sm:$0xff] }
 0x16d   : > { %v554_v7 = vmul.f32 0.1, %v512_v28  ;;  %1425 = vmatpush.msrb.mxu0 %v4205_v20  ;;  %v4202_v20 = vld [vmem:[%s7038_s2 + $0x320] sm:$0xff]  ;;  %1295 = vmatpush.msrb.mxu3 %v4185_v33  ;;  %v4199_v33 = vld [vmem:[%s7038_s2 + $0x308] sm:$0xff] }
 0x16e   : > { %v5448_v30 = vpop.f32.mrf.mxu1 }
 0x16f   : > { %v582_v44 = vmax.f32 %v512_v28, %v554_v7  ;;  %903 = vmatmul.f32.gmra.mxu0 %v5278_v14  ;;  %v4184_v28 = vld [vmem:[%s7038_s2 + $0x290] sm:$0xff] }
 0x170   : > { %v5454_v31 = vld [vmem:[#allocation2 + $0x9f] sm:$0xff]  ;;  %1426 = vmatpush.msrb.mxu0 %v4204_v27  ;;  %v4183_v27 = vld [vmem:[%s7038_s2 + $0x288] sm:$0xff]  ;;  %1296 = vmatpush.msrb.mxu3 %v4184_v28 }
 0x171   : > { %v5456_v3 = vld [vmem:[#allocation2 + $0x9d] sm:$0xff]  ;;  %610 = vst [vmem:[#allocation2 + $0xa8] sm:$0xff] %v582_v44  ;;  %760 = vmatmul.f32.gmra.mxu1 %v5454_v31 }
 0x172   : > { %837 = vmatmul.f32.gmra.mxu2 %v5456_v3  ;;  %945 = vmatmul.f32.gmra.mxu3 %v5456_v3  ;;  %v4182_v28 = vld [vmem:[%s7038_s2 + $0x280] sm:$0xff] }
 0x173   : > { %1427 = vmatpush.msrb.mxu0 %v4203_v23  ;;  %1297 = vmatpush.msrb.mxu3 %v4183_v27 }
 0x174   : > { %v515_v7 = vpop.f32.mrf.mxu0 }
 0x175   : > { %1428 = vmatpush.msrb.mxu0 %v4202_v20  ;;  %v555_v44 = vmul.f32 0.1, %v515_v7  ;;  %1298 = vmatpush.msrb.mxu3 %v4182_v28 }
 0x176   : > { %v5479_v54 = vpop.f32.mrf.mxu1 }
 0x177   : > { %1429 = vmatpush.msrb.mxu0 %v4201_v22  ;;  %v583_v23 = vmax.f32 %v515_v7, %v555_v44  ;;  %v4227_v22 = vld [vmem:[%s7038_s2 + $0x3e8] sm:$0xff]  ;;  %v4198_v7 = vld [vmem:[%s7038_s2 + $0x300] sm:$0xff] }
 0x178   : > { %906 = vmatmul.f32.gmra.mxu0 %v5300_v12  ;;  %v5485_v63 = vld [vmem:[#allocation2 + $0xa7] sm:$0xff]  ;;  %1553 = vmatpush.msra.mxu1 %v4227_v22 }
 0x179   : > { %v5487_v20 = vld [vmem:[#allocation2 + $0xa5] sm:$0xff]  ;;  %1430 = vmatpush.msrb.mxu0 %v4200_v0  ;;  %611 = vst [vmem:[#allocation2 + $0xb0] sm:$0xff] %v583_v23  ;;  %763 = vmatmul.f32.gmra.mxu1 %v5485_v63 }
 0x17a   : > { %840 = vmatmul.f32.gmra.mxu2 %v5487_v20  ;;  %948 = vmatmul.f32.gmra.mxu3 %v5487_v20 }
 0x17b   : > { %1431 = vmatpush.msrb.mxu0 %v4199_v33  ;;  %v4226_v33 = vld [vmem:[%s7038_s2 + $0x3e0] sm:$0xff] }
 0x17c   : > { %v518_v27 = vpop.f32.mrf.mxu0  ;;  %1554 = vmatpush.msra.mxu1 %v4226_v33 }
 0x17d   : > { %1432 = vmatpush.msrb.mxu0 %v4198_v7  ;;  %v556_v0 = vmul.f32 0.1, %v518_v27 }
 0x17e   : > { %v5501_v44 = vpop.f32.mrf.mxu1 }
 0x17f   : > { %v584_v23 = vmax.f32 %v518_v27, %v556_v0 }
 0x180   : > { %909 = vmatmul.f32.gmra.mxu0 %v5331_v8  ;;  %v5504_v53 = vld [vmem:[#allocation2 + $0xad] sm:$0xff] }
 0x181   : > { %612 = vst [vmem:[#allocation2 + $0xb8] sm:$0xff] %v584_v23  ;;  %1031 = vmatmul.f32.vlgmr.msrb.gmra.mxu1 %v5111_v17 }
 0x182   : > { %1165 = vmatmul.f32.vlgmr.msrb.gmra.mxu2 %v5278_v14  ;;  %951 = vmatmul.f32.gmra.mxu3 %v5504_v53  ;;  %v4225_v14 = vld [vmem:[%s7038_s2 + $0x3d8] sm:$0xff] }
 0x183   : > { %1555 = vmatpush.msra.mxu1 %v4225_v14 }
 0x184   : > { %v521_v28 = vpop.f32.mrf.mxu0 }
 0x185   : > { %v557_v22 = vmul.f32 0.1, %v521_v28 }
 0x186   : > { %v5512_v7 = vpop.f32.mrf.mxu1 }
 0x187   : > { %v585_v27 = vmax.f32 %v521_v28, %v557_v22 }
 0x188   : > { %912 = vmatmul.f32.gmra.mxu0 %v5211_v13  ;;  %v5515_v0 = vld [vmem:[#allocation2 + $0xb5] sm:$0xff] }
 0x189   : > { %613 = vst [vmem:[#allocation2 + $0xc0] sm:$0xff] %v585_v27  ;;  %1034 = vmatmul.f32.gmra.mxu1 %v5150_v18 }
 0x18a   : > { %1168 = vmatmul.f32.gmra.mxu2 %v5300_v12  ;;  %954 = vmatmul.f32.gmra.mxu3 %v5515_v0  ;;  %v4224_v12 = vld [vmem:[%s7038_s2 + $0x3d0] sm:$0xff] }
 0x18b   : > { %1556 = vmatpush.msra.mxu1 %v4224_v12  ;;  %v4223_v12 = vld [vmem:[%s7038_s2 + $0x3c8] sm:$0xff] }
 0x18c   : > { %v524_v17 = vpop.f32.mrf.mxu0 }
 0x18d   : > { %v558_v23 = vmul.f32 0.1, %v524_v17  ;;  %1557 = vmatpush.msra.mxu1 %v4223_v12 }
 0x18e   : > { %v5523_v33 = vpop.f32.mrf.mxu1 }
 0x18f   : > { %v586_v28 = vmax.f32 %v524_v17, %v558_v23 }
 0x190   : > { %915 = vmatmul.f32.gmra.mxu0 %v5222_v11 }
 0x191   : > { %614 = vst [vmem:[#allocation2 + $0xc8] sm:$0xff] %v586_v28  ;;  %1037 = vmatmul.f32.gmra.mxu1 %v5167_v32 }
 0x192   : > { %1171 = vmatmul.f32.gmra.mxu2 %v5331_v8  ;;  %1299 = vmatmul.f32.vlgmr.msrb.gmra.mxu3 %v5167_v32 }
 0x194   : > { %v527_v18 = vpop.f32.mrf.mxu0 }
 0x195   : > { %v559_v22 = vmul.f32 0.1, %v527_v18 }
 0x196   : > { %v728_v27 = vpop.f32.mrf.mxu1 }
 0x197   : > { %v587_v14 = vmax.f32 %v527_v18, %v559_v22  ;;  %v4222_v22 = vld [vmem:[%s7038_s2 + $0x3c0] sm:$0xff] }
 0x198   : > { %1433 = vmatmul.f32.vlgmr.msrb.gmra.mxu0 %v5331_v8  ;;  %1558 = vmatpush.msra.mxu1 %v4222_v22 }
 0x199   : > { %615 = vst [vmem:[#allocation2 + $0xd0] sm:$0xff] %v587_v14  ;;  %1040 = vmatmul.f32.gmra.mxu1 %v5191_v35 }
 0x19a   : > { %1174 = vmatmul.f32.gmra.mxu2 %v5211_v13  ;;  %1302 = vmatmul.f32.gmra.mxu3 %v5191_v35 }
 0x19c   : > { %v530_v17 = vpop.f32.mrf.mxu0 }
 0x19d   : > { %v805_v32 = vpop.f32.mrf.mxu2  ;;  %v560_v23 = vmul.f32 0.1, %v530_v17 }
 0x19e   : > { %v806_v28 = vadd.f32 %v805_v32, %v728_v27  ;;  %v731_v62 = vpop.f32.mrf.mxu1 }
 0x19f   : > { %v588_v52 = vmax.f32 %v530_v17, %v560_v23 }
 0x1a0   : > { %1436 = vmatmul.f32.gmra.mxu0 %v5211_v13 }
 0x1a1   : > { %616 = vst [vmem:[#allocation2 + $0xd8] sm:$0xff] %v588_v52  ;;  %1043 = vmatmul.f32.gmra.mxu1 %v5201_v1 }
 0x1a2   : > { %1177 = vmatmul.f32.gmra.mxu2 %v5222_v11  ;;  %1305 = vmatmul.f32.gmra.mxu3 %v5201_v1 }
 0x1a5   : > { %v808_v35 = vpop.f32.mrf.mxu2 }
 0x1a6   : > { %v809_v8 = vadd.f32 %v808_v35, %v731_v62  ;;  %v734_v18 = vpop.f32.mrf.mxu1 }
 0x1a8   : > { %1439 = vmatmul.f32.gmra.mxu0 %v5222_v11  ;;  %v4221_v11 = vld [vmem:[%s7038_s2 + $0x3b8] sm:$0xff] }
 0x1a9   : > { %1046 = vmatmul.f32.gmra.mxu1 %v5209_v15 }
 0x1aa   : > { %1180 = vmatmul.f32.gmra.mxu2 %v5228_v26  ;;  %1308 = vmatmul.f32.gmra.mxu3 %v5209_v15 }
 0x1ab   : > { %1559 = vmatpush.msra.mxu1 %v4221_v11 }
 0x1ad   : > { %v811_v52 = vpop.f32.mrf.mxu2  ;;  %v919_v27 = vpop.f32.mrf.mxu3 }
 0x1ae   : > { %v812_v13 = vadd.f32 %v811_v52, %v734_v18  ;;  %v5550_v1 = vadd.f32 %v919_v27, %v806_v28  ;;  %v737_v62 = vpop.f32.mrf.mxu1 }
 0x1b0   : > { %1442 = vmatmul.f32.gmra.mxu0 %v5228_v26 }
 0x1b1   : > { %1049 = vmatmul.f32.gmra.mxu1 %v5220_v37 }
 0x1b2   : > { %1183 = vmatmul.f32.gmra.mxu2 %v5238_v38  ;;  %1311 = vmatmul.f32.gmra.mxu3 %v5220_v37  ;;  %v4220_v37 = vld [vmem:[%s7038_s2 + $0x3b0] sm:$0xff] }
 0x1b3   : > { %1560 = vmatpush.msra.mxu1 %v4220_v37 }
 0x1b5   : > { %v814_v15 = vpop.f32.mrf.mxu2  ;;  %v922_v17 = vpop.f32.mrf.mxu3 }
 0x1b6   : > { %v815_v14 = vadd.f32 %v814_v15, %v737_v62  ;;  %v5559_v32 = vadd.f32 %v922_v17, %v809_v8  ;;  %v740_v23 = vpop.f32.mrf.mxu1  ;;  %v4218_v15 = vld [vmem:[%s7038_s2 + $0x3a0] sm:$0xff] }
 0x1b8   : > { %1445 = vmatmul.f32.gmra.mxu0 %v5238_v38 }
 0x1b9   : > { %1052 = vmatmul.f32.gmra.mxu1 %v5226_v19 }
 0x1ba   : > { %1186 = vmatmul.f32.gmra.mxu2 %v5251_v40  ;;  %1314 = vmatmul.f32.gmra.mxu3 %v5226_v19 }
 0x1bd   : > { %v817_v26 = vpop.f32.mrf.mxu2  ;;  %v925_v12 = vpop.f32.mrf.mxu3 }
 0x1be   : > { %v818_v28 = vadd.f32 %v817_v26, %v740_v23  ;;  %v5568_v35 = vadd.f32 %v925_v12, %v812_v13  ;;  %v743_v8 = vpop.f32.mrf.mxu1  ;;  %v4219_v13 = vld [vmem:[%s7038_s2 + $0x3a8] sm:$0xff] }
 0x1bf   : > { %1561 = vmatpush.msra.mxu1 %v4219_v13 }
 0x1c0   : > { %7232 = vst [vmem:[#allocation47_spill] sm:$0xff] %v5568_v35  ;;  %1448 = vmatmul.f32.gmra.mxu0 %v5251_v40 }
 0x1c1   : > { %1055 = vmatmul.f32.gmra.mxu1 %v5236_v42 }
 0x1c2   : > { %1189 = vmatmul.f32.gmra.mxu2 %v5264_v5  ;;  %1317 = vmatmul.f32.gmra.mxu3 %v5236_v42 }
 0x1c3   : > { %1562 = vmatpush.msra.mxu1 %v4218_v15  ;;  %v5675_v15 = vld [vmem:[#allocation2 + $0xb7] sm:$0xff] }
 0x1c5   : > { %v820_v19 = vpop.f32.mrf.mxu2  ;;  %v928_v18 = vpop.f32.mrf.mxu3 }
 0x1c6   : > { %v821_v38 = vadd.f32 %v820_v19, %v743_v8  ;;  %v5574_v22 = vadd.f32 %v928_v18, %v815_v14  ;;  %v746_v52 = vpop.f32.mrf.mxu1 }
 0x1c8   : > { %7233 = vst [vmem:[#allocation48_spill] sm:$0xff] %v5574_v22  ;;  %1451 = vmatmul.f32.gmra.mxu0 %v5264_v5  ;;  %v5592_v5 = vpop.f32.mrf.mxu0 }
 0x1c9   : > { %1058 = vmatmul.f32.gmra.mxu1 %v5249_v39 }
 0x1ca   : > { %1192 = vmatmul.f32.gmra.mxu2 %v5286_v34  ;;  %1320 = vmatmul.f32.gmra.mxu3 %v5249_v39 }
 0x1cd   : > { %v823_v42 = vpop.f32.mrf.mxu2  ;;  %v931_v27 = vpop.f32.mrf.mxu3 }
 0x1ce   : > { %v824_v40 = vadd.f32 %v823_v42, %v746_v52  ;;  %v5583_v62 = vadd.f32 %v931_v27, %v818_v28  ;;  %v749_v11 = vpop.f32.mrf.mxu1  ;;  %v4215_v42 = vld [vmem:[%s7038_s2 + $0x388] sm:$0xff] }
 0x1d0   : > { %7234 = vst [vmem:[#allocation49_spill] sm:$0xff] %v5583_v62  ;;  %1454 = vmatmul.f32.gmra.mxu0 %v5286_v34  ;;  %v5607_v19 = vpop.f32.mrf.mxu0 }
 0x1d1   : > { %1061 = vmatmul.f32.gmra.mxu1 %v5262_v16 }
 0x1d2   : > { %1195 = vmatmul.f32.gmra.mxu2 %v5308_v10  ;;  %1323 = vmatmul.f32.gmra.mxu3 %v5262_v16  ;;  %v4217_v16 = vld [vmem:[%s7038_s2 + $0x398] sm:$0xff] }
 0x1d3   : > { %1563 = vmatpush.msra.mxu1 %v4217_v16 }
 0x1d5   : > { %v826_v39 = vpop.f32.mrf.mxu2  ;;  %v934_v17 = vpop.f32.mrf.mxu3 }
 0x1d6   : > { %v827_v14 = vadd.f32 %v826_v39, %v749_v11  ;;  %v5594_v23 = vadd.f32 %v934_v17, %v821_v38  ;;  %v752_v37 = vpop.f32.mrf.mxu1  ;;  %v1130_v11 = vld [vmem:[#allocation2 + $0xbd] sm:$0xff] }
 0x1d7   : > { %v5683_v17 = vld [vmem:[#allocation2 + $0xbf] sm:$0xff] }
 0x1d8   : > { %7235 = vst [vmem:[#allocation50_spill] sm:$0xff] %v5594_v23  ;;  %1457 = vmatmul.f32.gmra.mxu0 %v5308_v10  ;;  %v5621_v52 = vpop.f32.mrf.mxu0 }
 0x1d9   : > { %1064 = vmatmul.f32.gmra.mxu1 %v5284_v29 }
 0x1da   : > { %1198 = vmatmul.f32.gmra.mxu2 %v5342_v4  ;;  %1326 = vmatmul.f32.gmra.mxu3 %v5284_v29  ;;  %v4216_v29 = vld [vmem:[%s7038_s2 + $0x390] sm:$0xff] }
 0x1db   : > { %1564 = vmatpush.msra.mxu1 %v4216_v29 }
 0x1dd   : > { %v829_v34 = vpop.f32.mrf.mxu2  ;;  %v937_v28 = vpop.f32.mrf.mxu3  ;;  %1565 = vmatpush.msra.mxu1 %v4215_v42  ;;  %v1516_v42 = vld [vmem:[#allocation2 + $0x4f] sm:$0xff] }
 0x1de   : > { %v830_v26 = vadd.f32 %v829_v34, %v752_v37  ;;  %v5603_v12 = vadd.f32 %v937_v28, %v824_v40  ;;  %v5605_v8 = vpop.f32.mrf.mxu1  ;;  %v4214_v40 = vld [vmem:[%s7038_s2 + $0x380] sm:$0xff]  ;;  %v1398_v34 = vld [vmem:[#allocation2 + $0xcd] sm:$0xff] }
 0x1df   : > { %7237 = vst [vmem:[#allocation52_spill] sm:$0xff] %v5605_v8  ;;  %1566 = vmatpush.msra.mxu1 %v4214_v40  ;;  %v5690_v28 = vld [vmem:[#allocation2 + $0xc7] sm:$0xff] }
 0x1e0   : > { %7236 = vst [vmem:[#allocation51_spill] sm:$0xff] %v5603_v12  ;;  %1460 = vmatmul.f32.gmra.mxu0 %v5342_v4 }
 0x1e1   : > { %1067 = vmatmul.f32.gmra.mxu1 %v5306_v24 }
 0x1e2   : > { %1201 = vmatmul.f32.gmra.mxu2 %v5388_v41  ;;  %1329 = vmatmul.f32.gmra.mxu3 %v5306_v24 }
 0x1e5   : > { %v940_v10 = vpop.f32.mrf.mxu3 }
 0x1e6   : > { %v5616_v38 = vadd.f32 %v940_v10, %v827_v14  ;;  %v5618_v18 = vpop.f32.mrf.mxu1  ;;  %v1514_v14 = vld [vmem:[#allocation2 + $0x3f] sm:$0xff]  ;;  %v1399_v10 = vld [vmem:[#allocation2 + $0xd5] sm:$0xff] }
 0x1e7   : > { %7239 = vst [vmem:[#allocation54_spill] sm:$0xff] %v5618_v18 }
 0x1e8   : > { %7238 = vst [vmem:[#allocation53_spill] sm:$0xff] %v5616_v38  ;;  %1463 = vmatmul.f32.gmra.mxu0 %v5388_v41  ;;  %v5637_v41 = vpop.f32.mrf.mxu0 }
 0x1e9   : > { %1070 = vmatmul.f32.gmra.mxu1 %v5340_v6 }
 0x1ea   : > { %1204 = vmatmul.f32.gmra.mxu2 %v5422_v9  ;;  %1332 = vmatmul.f32.gmra.mxu3 %v5340_v6 }
 0x1ed   : > { %v943_v4 = vpop.f32.mrf.mxu3 }
 0x1ee   : > { %v5626_v24 = vadd.f32 %v943_v4, %v830_v26  ;;  %v5628_v13 = vpop.f32.mrf.mxu1  ;;  %v1515_v26 = vld [vmem:[#allocation2 + $0x47] sm:$0xff] }
 0x1ef   : > { %7241 = vst [vmem:[#allocation56_spill] sm:$0xff] %v5628_v13  ;;  %v1519_v13 = vld [vmem:[#allocation2 + $0x67] sm:$0xff] }
 0x1f0   : > { %7240 = vst [vmem:[#allocation55_spill] sm:$0xff] %v5626_v24  ;;  %1466 = vmatmul.f32.gmra.mxu0 %v5422_v9  ;;  %v5648_v9 = vpop.f32.mrf.mxu0 }
 0x1f1   : > { %1073 = vmatmul.f32.gmra.mxu1 %v5386_v21 }
 0x1f2   : > { %1207 = vmatmul.f32.gmra.mxu2 %v5456_v3  ;;  %1335 = vmatmul.f32.gmra.mxu3 %v5386_v21 }
 0x1f6   : > { %v5639_v6 = vpop.f32.mrf.mxu1 }
 0x1f7   : > { %7242 = vst [vmem:[#allocation57_spill] sm:$0xff] %v5639_v6 }
 0x1f8   : > { %1469 = vmatmul.f32.gmra.mxu0 %v5456_v3  ;;  %v5658_v27 = vpop.f32.mrf.mxu0 }
 0x1f9   : > { %1076 = vmatmul.f32.gmra.mxu1 %v5420_v36 }
 0x1fa   : > { %1210 = vmatmul.f32.gmra.mxu2 %v5487_v20  ;;  %1338 = vmatmul.f32.gmra.mxu3 %v5420_v36 }
 0x1fe   : > { %v5650_v21 = vpop.f32.mrf.mxu1 }
 0x200   : > { %1472 = vmatmul.f32.gmra.mxu0 %v5487_v20  ;;  %v5667_v20 = vld [vmem:[#allocation2 + $0xaf] sm:$0xff] }
 0x201   : > { %1079 = vmatmul.f32.gmra.mxu1 %v5454_v31 }
 0x202   : > { %1213 = vmatmul.f32.gmra.mxu2 %v5504_v53  ;;  %1341 = vmatmul.f32.gmra.mxu3 %v5454_v31  ;;  %v5669_v31 = vpop.f32.mrf.mxu0 }
 0x206   : > { %v5656_v3 = vpop.f32.mrf.mxu1 }
 0x208   : > { %1475 = vmatmul.f32.gmra.mxu0 %v5504_v53 }
 0x209   : > { %1082 = vmatmul.f32.gmra.mxu1 %v5485_v63 }
 0x20a   : > { %1216 = vmatmul.f32.gmra.mxu2 %v5515_v0  ;;  %1344 = vmatmul.f32.gmra.mxu3 %v5485_v63  ;;  %v1131_v63 = vld [vmem:[#allocation2 + $0xc5] sm:$0xff] }
 0x20e   : > { %v5664_v36 = vpop.f32.mrf.mxu1 }
 0x210   : > { %1478 = vmatmul.f32.gmra.mxu0 %v5515_v0  ;;  %v5679_v0 = vpop.f32.mrf.mxu0 }
 0x211   : > { %1085 = vmatmul.f32.gmra.mxu1 %v5667_v20 }
 0x212   : > { %1219 = vmatmul.f32.gmra.mxu2 %v1130_v11  ;;  %1347 = vmatmul.f32.gmra.mxu3 %v5667_v20 }
 0x216   : > { %v5673_v53 = vpop.f32.mrf.mxu1 }
 0x218   : > { %1481 = vmatmul.f32.gmra.mxu0 %v1130_v11  ;;  %v5686_v37 = vpop.f32.mrf.mxu0  ;;  %v1517_v11 = vld [vmem:[#allocation2 + $0x57] sm:$0xff] }
 0x219   : > { %1088 = vmatmul.f32.gmra.mxu1 %v5675_v15 }
 0x21a   : > { %1222 = vmatmul.f32.gmra.mxu2 %v1131_v63  ;;  %1350 = vmatmul.f32.gmra.mxu3 %v5675_v15 }
 0x21e   : > { %v5681_v39 = vpop.f32.mrf.mxu1 }
 0x220   : > { %1484 = vmatmul.f32.gmra.mxu0 %v1131_v63  ;;  %v5695_v4 = vpop.f32.mrf.mxu0 }
 0x221   : > { %1567 = vmatmul.f32.vlgmr.msra.gmra.mxu1 %v1514_v14  ;;  %v1518_v14 = vld [vmem:[#allocation2 + $0x5f] sm:$0xff] }
 0x222   : > { %1353 = vmatmul.f32.gmra.mxu3 %v5683_v17 }
 0x226   : > { %v5688_v16 = vpop.f32.mrf.mxu1 }
 0x228   : > { %1487 = vmatmul.f32.gmra.mxu0 %v1398_v34  ;;  %v5701_v34 = vpop.f32.mrf.mxu2  ;;  %v5707_v18 = vpop.f32.mrf.mxu0 }
 0x229   : > { %1570 = vmatmul.f32.gmra.mxu1 %v1515_v26  ;;  %7244 = vst [vmem:[#allocation59_spill] sm:$0xff] %v5701_v34  ;;  %v5703_v26 = vpop.f32.mrf.mxu3  ;;  %v1521_v34 = vld [vmem:[#allocation2 + $0x77] sm:$0xff] }
 0x22a   : > { %1356 = vmatmul.f32.gmra.mxu3 %v5690_v28  ;;  %7245 = vst [vmem:[#allocation60_spill] sm:$0xff] %v5703_v26 }
 0x22e   : > { %v5693_v29 = vpop.f32.mrf.mxu1 }
 0x230   : > { %1490 = vmatmul.f32.gmra.mxu0 %v1399_v10 }
 0x231   : > { %1573 = vmatmul.f32.gmra.mxu1 %v1516_v42  ;;  %v5711_v42 = vpop.f32.mrf.mxu2  ;;  %v5713_v8 = vpop.f32.mrf.mxu3 }
 0x232   : > { %7248 = vst [vmem:[#allocation63_spill] sm:$0xff] %v5711_v42 }
 0x233   : > { %7249 = vst [vmem:[#allocation64_spill] sm:$0xff] %v5713_v8 }
 0x236   : > { %v5697_v40 = vpop.f32.mrf.mxu1 }
 0x239   : > { %1576 = vmatmul.f32.gmra.mxu1 %v1517_v11  ;;  %v1520_v11 = vld [vmem:[#allocation2 + $0x6f] sm:$0xff]  ;;  %v5719_v26 = vpop.f32.mrf.mxu2  ;;  %v5721_v24 = vpop.f32.mrf.mxu3 }
 0x23a   : > { %7251 = vst [vmem:[#allocation66_spill] sm:$0xff] %v5719_v26 }
 0x23b   : > { %7252 = vst [vmem:[#allocation67_spill] sm:$0xff] %v5721_v24 }
 0x23e   : > { %v5699_v63 = vpop.f32.mrf.mxu1 }
 0x23f   : > { %7243 = vst [vmem:[#allocation58_spill] sm:$0xff] %v5699_v63 }
 0x241   : > { %1579 = vmatmul.f32.gmra.mxu1 %v1518_v14  ;;  %v5717_v14 = vpop.f32.mrf.mxu0  ;;  %v5727_v42 = vpop.f32.mrf.mxu2 }
 0x242   : > { %7254 = vst [vmem:[#allocation69_spill] sm:$0xff] %v5727_v42  ;;  %v5729_v8 = vpop.f32.mrf.mxu3 }
 0x243   : > { %7255 = vst [vmem:[#allocation70_spill] sm:$0xff] %v5729_v8  ;;  %v2215_v8 = vld [vmem:[%s7040_s4 + $0x78] sm:$0xff] }
 0x244   : > { %2334 = vmatpush.msra.mxu3 %v2215_v8  ;;  %v4277_v8 = vld [vmem:[%s7040_s4 + $0x1f8] sm:$0xff] }
 0x245   : > { %2645 = vmatpush.msrb.mxu1 %v4277_v8 }
 0x246   : > { %v5705_v6 = vpop.f32.mrf.mxu1 }
 0x247   : > { %7246 = vst [vmem:[#allocation61_spill] sm:$0xff] %v5705_v6 }
 0x249   : > { %1582 = vmatmul.f32.gmra.mxu1 %v1519_v13  ;;  %v5725_v38 = vpop.f32.mrf.mxu0  ;;  %v1166_v26 = vpop.f32.mrf.mxu2 }
 0x24e   : > { %v5709_v10 = vpop.f32.mrf.mxu1 }
 0x24f   : > { %7247 = vst [vmem:[#allocation62_spill] sm:$0xff] %v5709_v10 }
 0x251   : > { %1585 = vmatmul.f32.gmra.mxu1 %v1520_v11  ;;  %v5733_v12 = vpop.f32.mrf.mxu0 }
 0x256   : > { %v5715_v61 = vpop.f32.mrf.mxu1 }
 0x257   : > { %7250 = vst [vmem:[#allocation65_spill] sm:$0xff] %v5715_v61  ;;  %v1526_v61 = vld [vmem:[#allocation2 + $0x9f] sm:$0xff] }
 0x259   : > { %1588 = vmatmul.f32.gmra.mxu1 %v1521_v34  ;;  %v5735_v34 = vpop.f32.mrf.mxu3 }
 0x25e   : > { %v5723_v13 = vpop.f32.mrf.mxu1 }
 0x25f   : > { %7253 = vst [vmem:[#allocation68_spill] sm:$0xff] %v5723_v13  ;;  %v1525_v13 = vld [vmem:[#allocation2 + $0x97] sm:$0xff] }
 0x261   : > { %1591 = vmatmul.f32.gmra.mxu1 %v1522_v51  ;;  %v4245_v51 = vld [vmem:[%s7040_s4 + $0xf8] sm:$0xff]  ;;  %v5747_v23 = vpop.f32.mrf.mxu3 }
 0x262   : > { %2236 = vmatpush.msra.mxu2 %v4245_v51 }
 0x264   : > { %2237 = vmatpush.msra.mxu2 %v4244_v59  ;;  %v4243_v59 = vld [vmem:[%s7040_s4 + $0xe8] sm:$0xff] }
 0x266   : > { %v5731_v11 = vpop.f32.mrf.mxu1  ;;  %2238 = vmatpush.msra.mxu2 %v4243_v59  ;;  %v4242_v59 = vld [vmem:[%s7040_s4 + $0xe0] sm:$0xff] }
 0x267   : > { %7256 = vst [vmem:[#allocation71_spill] sm:$0xff] %v5731_v11  ;;  %v1169_v11 = vpop.f32.mrf.mxu2 }
 0x268   : > { %2239 = vmatpush.msra.mxu2 %v4242_v59 }
 0x269   : > { %1594 = vmatmul.f32.gmra.mxu1 %v1523_v60  ;;  %v1434_v60 = vpop.f32.mrf.mxu0  ;;  %v5767_v49 = vpop.f32.mrf.mxu3 }
 0x26e   : > { %v5737_v24 = vpop.f32.mrf.mxu1 }
 0x26f   : > { %7257 = vst [vmem:[#allocation72_spill] sm:$0xff] %v5737_v24  ;;  %v4261_v24 = vld [vmem:[%s7040_s4 + $0x178] sm:$0xff]  ;;  %v5765_v62 = vpop.f32.mrf.mxu2 }
 0x270   : > { %2476 = vmatpush.msra.mxu0 %v4261_v24  ;;  %v4260_v24 = vld [vmem:[%s7040_s4 + $0x170] sm:$0xff] }
 0x271   : > { %1597 = vmatmul.f32.gmra.mxu1 %v1524_v50  ;;  %v2214_v50 = vld [vmem:[%s7040_s4 + $0x70] sm:$0xff] }
 0x272   : > { %2335 = vmatpush.msra.mxu3 %v2214_v50  ;;  %v1527_v50 = vld [vmem:[#allocation2 + $0xa7] sm:$0xff]  ;;  %2477 = vmatpush.msra.mxu0 %v4260_v24 }
 0x273   : > { %v4259_v24 = vld [vmem:[%s7040_s4 + $0x168] sm:$0xff] }
 0x274   : > { %2478 = vmatpush.msra.mxu0 %v4259_v24 }
 0x276   : > { %v5745_v42 = vpop.f32.mrf.mxu1 }
 0x277   : > { %7258 = vst [vmem:[#allocation73_spill] sm:$0xff] %v5745_v42  ;;  %v5763_v42 = vpop.f32.mrf.mxu0 }
 0x279   : > { %1600 = vmatmul.f32.gmra.mxu1 %v1525_v13  ;;  %v2213_v13 = vld [vmem:[%s7040_s4 + $0x68] sm:$0xff] }
 0x27a   : > { %2336 = vmatpush.msra.mxu3 %v2213_v13  ;;  %v2212_v13 = vld [vmem:[%s7040_s4 + $0x60] sm:$0xff] }
 0x27c   : > { %2337 = vmatpush.msra.mxu3 %v2212_v13  ;;  %v5826_v13 = vperm.slane %v4587_v2, 0 }
 0x27e   : > { %v5761_v51 = vpop.f32.mrf.mxu1 }
 0x27f   : > { %7259 = vst [vmem:[#allocation74_spill] sm:$0xff] %v5761_v51  ;;  %v5783_v8 = vpop.f32.mrf.mxu0  ;;  %v5787_v51 = vpop.f32.mrf.mxu3 }
 0x281   : > { %1603 = vmatmul.f32.gmra.mxu1 %v1526_v61  ;;  %v4276_v61 = vld [vmem:[%s7040_s4 + $0x1f0] sm:$0xff] }
 0x282   : > { %2646 = vmatpush.msrb.mxu1 %v4276_v61  ;;  %v785_v61 = vadd.f32 %v5592_v5, %v5377_v43  ;;  %v4258_v43 = vld [vmem:[%s7040_s4 + $0x160] sm:$0xff]  ;;  %v788_v5 = vadd.f32 %v5607_v19, %v5414_v25  ;;  %v4241_v25 = vld [vmem:[%s7040_s4 + $0xd8] sm:$0xff] }
 0x283   : > { %2479 = vmatpush.msra.mxu0 %v4258_v43  ;;  %v2211_v19 = vld [vmem:[%s7040_s4 + $0x58] sm:$0xff]  ;;  %2240 = vmatpush.msra.mxu2 %v4241_v25 }
 0x284   : > { %v958_v24 = vadd.f32 %v5679_v0, %v785_v61  ;;  %2338 = vmatpush.msra.mxu3 %v2211_v19 }
 0x286   : > { %v5769_v10 = vpop.f32.mrf.mxu1  ;;  %v1092_v58 = vadd.f32 %v5650_v21, %v958_v24  ;;  %v959_v21 = vadd.f32 %v5686_v37, %v788_v5  ;;  %v791_v37 = vadd.f32 %v5621_v52, %v5448_v30  ;;  %v4257_v30 = vld [vmem:[%s7040_s4 + $0x158] sm:$0xff]  ;;  %v2210_v52 = vld [vmem:[%s7040_s4 + $0x50] sm:$0xff] }
 0x287   : > { %7260 = vst [vmem:[#allocation75_spill] sm:$0xff] %v5769_v10  ;;  %v5785_v10 = vpop.f32.mrf.mxu2  ;;  %v5812_v35 = vpop.f32.mrf.mxu3  ;;  %2480 = vmatpush.msra.mxu0 %v4257_v30  ;;  %2339 = vmatpush.msra.mxu3 %v2210_v52 }
 0x288   : > { %v1226_v63 = vadd.f32 %v1166_v26, %v1092_v58  ;;  %v1093_v0 = vadd.f32 %v5656_v3, %v959_v21  ;;  %v4274_v3 = vld [vmem:[%s7040_s4 + $0x1e0] sm:$0xff] }
 0x289   : > { %1606 = vmatmul.f32.gmra.mxu1 %v1527_v50  ;;  %v4275_v50 = vld [vmem:[%s7040_s4 + $0x1e8] sm:$0xff] }
 0x28a   : > { %2647 = vmatpush.msrb.mxu1 %v4275_v50  ;;  %v1227_v50 = vadd.f32 %v1169_v11, %v1093_v0 }
 0x28c   : > { %2648 = vmatpush.msrb.mxu1 %v4274_v3 }
 0x28e   : > { %v5789_v22 = vpop.f32.mrf.mxu1 }
 0x28f   : > { %7261 = vst [vmem:[#allocation76_spill] sm:$0xff] %v5789_v22  ;;  %v5807_v22 = vpop.f32.mrf.mxu0  ;;  %v5810_v6 = vpop.f32.mrf.mxu2 }
 0x291   : > { %1609 = vmatmul.f32.gmra.mxu1 %v5667_v20  ;;  %v1360_v20 = vadd.f32 %v5735_v34, %v1226_v63  ;;  %v1361_v63 = vadd.f32 %v5747_v23, %v1227_v50  ;;  %v960_v34 = vadd.f32 %v5695_v4, %v791_v37  ;;  %v4240_v23 = vld [vmem:[%s7040_s4 + $0xd0] sm:$0xff] }
 0x292   : > { %2241 = vmatpush.msra.mxu2 %v4240_v23 }
 0x293   : > { %v1494_v59 = vadd.f32 %v1434_v60, %v1360_v20  ;;  %v1094_v60 = vadd.f32 %v5664_v36, %v960_v34  ;;  %v1495_v43 = vadd.f32 %v5763_v42, %v1361_v63  ;;  %v794_v36 = vadd.f32 %v5637_v41, %v5479_v54 }
 0x295   : > { %v1228_v21 = vadd.f32 %v5765_v62, %v1094_v60  ;;  %v4273_v62 = vld [vmem:[%s7040_s4 + $0x1d8] sm:$0xff]  ;;  %v961_v54 = vadd.f32 %v5707_v18, %v794_v36 }
 0x296   : > { %v5814_v48 = vpop.f32.mrf.mxu1  ;;  %2649 = vmatpush.msrb.mxu1 %v4273_v62 }
 0x297   : > { %v5828_v58 = vpop.f32.mrf.mxu0  ;;  %v5830_v61 = vpop.f32.mrf.mxu2  ;;  %v1362_v4 = vadd.f32 %v5767_v49, %v1228_v21 }
 0x299   : > { %1612 = vmatmul.f32.gmra.mxu1 %v5675_v15  ;;  %v5841_v15 = vpop.f32.mrf.mxu3  ;;  %v1496_v25 = vadd.f32 %v5783_v8, %v1362_v4  ;;  %v4239_v8 = vld [vmem:[%s7040_s4 + $0xc8] sm:$0xff] }
 0x29a   : > { %2242 = vmatpush.msra.mxu2 %v4239_v8 }
 0x29e   : > { %v1568_v26 = vpop.f32.mrf.mxu1 }
 0x29f   : > { %v1628_v24 = vadd.f32 %v1568_v26, %v1494_v59  ;;  %v5869_v42 = vpop.f32.mrf.mxu2 }
 0x2a1   : > { %v1651_v11 = vadd.f32 %v5826_v13, %v1628_v24  ;;  %1615 = vmatmul.f32.gmra.mxu1 %v5683_v17  ;;  %v5863_v17 = vpop.f32.mrf.mxu0  ;;  %v5874_v41 = vpop.f32.mrf.mxu3  ;;  %v1095_v24 = vadd.f32 %v5673_v53, %v961_v54  ;;  %v4256_v53 = vld [vmem:[%s7040_s4 + $0x150] sm:$0xff] }
 0x2a2   : > { %2481 = vmatpush.msra.mxu0 %v4256_v53 }
 0x2a3   : > { %v1671_v5 = vmul.f32 0.1, %v1651_v11  ;;  %v1229_v3 = vadd.f32 %v5785_v10, %v1095_v24  ;;  %v2209_v10 = vld [vmem:[%s7040_s4 + $0x48] sm:$0xff] }
 0x2a4   : > { %2340 = vmatpush.msra.mxu3 %v2209_v10 }
 0x2a5   : > { %v1691_v59 = vmax.f32 %v1651_v11, %v1671_v5  ;;  %v4272_v5 = vld [vmem:[%s7040_s4 + $0x1d0] sm:$0xff]  ;;  %v1363_v21 = vadd.f32 %v5787_v51, %v1229_v3 }
 0x2a6   : > { %v1571_v20 = vpop.f32.mrf.mxu1  ;;  %2650 = vmatpush.msrb.mxu1 %v4272_v5 }
 0x2a7   : > { %v1629_v0 = vadd.f32 %v1571_v20, %v1495_v43  ;;  %v5880_v49 = vsel %vm7262_vm2, %v1691_v59, 0.0  ;;  %v797_v20 = vadd.f32 %v5648_v9, %v5501_v44  ;;  %v5914_v62 = vpop.f32.mrf.mxu2  ;;  %v1497_v4 = vadd.f32 %v5807_v22, %v1363_v21  ;;  %v2208_v22 = vld [vmem:[%s7040_s4 + $0x40] sm:$0xff] }
 0x2a8   : > { %v1992_v11 = vrot.slane %v5880_v49, 3  ;;  %v1792_v60 = vrot.slane %v5880_v49, 1  ;;  %v1892_v8 = vrot.slane %v5880_v49, 2  ;;  %2341 = vmatpush.msra.mxu3 %v2208_v22  ;;  %vm7265_vm2 = vcmask 1046528  }
 0x2a9   : > { %v1652_v26 = vadd.f32 %v5826_v13, %v1629_v0  ;;  %1618 = vmatmul.f32.gmra.mxu1 %v5690_v28  ;;  %v1532_v28 = vld [vmem:[#allocation2 + $0xcf] sm:$0xff]  ;;  %v5907_v30 = vpop.f32.mrf.mxu0  ;;  %v962_v36 = vadd.f32 %v5717_v14, %v797_v20  ;;  %v5918_v9 = vpop.f32.mrf.mxu3 }
 0x2ab   : > { %v1672_v50 = vmul.f32 0.1, %v1652_v26  ;;  %v1096_v51 = vadd.f32 %v5681_v39, %v962_v36  ;;  %v4238_v39 = vld [vmem:[%s7040_s4 + $0xc0] sm:$0xff] }
 0x2ac   : > { %2243 = vmatpush.msra.mxu2 %v4238_v39 }
 0x2ad   : > { %v1692_v19 = vmax.f32 %v1652_v26, %v1672_v50  ;;  %v1230_v54 = vadd.f32 %v5810_v6, %v1096_v51  ;;  %v1533_v6 = vld [vmem:[#allocation2 + $0xd7] sm:$0xff] }
 0x2ae   : > { %v1574_v37 = vpop.f32.mrf.mxu1 }
 0x2af   : > { %v5885_v18 = vsel %vm4735_vm12, %v1692_v19, 0.0  ;;  %v1630_v63 = vadd.f32 %v1574_v37, %v1496_v25  ;;  %v4255_v25 = vld [vmem:[%s7040_s4 + $0x148] sm:$0xff] }
 0x2b0   : > { %v1993_v34 = vrot.slane %v5885_v18, 3  ;;  %v1793_v43 = vrot.slane %v5885_v18, 1  ;;  %v1893_v24 = vrot.slane %v5885_v18, 2  ;;  %2482 = vmatpush.msra.mxu0 %v4255_v25  ;;  %v4271_v37 = vld [vmem:[%s7040_s4 + $0x1c8] sm:$0xff] }
 0x2b1   : > { %v1653_v0 = vadd.f32 %v5826_v13, %v1630_v63  ;;  %1621 = vmatmul.f32.gmra.mxu1 %v1532_v28  ;;  %v800_v28 = vadd.f32 %v5658_v27, %v5512_v7  ;;  %v1364_v63 = vadd.f32 %v5812_v35, %v1230_v54  ;;  %v5953_v35 = vpop.f32.mrf.mxu0 }
 0x2b2   : > { %v1994_v23 = vsel %vm7088_vm0, %v1992_v11, %v1993_v34  ;;  %v1794_v52 = vsel %vm7089_vm9, %v1792_v60, %v1793_v43  ;;  %vm7090_vm0 = vcmask 1045504   ;;  %2651 = vmatpush.msrb.mxu1 %v4271_v37  ;;  %v4270_v37 = vld [vmem:[%s7040_s4 + $0x1c0] sm:$0xff] }
 0x2b3   : > { %v1673_v44 = vmul.f32 0.1, %v1653_v0  ;;  %2031 = vrot.lane.b32.xlu1 %v1994_v23, %s4533_s12  ;;  %1831 = vrot.lane.b32.xlu0 %v1794_v52, %s4534_s13  ;;  %v963_v60 = vadd.f32 %v5725_v38, %v800_v28  ;;  %v1894_v7 = vsel %vm7090_vm0, %v1892_v8, %v1893_v24  ;;  %v1498_v20 = vadd.f32 %v5828_v58, %v1364_v63  ;;  %v5960_v38 = vpop.f32.mrf.mxu3 }
 0x2b4   : > { %2652 = vmatpush.msrb.mxu1 %v4270_v37 }
 0x2b5   : > { %v1693_v59 = vmax.f32 %v1653_v0, %v1673_v44  ;;  %v1097_v27 = vadd.f32 %v5688_v16, %v963_v60  ;;  %v4254_v16 = vld [vmem:[%s7040_s4 + $0x140] sm:$0xff] }
 0x2b6   : > { %v1577_v26 = vpop.f32.mrf.mxu1  ;;  %2483 = vmatpush.msra.mxu0 %v4254_v16 }
 0x2b7   : > { %v5925_v14 = vsel %vm7263_vm3, %v1693_v59, 0.0  ;;  %v1631_v50 = vadd.f32 %v1577_v26, %v1497_v4  ;;  %v1231_v52 = vadd.f32 %v5830_v61, %v1097_v27  ;;  %v803_v4 = vadd.f32 %v5669_v31, %v5523_v33 }
 0x2b8   : > { %v1895_v19 = vrot.slane %v5925_v14, 2  ;;  %v1795_v3 = vrot.slane %v5925_v14, 1  ;;  %v1995_v23 = vrot.slane %v5925_v14, 3 }
 0x2b9   : > { %v1654_v53 = vadd.f32 %v5826_v13, %v1631_v50  ;;  %1624 = vmatmul.f32.gmra.mxu1 %v1533_v6  ;;  %v1365_v59 = vadd.f32 %v5841_v15, %v1231_v52  ;;  %v5988_v39 = vpop.f32.mrf.mxu0 }
 0x2ba   : > { %v1896_v10 = vsel %vm7090_vm0, %v1893_v24, %v1895_v19  ;;  %v1796_v11 = vsel %vm7089_vm9, %v1793_v43, %v1795_v3  ;;  %v5958_v43 = vpop.f32.mrf.mxu2  ;;  %vm7264_vm9 = vcmask 1044480   ;;  %v964_v24 = vadd.f32 %v5733_v12, %v803_v4 }
 0x2bb   : > { %v1674_v5 = vmul.f32 0.1, %v1654_v53  ;;  %1933 = vrot.lane.b32.xlu2 %v1896_v10, %s4535_s24  ;;  %1833 = vrot.lane.b32.xlu1 %v1796_v11, %s4534_s13  ;;  %v1996_v26 = vsel %vm7264_vm9, %v1993_v34, %v1995_v23  ;;  %v1499_v31 = vadd.f32 %v5863_v17, %v1365_v59  ;;  %v2207_v17 = vld [vmem:[%s7040_s4 + $0x38] sm:$0xff] }
 0x2bc   : > { %1931 = vrot.lane.b32.xlu0 %v1894_v7, %s4535_s24  ;;  %v1098_v33 = vadd.f32 %v5693_v29, %v964_v24  ;;  %v4237_v29 = vld [vmem:[%s7040_s4 + $0xb8] sm:$0xff]  ;;  %2342 = vmatpush.msra.mxu3 %v2207_v17  ;;  %v1099_v7 = vadd.f32 %v5697_v40, %v5550_v1  ;;  %v4236_v1 = vld [vmem:[%s7040_s4 + $0xb0] sm:$0xff] }
 0x2bd   : > { %v1694_v21 = vmax.f32 %v1654_v53, %v1674_v5  ;;  %2244 = vmatpush.msra.mxu2 %v4237_v29  ;;  %v2206_v40 = vld [vmem:[%s7040_s4 + $0x30] sm:$0xff] }
 0x2be   : > { %v1580_v0 = vpop.f32.mrf.mxu1  ;;  %v1232_v6 = vadd.f32 %v5869_v42, %v1098_v33  ;;  %v6007_v42 = vpop.f32.mrf.mxu3  ;;  %2343 = vmatpush.msra.mxu3 %v2206_v40  ;;  %v4252_v17 = vld [vmem:[%s7040_s4 + $0x130] sm:$0xff]  ;;  %v7280_v40 = vld [vmem:[#allocation65_spill] sm:$0xff] }
 0x2bf   : > { %v5966_v36 = vsel %vm4741_vm13, %v1694_v21, 0.0  ;;  %v1632_v44 = vadd.f32 %v1580_v0, %v1498_v20  ;;  %v1233_v0 = vadd.f32 %v5914_v62, %v1099_v7  ;;  %2245 = vmatpush.msra.mxu2 %v4236_v1 }
 0x2c0   : > { %v1897_v58 = vrot.slane %v5966_v36, 2  ;;  %v1797_v51 = vrot.slane %v5966_v36, 1  ;;  %v1997_v22 = vrot.slane %v5966_v36, 3  ;;  %v1366_v53 = vadd.f32 %v5874_v41, %v1232_v6  ;;  %v7270_v6 = vld [vmem:[#allocation7_spill] sm:$0xff] }
 0x2c1   : > { %v1655_v61 = vadd.f32 %v5826_v13, %v1632_v44  ;;  %v4253_v44 = vld [vmem:[%s7040_s4 + $0x138] sm:$0xff]  ;;  %vm7271_vm5 = vnez %v7270_v6 }
 0x2c2   : > { %v1898_v54 = vsel %vm7090_vm0, %v1895_v19, %v1897_v58  ;;  %v1798_v50 = vsel %vm7265_vm2, %v1795_v3, %v1797_v51  ;;  %v5992_v12 = vpop.f32.mrf.mxu2  ;;  %vm7267_vm2 = vmmov %vm7264_vm9  ;;  %vm7268_vm9 = vcmask 1046528   ;;  %v1500_v41 = vadd.f32 %v5907_v30, %v1366_v53  ;;  %v6037_v30 = vpop.f32.mrf.mxu0  ;;  %2484 = vmatpush.msra.mxu0 %v4253_v44 }
 0x2c3   : > { %v1675_v25 = vmul.f32 0.1, %v1655_v61  ;;  %2033 = vrot.lane.b32.xlu2 %v1996_v26, %s4533_s12  ;;  %1935 = vrot.lane.b32.xlu1 %v1898_v54, %s4535_s24  ;;  %v1998_v10 = vsel %vm7267_vm2, %v1995_v23, %v1997_v22 }
 0x2c4   : > { %1835 = vrot.lane.b32.xlu0 %v1798_v50, %s4534_s13  ;;  %2485 = vmatpush.msra.mxu0 %v4252_v17 }
 0x2c5   : > { %v1695_v15 = vmax.f32 %v1655_v61, %v1675_v25 }
 0x2c6   : > { %v1583_v34 = vpop.f32.mrf.mxu1  ;;  %v6048_v61 = vpop.f32.mrf.mxu3 }
 0x2c7   : > { %v5996_v19 = vsel %vm7266_vm4, %v1695_v15, 0.0  ;;  %v1633_v3 = vadd.f32 %v1583_v34, %v1499_v31  ;;  %vm7442_vm4 = vcmask 1046528  }
 0x2c8   : > { %v1899_v28 = vrot.slane %v5996_v19, 2  ;;  %v1799_v63 = vrot.slane %v5996_v19, 1  ;;  %v1999_v21 = vrot.slane %v5996_v19, 3 }
 0x2c9   : > { %v1656_v8 = vadd.f32 %v5826_v13, %v1633_v3 }
 0x2ca   : > { %v1900_v11 = vsel %vm7090_vm0, %v1897_v58, %v1899_v28  ;;  %v1800_v60 = vsel %vm7268_vm9, %v1797_v51, %v1799_v63  ;;  %v4269_v58 = vld [vmem:[%s7040_s4 + $0x1b8] sm:$0xff]  ;;  %v1367_v51 = vadd.f32 %v5918_v9, %v1233_v0  ;;  %v6045_v4 = vpop.f32.mrf.mxu2  ;;  %v2000_v26 = vsel %vm7267_vm2, %v1997_v22, %v1999_v21  ;;  %v7269_v9 = vld [vmem:[#allocation58_spill] sm:$0xff] }
 0x2cb   : > { %v1676_v5 = vmul.f32 0.1, %v1656_v8  ;;  %2035 = vrot.lane.b32.xlu2 %v1998_v10, %s4533_s12  ;;  %1937 = vrot.lane.b32.xlu1 %v1900_v11, %s4535_s24  ;;  %v1100_v25 = vadd.f32 %v7269_v9, %v5559_v32  ;;  %v4235_v32 = vld [vmem:[%s7040_s4 + $0xa8] sm:$0xff] }
 0x2cc   : > { %1837 = vrot.lane.b32.xlu0 %v1800_v60, %s4534_s13  ;;  %2653 = vmatpush.msrb.mxu1 %v4269_v58  ;;  %v1501_v33 = vadd.f32 %v5953_v35, %v1367_v51  ;;  %v2205_v35 = vld [vmem:[%s7040_s4 + $0x28] sm:$0xff]  ;;  %v4234_v51 = vld [vmem:[%s7040_s4 + $0xa0] sm:$0xff] }
 0x2cd   : > { %v1696_v27 = vmax.f32 %v1656_v8, %v1676_v5  ;;  %v1234_v22 = vadd.f32 %v5958_v43, %v1100_v25  ;;  %2246 = vmatpush.msra.mxu2 %v4235_v32  ;;  %2344 = vmatpush.msra.mxu3 %v2205_v35  ;;  %v6081_v8 = vpop.f32.mrf.mxu0  ;;  %v4251_v58 = vld [vmem:[%s7040_s4 + $0x128] sm:$0xff]  ;;  %v2202_v32 = vld [vmem:[%s7040_s4 + $0x10] sm:$0xff] }
 0x2ce   : > { %v1586_v20 = vpop.f32.mrf.mxu1  ;;  %2486 = vmatpush.msra.mxu0 %v4251_v58 }
 0x2cf   : > { %v6026_v23 = vsel %vm4747_vm14, %v1696_v27, 0.0  ;;  %v1634_v52 = vadd.f32 %v1586_v20, %v1500_v41  ;;  %v7272_v41 = vld [vmem:[#allocation47_spill] sm:$0xff]  ;;  %v7273_v27 = vld [vmem:[#allocation61_spill] sm:$0xff]  ;;  %2247 = vmatpush.msra.mxu2 %v4234_v51 }
 0x2d0   : > { %v1901_v62 = vrot.slane %v6026_v23, 2  ;;  %v1801_v16 = vrot.slane %v6026_v23, 1  ;;  %v2001_v34 = vrot.slane %v6026_v23, 3  ;;  %v1101_v20 = vadd.f32 %v7273_v27, %v7272_v41  ;;  %v2200_v27 = vld [vmem:[%s7040_s4] sm:$0xff] }
 0x2d1   : > { %v1657_v59 = vadd.f32 %v5826_v13, %v1634_v52 }
 0x2d2   : > { %v1902_v54 = vsel %vm7090_vm0, %v1899_v28, %v1901_v62  ;;  %v1802_v50 = vsel %vm7268_vm9, %v1799_v63, %v1801_v16  ;;  %v4268_v28 = vld [vmem:[%s7040_s4 + $0x1b0] sm:$0xff]  ;;  %v1368_v63 = vadd.f32 %v5960_v38, %v1234_v22  ;;  %v2002_v10 = vsel %vm7267_vm2, %v1999_v21, %v2001_v34  ;;  %v6086_v5 = vpop.f32.mrf.mxu2  ;;  %v6090_v38 = vpop.f32.mrf.mxu3 }
 0x2d3   : > { %v1677_v24 = vmul.f32 0.1, %v1657_v59  ;;  %2037 = vrot.lane.b32.xlu2 %v2000_v26, %s4533_s12  ;;  %1939 = vrot.lane.b32.xlu1 %v1902_v54, %s4535_s24  ;;  %v1235_v1 = vadd.f32 %v5992_v12, %v1101_v20  ;;  %v4267_v26 = vld [vmem:[%s7040_s4 + $0x1a8] sm:$0xff] }
 0x2d4   : > { %1839 = vrot.lane.b32.xlu0 %v1802_v50, %s4534_s13  ;;  %2654 = vmatpush.msrb.mxu1 %v4268_v28  ;;  %v1502_v21 = vadd.f32 %v5988_v39, %v1368_v63  ;;  %v2204_v39 = vld [vmem:[%s7040_s4 + $0x20] sm:$0xff] }
 0x2d5   : > { %v1697_v31 = vmax.f32 %v1657_v59, %v1677_v24  ;;  %v1369_v54 = vadd.f32 %v6007_v42, %v1235_v1  ;;  %2345 = vmatpush.msra.mxu3 %v2204_v39  ;;  %v6126_v42 = vpop.f32.mrf.mxu0  ;;  %v7277_v63 = vld [vmem:[#allocation8_spill] sm:$0xff] }
 0x2d6   : > { %v1589_v15 = vpop.f32.mrf.mxu1  ;;  %2655 = vmatpush.msrb.mxu1 %v4267_v26  ;;  %vm7278_vm6 = vnez %v7277_v63 }
 0x2d7   : > { %v6063_v3 = vsel %vm7271_vm5, %v1697_v31, 0.0  ;;  %v1635_v29 = vadd.f32 %v1589_v15, %v1501_v33  ;;  %v2203_v31 = vld [vmem:[%s7040_s4 + $0x18] sm:$0xff]  ;;  %v7275_v15 = vld [vmem:[#allocation48_spill] sm:$0xff]  ;;  %v1503_v6 = vadd.f32 %v6037_v30, %v1369_v54 }
 0x2d8   : > { %v1903_v37 = vrot.slane %v6063_v3, 2  ;;  %v1803_v43 = vrot.slane %v6063_v3, 1  ;;  %v2003_v44 = vrot.slane %v6063_v3, 3  ;;  %2346 = vmatpush.msra.mxu3 %v2203_v31  ;;  %v7281_v54 = vld [vmem:[#allocation15_spill] sm:$0xff] }
 0x2d9   : > { %v1658_v53 = vadd.f32 %v5826_v13, %v1635_v29  ;;  %vm7282_vm1 = vnez %v7281_v54 }
 0x2da   : > { %v1904_v11 = vsel %vm7090_vm0, %v1901_v62, %v1903_v37  ;;  %v1804_v60 = vsel %vm7268_vm9, %v1801_v16, %v1803_v43  ;;  %v2004_v24 = vsel %vm7267_vm2, %v2001_v34, %v2003_v44  ;;  %v7276_v34 = vld [vmem:[#allocation62_spill] sm:$0xff]  ;;  %v6132_v29 = vpop.f32.mrf.mxu2  ;;  %v6137_v35 = vpop.f32.mrf.mxu3  ;;  %2347 = vmatpush.msra.mxu3 %v2202_v32 }
 0x2db   : > { %v1678_v7 = vmul.f32 0.1, %v1658_v53  ;;  %2039 = vrot.lane.b32.xlu2 %v2002_v10, %s4533_s12  ;;  %1941 = vrot.lane.b32.xlu1 %v1904_v11, %s4535_s24  ;;  %v1102_v22 = vadd.f32 %v7276_v34, %v7275_v15  ;;  %v4250_v10 = vld [vmem:[%s7040_s4 + $0x120] sm:$0xff]  ;;  %v2201_v11 = vld [vmem:[%s7040_s4 + $0x8] sm:$0xff] }
 0x2dc   : > { %1841 = vrot.lane.b32.xlu0 %v1804_v60, %s4534_s13  ;;  %2487 = vmatpush.msra.mxu0 %v4250_v10 }
 0x2dd   : > { %v1698_v0 = vmax.f32 %v1658_v53, %v1678_v7  ;;  %v1236_v28 = vadd.f32 %v6045_v4, %v1102_v22  ;;  %2348 = vmatpush.msra.mxu3 %v2201_v11  ;;  %v1470_v51 = vpop.f32.mrf.mxu0 }
 0x2de   : > { %v1592_v52 = vpop.f32.mrf.mxu1 }
 0x2df   : > { %v6100_v62 = vsel %vm4755_vm15, %v1698_v0, 0.0  ;;  %v1636_v16 = vadd.f32 %v1592_v52, %v1502_v21  ;;  %v1370_v4 = vadd.f32 %v6048_v61, %v1236_v28  ;;  %2349 = vmatpush.msra.mxu3 %v2200_v27  ;;  %v2173_v52 = vld [vmem:[#allocation3 + $0x10] sm:$0xff]  ;;  %v7279_v61 = vld [vmem:[#allocation49_spill] sm:$0xff]  ;;  %v7284_v28 = vld [vmem:[#allocation68_spill] sm:$0xff] }
 0x2e0   : > { %v1905_v59 = vrot.slane %v6100_v62, 2  ;;  %v1805_v12 = vrot.slane %v6100_v62, 1  ;;  %2350 = vmatmul.f32.vlgmr.msra.gmra.mxu3 %v2173_v52  ;;  %v4265_v27 = vld [vmem:[%s7040_s4 + $0x198] sm:$0xff] }
 0x2e1   : > { %v1659_v50 = vadd.f32 %v5826_v13, %v1636_v16  ;;  %v1103_v16 = vadd.f32 %v7280_v40, %v7279_v61  ;;  %v1504_v58 = vadd.f32 %v6081_v8, %v1370_v4  ;;  %v4266_v8 = vld [vmem:[%s7040_s4 + $0x1a0] sm:$0xff] }
 0x2e2   : > { %v1906_v9 = vsel %vm7090_vm0, %v1903_v37, %v1905_v59  ;;  %v1806_v25 = vsel %vm7268_vm9, %v1803_v43, %v1805_v12  ;;  %v2005_v43 = vrot.slane %v6100_v62, 3  ;;  %v1205_v26 = vpop.f32.mrf.mxu2  ;;  %2656 = vmatpush.msrb.mxu1 %v4266_v8  ;;  %v4230_v40 = vld [vmem:[%s7040_s4 + $0x80] sm:$0xff] }
 0x2e3   : > { %v1679_v33 = vmul.f32 0.1, %v1659_v50  ;;  %2041 = vrot.lane.b32.xlu2 %v2004_v24, %s4533_s12  ;;  %1943 = vrot.lane.b32.xlu1 %v1906_v9, %s4535_s24  ;;  %v4233_v9 = vld [vmem:[%s7040_s4 + $0x98] sm:$0xff] }
 0x2e4   : > { %1843 = vrot.lane.b32.xlu0 %v1806_v25, %s4534_s13  ;;  %v2006_v20 = vsel %vm7267_vm2, %v2003_v44, %v2005_v43  ;;  %v6179_v25 = vpop.f32.mrf.mxu3  ;;  %2248 = vmatpush.msra.mxu2 %v4233_v9 }
 0x2e5   : > { %v1699_v17 = vmax.f32 %v1659_v50, %v1679_v33  ;;  %2657 = vmatpush.msrb.mxu1 %v4265_v27 }
 0x2e6   : > { %v1595_v37 = vpop.f32.mrf.mxu1 }
 0x2e7   : > { %v6143_v53 = vsel %vm7278_vm6, %v1699_v17, 0.0  ;;  %v1637_v30 = vadd.f32 %v1595_v37, %v1503_v6  ;;  %v2174_v17 = vld [vmem:[#allocation3 + $0x18] sm:$0xff]  ;;  %v7283_v37 = vld [vmem:[#allocation50_spill] sm:$0xff] }
 0x2e8   : > { %v1907_v60 = vrot.slane %v6143_v53, 2  ;;  %v1807_v7 = vrot.slane %v6143_v53, 1  ;;  %2353 = vmatmul.f32.gmra.mxu3 %v2174_v17 }
 0x2e9   : > { %v1660_v41 = vadd.f32 %v5826_v13, %v1637_v30 }
 0x2ea   : > { %v1908_v21 = vsel %vm7090_vm0, %v1905_v59, %v1907_v60  ;;  %v1808_v0 = vsel %vm7268_vm9, %v1805_v12, %v1807_v7  ;;  %v2007_v59 = vrot.slane %v6143_v53, 3  ;;  %v1237_v12 = vadd.f32 %v6086_v5, %v1103_v16  ;;  %v1208_v52 = vpop.f32.mrf.mxu2 }
 0x2eb   : > { %v1680_v1 = vmul.f32 0.1, %v1660_v41  ;;  %2043 = vrot.lane.b32.xlu2 %v2006_v20, %s4533_s12  ;;  %1945 = vrot.lane.b32.xlu1 %v1908_v21, %s4535_s24  ;;  %v4231_v20 = vld [vmem:[%s7040_s4 + $0x88] sm:$0xff]  ;;  %v1473_v21 = vpop.f32.mrf.mxu0 }
 0x2ec   : > { %1845 = vrot.lane.b32.xlu0 %v1808_v0, %s4534_s13  ;;  %v1371_v31 = vadd.f32 %v6090_v38, %v1237_v12  ;;  %v2008_v34 = vsel %vm7267_vm2, %v2005_v43, %v2007_v59  ;;  %v1104_v38 = vadd.f32 %v7284_v28, %v7283_v37  ;;  %v4232_v43 = vld [vmem:[%s7040_s4 + $0x90] sm:$0xff]  ;;  %v1342_v16 = vpop.f32.mrf.mxu3  ;;  %v2175_v12 = vld [vmem:[#allocation3 + $0x20] sm:$0xff] }
 0x2ed   : > { %v1700_v44 = vmax.f32 %v1660_v41, %v1680_v1  ;;  %2249 = vmatpush.msra.mxu2 %v4232_v43  ;;  %v2176_v43 = vld [vmem:[#allocation3 + $0x28] sm:$0xff] }
 0x2ee   : > { %v1598_v39 = vpop.f32.mrf.mxu1  ;;  %v1505_v63 = vadd.f32 %v6126_v42, %v1371_v31  ;;  %v4249_v42 = vld [vmem:[%s7040_s4 + $0x118] sm:$0xff] }
 0x2ef   : > { %v6171_v50 = vsel %vm7282_vm1, %v1700_v44, 0.0  ;;  %v1638_v24 = vadd.f32 %v1598_v39, %v1504_v58  ;;  %2488 = vmatpush.msra.mxu0 %v4249_v42  ;;  %2250 = vmatpush.msra.mxu2 %v4231_v20  ;;  %vm7308_vm1 = vcmask 1046528  }
 0x2f0   : > { %v1909_v33 = vrot.slane %v6171_v50, 2  ;;  %v1809_v5 = vrot.slane %v6171_v50, 1  ;;  %v2009_v11 = vrot.slane %v6171_v50, 3  ;;  %2356 = vmatmul.f32.gmra.mxu3 %v2175_v12 }
 0x2f1   : > { %v1661_v15 = vadd.f32 %v5826_v13, %v1638_v24  ;;  %2251 = vmatpush.msra.mxu2 %v4230_v40  ;;  %v7290_v24 = vld [vmem:[#allocation71_spill] sm:$0xff] }
 0x2f2   : > { %v1910_v22 = vsel %vm7090_vm0, %v1907_v60, %v1909_v33  ;;  %v1810_v6 = vsel %vm7268_vm9, %v1807_v7, %v1809_v5  ;;  %v1238_v60 = vadd.f32 %v6132_v29, %v1104_v38  ;;  %v7285_v7 = vld [vmem:[#allocation9_spill] sm:$0xff]  ;;  %vm7287_vm9 = vcmask 1044480   ;;  %2252 = vmatmul.f32.vlgmr.msra.gmra.mxu2 %v2175_v12 }
 0x2f3   : > { %v1681_v32 = vmul.f32 0.1, %v1661_v15  ;;  %2045 = vrot.lane.b32.xlu2 %v2008_v34, %s4533_s12  ;;  %1947 = vrot.lane.b32.xlu1 %v1910_v22, %s4535_s24  ;;  %vm7286_vm2 = vnez %v7285_v7  ;;  %v2010_v58 = vsel %vm7287_vm9, %v2007_v59, %v2009_v11  ;;  %v1476_v28 = vpop.f32.mrf.mxu0 }
 0x2f4   : > { %1847 = vrot.lane.b32.xlu0 %v1810_v6, %s4534_s13  ;;  %v1372_v1 = vadd.f32 %v6137_v35, %v1238_v60  ;;  %v7289_v35 = vld [vmem:[#allocation51_spill] sm:$0xff]  ;;  %v4248_v6 = vld [vmem:[%s7040_s4 + $0x110] sm:$0xff]  ;;  %v1345_v7 = vpop.f32.mrf.mxu3 }
 0x2f5   : > { %v1701_v30 = vmax.f32 %v1661_v15, %v1681_v32  ;;  %v1105_v9 = vadd.f32 %v7290_v24, %v7289_v35  ;;  %v7291_v15 = vld [vmem:[#allocation16_spill] sm:$0xff]  ;;  %2489 = vmatpush.msra.mxu0 %v4248_v6 }
 0x2f6   : > { %v1601_v10 = vpop.f32.mrf.mxu1  ;;  %v1506_v8 = vadd.f32 %v1470_v51, %v1372_v1  ;;  %vm7292_vm9 = vnez %v7291_v15  ;;  %v4264_v51 = vld [vmem:[%s7040_s4 + $0x190] sm:$0xff] }
 0x2f7   : > { %v6201_v4 = vsel %vm7286_vm2, %v1701_v30, 0.0  ;;  %v1639_v41 = vadd.f32 %v1601_v10, %v1505_v63  ;;  %vm7288_vm2 = vcmask 1046528   ;;  %2658 = vmatpush.msrb.mxu1 %v4264_v51  ;;  %v1211_v10 = vpop.f32.mrf.mxu2  ;;  %v7297_v1 = vld [vmem:[#allocation10_spill] sm:$0xff] }
 0x2f8   : > { %v1911_v29 = vrot.slane %v6201_v4, 2  ;;  %v1811_v0 = vrot.slane %v6201_v4, 1  ;;  %2359 = vmatmul.f32.gmra.mxu3 %v2176_v43 }
 0x2f9   : > { %v1662_v61 = vadd.f32 %v5826_v13, %v1639_v41  ;;  %v7296_v41 = vld [vmem:[#allocation72_spill] sm:$0xff] }
 0x2fa   : > { %v1912_v44 = vsel %vm7090_vm0, %v1909_v33, %v1911_v29  ;;  %v1812_v39 = vsel %vm7288_vm2, %v1809_v5, %v1811_v0  ;;  %v2011_v33 = vrot.slane %v6201_v4, 3  ;;  %v1239_v5 = vadd.f32 %v1205_v26, %v1105_v9  ;;  %2255 = vmatmul.f32.gmra.mxu2 %v2176_v43 }
 0x2fb   : > { %v1682_v54 = vmul.f32 0.1, %v1662_v61  ;;  %2047 = vrot.lane.b32.xlu2 %v2010_v58, %s4533_s12  ;;  %1949 = vrot.lane.b32.xlu1 %v1912_v44, %s4535_s24  ;;  %vm7293_vm2 = vcmask 1044480   ;;  %v4247_v58 = vld [vmem:[%s7040_s4 + $0x108] sm:$0xff] }
 0x2fc   : > { %1849 = vrot.lane.b32.xlu0 %v1812_v39, %s4534_s13  ;;  %v1373_v26 = vadd.f32 %v6179_v25, %v1239_v5  ;;  %v2012_v38 = vsel %vm7293_vm2, %v2009_v11, %v2011_v33  ;;  %v7295_v25 = vld [vmem:[#allocation53_spill] sm:$0xff]  ;;  %vm7298_vm2 = vnez %v7297_v1  ;;  %2490 = vmatpush.msra.mxu0 %v4247_v58  ;;  %v1348_v51 = vpop.f32.mrf.mxu3 }
 0x2fd   : > { %v1702_v31 = vmax.f32 %v1662_v61, %v1682_v54  ;;  %v1106_v42 = vadd.f32 %v7296_v41, %v7295_v25  ;;  %v4246_v54 = vld [vmem:[%s7040_s4 + $0x100] sm:$0xff]  ;;  %v7302_v5 = vld [vmem:[#allocation73_spill] sm:$0xff]  ;;  %v7306_v25 = vld [vmem:[#allocation59_spill] sm:$0xff] }
 0x2fe   : > { %v1604_v59 = vpop.f32.mrf.mxu1  ;;  %v1507_v27 = vadd.f32 %v1473_v21, %v1373_v26  ;;  %v4263_v21 = vld [vmem:[%s7040_s4 + $0x188] sm:$0xff]  ;;  %2491 = vmatpush.msra.mxu0 %v4246_v54 }
 0x2ff   : > { %v6230_v34 = vsel %vm7292_vm9, %v1702_v31, 0.0  ;;  %v1640_v22 = vadd.f32 %v1604_v59, %v1506_v8  ;;  %vm7294_vm9 = vcmask 1046528   ;;  %2659 = vmatpush.msrb.mxu1 %v4263_v21  ;;  %v2177_v8 = vld [vmem:[#allocation3 + $0x30] sm:$0xff]  ;;  %v7301_v59 = vld [vmem:[#allocation55_spill] sm:$0xff] }
 0x300   : > { %v1913_v17 = vrot.slane %v6230_v34, 2  ;;  %v1813_v32 = vrot.slane %v6230_v34, 1  ;;  %2492 = vmatmul.f32.vlgmr.msra.gmra.mxu0 %v2177_v8  ;;  %v1107_v15 = vadd.f32 %v7302_v5, %v7301_v59  ;;  %2362 = vmatmul.f32.gmra.mxu3 %v2177_v8 }
 0x301   : > { %v1663_v37 = vadd.f32 %v5826_v13, %v1640_v22  ;;  %v1214_v22 = vpop.f32.mrf.mxu2 }
 0x302   : > { %v1914_v63 = vsel %vm7090_vm0, %v1911_v29, %v1913_v17  ;;  %v1814_v30 = vsel %vm7294_vm9, %v1811_v0, %v1813_v32  ;;  %v2013_v29 = vrot.slane %v6230_v34, 3  ;;  %v1240_v0 = vadd.f32 %v1208_v52, %v1106_v42  ;;  %2258 = vmatmul.f32.gmra.mxu2 %v2177_v8 }
 0x303   : > { %v1683_v60 = vmul.f32 0.1, %v1663_v37  ;;  %2049 = vrot.lane.b32.xlu2 %v2012_v38, %s4533_s12  ;;  %1951 = vrot.lane.b32.xlu1 %v1914_v63, %s4535_s24  ;;  %vm7299_vm9 = vcmask 1044480   ;;  %v1241_v26 = vadd.f32 %v1211_v10, %v1107_v15  ;;  %v7313_v15 = vld [vmem:[#allocation54_spill] sm:$0xff] }
 0x304   : > { %1851 = vrot.lane.b32.xlu0 %v1814_v30, %s4534_s13  ;;  %v1374_v52 = vadd.f32 %v1342_v16, %v1240_v0  ;;  %v2014_v35 = vsel %vm7299_vm9, %v2011_v33, %v2013_v29  ;;  %v1479_v16 = vpop.f32.mrf.mxu0  ;;  %v7309_v0 = vld [vmem:[#allocation60_spill] sm:$0xff] }
 0x305   : > { %v1703_v20 = vmax.f32 %v1663_v37, %v1683_v60  ;;  %v7303_v37 = vld [vmem:[#allocation17_spill] sm:$0xff]  ;;  %v7305_v60 = vld [vmem:[#allocation52_spill] sm:$0xff]  ;;  %v1375_v41 = vadd.f32 %v1345_v7, %v1241_v26  ;;  %v7310_v7 = vld [vmem:[#allocation74_spill] sm:$0xff] }
 0x306   : > { %v1607_v11 = vpop.f32.mrf.mxu1  ;;  %v1508_v33 = vadd.f32 %v1476_v28, %v1374_v52  ;;  %vm7304_vm9 = vnez %v7303_v37  ;;  %v833_v28 = vadd.f32 %v7306_v25, %v7305_v60  ;;  %v7317_v60 = vld [vmem:[#allocation64_spill] sm:$0xff] }
 0x307   : > { %v6253_v61 = vsel %vm7298_vm2, %v1703_v20, 0.0  ;;  %v1641_v40 = vadd.f32 %v1607_v11, %v1507_v27  ;;  %vm7300_vm2 = vcmask 1046528   ;;  %v2178_v11 = vld [vmem:[#allocation3 + $0x38] sm:$0xff]  ;;  %v1509_v21 = vadd.f32 %v1479_v16, %v1375_v41  ;;  %v1351_v16 = vpop.f32.mrf.mxu3 }
 0x308   : > { %v1915_v44 = vrot.slane %v6253_v61, 2  ;;  %v1815_v39 = vrot.slane %v6253_v61, 1  ;;  %v974_v1 = vadd.f32 %v7309_v0, %v833_v28  ;;  %2495 = vmatmul.f32.gmra.mxu0 %v2178_v11  ;;  %2365 = vmatmul.f32.gmra.mxu3 %v2178_v11  ;;  %v7318_v41 = vld [vmem:[#allocation75_spill] sm:$0xff] }
 0x309   : > { %v1664_v12 = vadd.f32 %v5826_v13, %v1641_v40 }
 0x30a   : > { %v1916_v24 = vsel %vm7090_vm0, %v1913_v17, %v1915_v44  ;;  %v1816_v9 = vsel %vm7300_vm2, %v1813_v32, %v1815_v39  ;;  %v2015_v32 = vrot.slane %v6253_v61, 3  ;;  %vm7307_vm2 = vcmask 1044480   ;;  %2261 = vmatmul.f32.gmra.mxu2 %v2178_v11 }
 0x30b   : > { %v1684_v31 = vmul.f32 0.1, %v1664_v12  ;;  %2051 = vrot.lane.b32.xlu2 %v2014_v35, %s4533_s12  ;;  %1953 = vrot.lane.b32.xlu1 %v1916_v24, %s4535_s24  ;;  %v1108_v58 = vadd.f32 %v7310_v7, %v974_v1  ;;  %v1217_v35 = vpop.f32.mrf.mxu2  ;;  %v7311_v24 = vld [vmem:[#allocation11_spill] sm:$0xff] }
 0x30c   : > { %1853 = vrot.lane.b32.xlu0 %v1816_v9, %s4534_s13  ;;  %v2016_v27 = vsel %vm7307_vm2, %v2013_v29, %v2015_v32 }
 0x30d   : > { %v1704_v6 = vmax.f32 %v1664_v12, %v1684_v31  ;;  %v1242_v54 = vadd.f32 %v1214_v22, %v1108_v58  ;;  %v4262_v31 = vld [vmem:[%s7040_s4 + $0x180] sm:$0xff] }
 0x30e   : > { %v1610_v17 = vpop.f32.mrf.mxu1  ;;  %2660 = vmatpush.msrb.mxu1 %v4262_v31  ;;  %v7321_v58 = vld [vmem:[#allocation56_spill] sm:$0xff] }
 0x30f   : > { %v6278_v38 = vsel %vm7304_vm9, %v1704_v6, 0.0  ;;  %v1642_v63 = vadd.f32 %v1610_v17, %v1508_v33  ;;  %v7314_v33 = vld [vmem:[#allocation63_spill] sm:$0xff]  ;;  %v1376_v22 = vadd.f32 %v1348_v51, %v1242_v54  ;;  %vm7315_vm9 = vmmov %vm7307_vm2  ;;  %vm7316_vm2 = vcmask 1046528  }
 0x310   : > { %v1917_v30 = vrot.slane %v6278_v38, 2  ;;  %v1817_v43 = vrot.slane %v6278_v38, 1  ;;  %v2017_v12 = vrot.slane %v6278_v38, 3  ;;  %v836_v6 = vadd.f32 %v7314_v33, %v7313_v15  ;;  %v7323_v15 = vld [vmem:[#allocation67_spill] sm:$0xff] }
 0x311   : > { %v1665_v42 = vadd.f32 %v5826_v13, %v1642_v63 }
 0x312   : > { %v1918_v20 = vsel %vm7090_vm0, %v1915_v44, %v1917_v30  ;;  %v1818_v10 = vsel %vm7308_vm1, %v1815_v39, %v1817_v43  ;;  %v1482_v44 = vpop.f32.mrf.mxu0  ;;  %vm7312_vm1 = vnez %v7311_v24  ;;  %v2018_v26 = vsel %vm7315_vm9, %v2015_v32, %v2017_v12  ;;  %v1354_v24 = vpop.f32.mrf.mxu3 }
 0x313   : > { %v1685_v40 = vmul.f32 0.1, %v1665_v42  ;;  %2053 = vrot.lane.b32.xlu2 %v2016_v27, %s4533_s12  ;;  %1955 = vrot.lane.b32.xlu1 %v1918_v20, %s4535_s24  ;;  %v975_v25 = vadd.f32 %v7317_v60, %v836_v6  ;;  %v1510_v51 = vadd.f32 %v1482_v44, %v1376_v22  ;;  %v1220_v44 = vpop.f32.mrf.mxu2  ;;  %v7324_v22 = vld [vmem:[#allocation76_spill] sm:$0xff] }
 0x314   : > { %1855 = vrot.lane.b32.xlu0 %v1818_v10, %s4534_s13 }
 0x315   : > { %v1705_v52 = vmax.f32 %v1665_v42, %v1685_v40  ;;  %v6293_v29 = vpop.permute.xlu2 %1933  ;;  %v1109_v42 = vadd.f32 %v7318_v41, %v975_v25  ;;  %v7325_v25 = vld [vmem:[#allocation12_spill] sm:$0xff] }
 0x316   : > { %v1613_v39 = vpop.f32.mrf.mxu1 }
 0x317   : > { %v6298_v9 = vsel %vm7312_vm1, %v1705_v52, 0.0  ;;  %v1643_v8 = vadd.f32 %v1613_v39, %v1509_v21  ;;  %v1243_v10 = vadd.f32 %v1217_v35, %v1109_v42  ;;  %v7322_v21 = vld [vmem:[#allocation66_spill] sm:$0xff]  ;;  %v7327_v42 = vld [vmem:[#allocation57_spill] sm:$0xff] }
 0x318   : > { %v1919_v59 = vrot.slane %v6298_v9, 2  ;;  %v1819_v5 = vrot.slane %v6298_v9, 1  ;;  %v839_v52 = vadd.f32 %v7322_v21, %v7321_v58 }
 0x319   : > { %v1666_v17 = vadd.f32 %v5826_v13, %v1643_v8  ;;  %v1377_v39 = vadd.f32 %v1351_v16, %v1243_v10 }
 0x31a   : > { %v1920_v37 = vsel %vm7090_vm0, %v1917_v30, %v1919_v59  ;;  %v1820_v63 = vsel %vm7316_vm2, %v1817_v43, %v1819_v5  ;;  %v2019_v30 = vrot.slane %v6298_v9, 3  ;;  %v7319_v43 = vld [vmem:[#allocation18_spill] sm:$0xff]  ;;  %v1485_v1 = vpop.f32.mrf.mxu0  ;;  %v976_v33 = vadd.f32 %v7323_v15, %v839_v52 }
 0x31b   : > { %v1686_v28 = vmul.f32 0.1, %v1666_v17  ;;  %2055 = vrot.lane.b32.xlu2 %v2018_v26, %s4533_s12  ;;  %1957 = vrot.lane.b32.xlu1 %v1920_v37, %s4535_s24  ;;  %vm7320_vm1 = vnez %v7319_v43 }
 0x31c   : > { %1857 = vrot.lane.b32.xlu0 %v1820_v63, %s4534_s13  ;;  %v2020_v35 = vsel %vm7315_vm9, %v2017_v12, %v2019_v30  ;;  %v1110_v16 = vadd.f32 %v7324_v22, %v976_v33 }
 0x31d   : > { %v1706_v27 = vmax.f32 %v1666_v17, %v1686_v28  ;;  %v6316_v20 = vpop.permute.xlu2 %2033  ;;  %v1511_v17 = vadd.f32 %v1485_v1, %v1377_v39  ;;  %v7329_v1 = vld [vmem:[#allocation70_spill] sm:$0xff] }
 0x31e   : > { %v1616_v32 = vpop.f32.mrf.mxu1  ;;  %v1244_v60 = vadd.f32 %v1220_v44, %v1110_v16 }
 0x31f   : > { %v6321_v11 = vsel %vm7320_vm1, %v1706_v27, 0.0  ;;  %v1644_v0 = vadd.f32 %v1616_v32, %v1510_v51  ;;  %vm7326_vm1 = vnez %v7325_v25  ;;  %v7328_v51 = vld [vmem:[#allocation69_spill] sm:$0xff] }
 0x320   : > { %v1921_v40 = vrot.slane %v6321_v11, 2  ;;  %v1821_v7 = vrot.slane %v6321_v11, 1  ;;  %v842_v27 = vadd.f32 %v7328_v51, %v7327_v42  ;;  %v1378_v43 = vadd.f32 %v1354_v24, %v1244_v60  ;;  %v1357_v24 = vpop.f32.mrf.mxu3 }
 0x321   : > { %v1667_v54 = vadd.f32 %v5826_v13, %v1644_v0 }
 0x322   : > { %v1922_v8 = vsel %vm7090_vm0, %v1919_v59, %v1921_v40  ;;  %v1822_v31 = vsel %vm7316_vm2, %v1819_v5, %v1821_v7  ;;  %v2021_v5 = vrot.slane %v6321_v11, 3  ;;  %v977_v58 = vadd.f32 %v7329_v1, %v842_v27  ;;  %v1488_v21 = vpop.f32.mrf.mxu0 }
 0x323   : > { %v1687_v6 = vmul.f32 0.1, %v1667_v54  ;;  %2057 = vrot.lane.b32.xlu2 %v2020_v35, %s4533_s12  ;;  %1959 = vrot.lane.b32.xlu1 %v1922_v8, %s4535_s24 }
 0x324   : > { %1859 = vrot.lane.b32.xlu0 %v1822_v31, %s4534_s13  ;;  %v2022_v52 = vsel %vm7315_vm9, %v2019_v30, %v2021_v5  ;;  %v1111_v8 = vadd.f32 %v5814_v48, %v977_v58  ;;  %v1512_v31 = vadd.f32 %v1488_v21, %v1378_v43  ;;  %vm7091_vm9 = vcmask 785408  }
 0x325   : > { %v1707_v26 = vmax.f32 %v1667_v54, %v1687_v6  ;;  %v6336_v37 = vpop.permute.xlu2 %2035  ;;  %v2032_v12 = vpop.permute.xlu1 %2031 }
 0x326   : > { %v1832_v63 = vpop.permute.xlu0 %1831  ;;  %v1619_v59 = vpop.f32.mrf.mxu1 }
 0x327   : > { %v6341_v28 = vsel %vm7326_vm1, %v1707_v26, 0.0  ;;  %v1645_v41 = vadd.f32 %v1619_v59, %v1511_v17  ;;  %v1223_v54 = vpop.f32.mrf.mxu2  ;;  %vm2111_vm1 = vcmask 523264   ;;  %v7332_v17 = vld [vmem:[#allocation19_spill] sm:$0xff] }
 0x328   : > { %v1923_v32 = vrot.slane %v6341_v28, 2  ;;  %v1823_v10 = vrot.slane %v6341_v28, 1  ;;  %v2023_v48 = vrot.slane %v6341_v28, 3  ;;  %vm7333_vm3 = vnez %v7332_v17  ;;  %v7343_v17 = vld [vmem:[#allocation20_spill] sm:$0xff] }
 0x329   : > { %v1668_v0 = vadd.f32 %v5826_v13, %v1645_v41 }
 0x32a   : > { %v1924_v44 = vsel %vm7090_vm0, %v1921_v40, %v1923_v32  ;;  %v1824_v39 = vsel %vm7316_vm2, %v1821_v7, %v1823_v10  ;;  %v1245_v40 = vadd.f32 %v1223_v54, %v1111_v8  ;;  %vm7330_vm2 = vcmask 261120  }
 0x32b   : > { %v1688_v35 = vmul.f32 0.1, %v1668_v0  ;;  %2059 = vrot.lane.b32.xlu2 %v2022_v52, %s4533_s12  ;;  %1961 = vrot.lane.b32.xlu1 %v1924_v44, %s4535_s24  ;;  %v2091_v7 = vsel %vm7330_vm2, %v5880_v49, %v1832_v63  ;;  %vm7331_vm0 = vmmov %vm7330_vm2  ;;  %vm7336_vm2 = vcmask 1046528  }
 0x32c   : > { %1861 = vrot.lane.b32.xlu0 %v1824_v39, %s4534_s13  ;;  %v1379_v42 = vadd.f32 %v1357_v24, %v1245_v40  ;;  %v7337_v39 = vld [vmem:[#allocation13_spill] sm:$0xff] }
 0x32d   : > { %v1708_v15 = vmax.f32 %v1668_v0, %v1688_v35  ;;  %v6356_v33 = vpop.permute.xlu2 %2037  ;;  %v1834_v30 = vpop.permute.xlu1 %1833 }
 0x32e   : > { %v2092_v6 = vsel %vm7331_vm0, %v5885_v18, %v1834_v30  ;;  %v1932_v22 = vpop.permute.xlu0 %1931  ;;  %v1622_v16 = vpop.f32.mrf.mxu1  ;;  %vm7335_vm0 = vcmask 1045504  }
 0x32f   : > { %v6365_v26 = vsel %vm7333_vm3, %v1708_v15, 0.0  ;;  %v2113_v59 = vsel %vm2111_vm1, %v2092_v6, %v6293_v29  ;;  %v2112_v60 = vsel %vm2111_vm1, %v2091_v7, %v1932_v22  ;;  %v1646_v25 = vadd.f32 %v1622_v16, %v1512_v31 }
 0x330   : > { %v2134_v49 = vsel %vm7091_vm9, %v2113_v59, %v6316_v20  ;;  %v2133_v63 = vsel %vm7091_vm9, %v2112_v60, %v2032_v12  ;;  %v1925_v18 = vrot.slane %v6365_v26, 2  ;;  %v1825_v41 = vrot.slane %v6365_v26, 1  ;;  %v1491_v20 = vpop.f32.mrf.mxu0 }
 0x331   : > { %2154 = vst [vmem:[#allocation3 + $0x49] sm:$0xff] %v2134_v49  ;;  %v1669_v51 = vadd.f32 %v5826_v13, %v1646_v25  ;;  %vm7334_vm3 = vcmask 1044480   ;;  %v1513_v12 = vadd.f32 %v1491_v20, %v1379_v42  ;;  %v2025_v54 = vrot.slane %v6365_v26, 3 }
 0x332   : > { %2153 = vst [vmem:[#allocation3 + $0x41] sm:$0xff] %v2133_v63  ;;  %v2024_v27 = vsel %vm7334_vm3, %v2021_v5, %v2023_v48  ;;  %v1926_v29 = vsel %vm7335_vm0, %v1923_v32, %v1925_v18  ;;  %v1826_v43 = vsel %vm7336_vm2, %v1823_v10, %v1825_v41  ;;  %vm7338_vm3 = vnez %v7337_v39 }
 0x333   : > { %v1689_v0 = vmul.f32 0.1, %v1669_v51  ;;  %2061 = vrot.lane.b32.xlu2 %v2024_v27, %s4533_s12  ;;  %1963 = vrot.lane.b32.xlu1 %v1926_v29, %s4535_s24  ;;  %vm7339_vm0 = vcmask 261120   ;;  %vm7340_vm2 = vcmask 1045504  }
 0x334   : > { %1863 = vrot.lane.b32.xlu0 %v1826_v43, %s4534_s13 }
 0x335   : > { %v1709_v1 = vmax.f32 %v1669_v51, %v1689_v0  ;;  %v2040_v58 = vpop.permute.xlu2 %2039  ;;  %v1936_v21 = vpop.permute.xlu1 %1935 }
 0x336   : > { %v1836_v52 = vpop.permute.xlu0 %1835  ;;  %v1625_v44 = vpop.f32.mrf.mxu1 }
 0x337   : > { %v6384_v5 = vsel %vm7338_vm3, %v1709_v1, 0.0  ;;  %v2093_v32 = vsel %vm7339_vm0, %v5925_v14, %v1836_v52  ;;  %v1647_v10 = vadd.f32 %v1625_v44, %v1513_v12  ;;  %vm7341_vm3 = vcmask 1046528  }
 0x338   : > { %v2114_v35 = vsel %vm2111_vm1, %v2093_v32, %v1936_v21  ;;  %v1927_v8 = vrot.slane %v6384_v5, 2  ;;  %v1827_v24 = vrot.slane %v6384_v5, 1  ;;  %vm7342_vm0 = vcmask 1044480  }
 0x339   : > { %v2135_v31 = vsel %vm7091_vm9, %v2114_v35, %v6336_v37  ;;  %v1670_v15 = vadd.f32 %v5826_v13, %v1647_v10  ;;  %v2179_v30 = vld [vmem:[#allocation3 + $0x40] sm:$0xff]  ;;  %v2026_v6 = vsel %vm7342_vm0, %v2023_v48, %v2025_v54  ;;  %vm7344_vm9 = vnez %v7343_v17  ;;  %v3183_v35 = vld [vmem:[%s7042_s6 + $0x18] sm:$0xff] }
 0x33a   : > { %2155 = vst [vmem:[#allocation3 + $0x51] sm:$0xff] %v2135_v31  ;;  %2264 = vmatmul.f32.gmra.mxu2 %v2179_v30  ;;  %2368 = vmatmul.f32.gmra.mxu3 %v2179_v30  ;;  %v1928_v14 = vsel %vm7340_vm2, %v1925_v18, %v1927_v8  ;;  %v1828_v40 = vsel %vm7341_vm3, %v1825_v41, %v1827_v24  ;;  %vm7345_vm2 = vcmask 261120   ;;  %v2027_v25 = vrot.slane %v6384_v5, 3  ;;  %v2180_v41 = vld [vmem:[#allocation3 + $0x48] sm:$0xff] }
 0x33b   : > { %v1690_v7 = vmul.f32 0.1, %v1670_v15  ;;  %2498 = vmatmul.f32.gmra.mxu0 %v2179_v30  ;;  %2661 = vmatmul.f32.vlgmr.msrb.gmra.mxu1 %v2179_v30  ;;  %vm7346_vm3 = vcmask 785408   ;;  %vm7348_vm0 = vcmask 1046528  }
 0x33c   : > { %2063 = vrot.lane.b32.xlu2 %v2026_v6, %s4533_s12  ;;  %1965 = vrot.lane.b32.xlu1 %v1928_v14, %s4535_s24 }
 0x33d   : > { %v1710_v37 = vmax.f32 %v1670_v15, %v1690_v7  ;;  %1865 = vrot.lane.b32.xlu0 %v1828_v40, %s4534_s13  ;;  %v2042_v13 = vpop.permute.xlu2 %2041  ;;  %v1938_v22 = vpop.permute.xlu1 %1937  ;;  %3394 = vmatpush.msrb.mxu3 %v3183_v35 }
 0x33e   : > { %v1838_v16 = vpop.permute.xlu0 %1837 }
 0x33f   : > { %v6403_v59 = vsel %vm7344_vm9, %v1710_v37, 0.0  ;;  %v2094_v60 = vsel %vm7345_vm2, %v5966_v36, %v1838_v16  ;;  %vm7347_vm9 = vcmask 1045504   ;;  %vm7349_vm2 = vcmask 1044480  }
 0x340   : > { %v2115_v48 = vsel %vm2111_vm1, %v2094_v60, %v1938_v22  ;;  %v1929_v49 = vrot.slane %v6403_v59, 2  ;;  %v1829_v63 = vrot.slane %v6403_v59, 1  ;;  %v2028_v36 = vsel %vm7349_vm2, %v2025_v54, %v2027_v25  ;;  %v4281_v54 = vld [vmem:[%s7042_s6 + $0x38] sm:$0xff] }
 0x341   : > { %v2136_v18 = vsel %vm7346_vm3, %v2115_v48, %v6356_v33  ;;  %vm7350_vm3 = vcmask 261120   ;;  %v2029_v0 = vrot.slane %v6403_v59, 3  ;;  %v2181_v1 = vld [vmem:[#allocation3 + $0x50] sm:$0xff]  ;;  %3287 = vmatpush.msrb.mxu2 %v4281_v54 }
 0x342   : > { %2156 = vst [vmem:[#allocation3 + $0x59] sm:$0xff] %v2136_v18  ;;  %2267 = vmatmul.f32.gmra.mxu2 %v2180_v41  ;;  %2371 = vmatmul.f32.gmra.mxu3 %v2180_v41  ;;  %v1930_v42 = vsel %vm7347_vm9, %v1927_v8, %v1929_v49  ;;  %v1830_v51 = vsel %vm7348_vm0, %v1827_v24, %v1829_v63  ;;  %vm7351_vm9 = vcmask 785408   ;;  %vm7352_vm0 = vmmov %vm7349_vm2 }
 0x343   : > { %2501 = vmatmul.f32.gmra.mxu0 %v2180_v41  ;;  %2664 = vmatmul.f32.gmra.mxu1 %v2180_v41  ;;  %v2030_v21 = vsel %vm7352_vm0, %v2027_v25, %v2029_v0  ;;  %vm7353_vm2 = vmmov %vm7350_vm3 }
 0x344   : > { %2065 = vrot.lane.b32.xlu2 %v2028_v36, %s4533_s12  ;;  %1967 = vrot.lane.b32.xlu1 %v1930_v42, %s4535_s24 }
 0x345   : > { %1867 = vrot.lane.b32.xlu0 %v1830_v51, %s4534_s13  ;;  %v2044_v27 = vpop.permute.xlu2 %2043  ;;  %v1940_v33 = vpop.permute.xlu1 %1939 }
 0x346   : > { %v1840_v29 = vpop.permute.xlu0 %1839 }
 0x347   : > { %v2095_v43 = vsel %vm7350_vm3, %v5996_v19, %v1840_v29  ;;  %vm7354_vm3 = vmmov %vm7351_vm9 }
 0x348   : > { %v2116_v20 = vsel %vm2111_vm1, %v2095_v43, %v1940_v33  ;;  %vm7356_vm0 = vmmov %vm7354_vm3 }
 0x349   : > { %v2137_v12 = vsel %vm7351_vm9, %v2116_v20, %v2040_v58  ;;  %v2182_v10 = vld [vmem:[#allocation3 + $0x58] sm:$0xff]  ;;  %vm7355_vm9 = vmmov %vm7353_vm2 }
 0x34a   : > { %2157 = vst [vmem:[#allocation3 + $0x61] sm:$0xff] %v2137_v12  ;;  %2270 = vmatmul.f32.gmra.mxu2 %v2181_v1  ;;  %2374 = vmatmul.f32.gmra.mxu3 %v2181_v1 }
 0x34b   : > { %2504 = vmatmul.f32.gmra.mxu0 %v2181_v1  ;;  %2667 = vmatmul.f32.gmra.mxu1 %v2181_v1 }
 0x34c   : > { %2067 = vrot.lane.b32.xlu2 %v2030_v21, %s4533_s12  ;;  %1969 = vrot.lane.b32.xlu1 %v1929_v49, %s4535_s24 }
 0x34d   : > { %1869 = vrot.lane.b32.xlu0 %v1829_v63, %s4534_s13  ;;  %v2046_v19 = vpop.permute.xlu2 %2045  ;;  %v1942_v52 = vpop.permute.xlu1 %1941 }
 0x34e   : > { %v1842_v44 = vpop.permute.xlu0 %1841 }
 0x34f   : > { %v2096_v58 = vsel %vm7353_vm2, %v6026_v23, %v1842_v44 }
 0x350   : > { %v2117_v39 = vsel %vm2111_vm1, %v2096_v58, %v1942_v52  ;;  %v4280_v58 = vld [vmem:[%s7042_s6 + $0x30] sm:$0xff] }
 0x351   : > { %v2138_v32 = vsel %vm7354_vm3, %v2117_v39, %v2042_v13  ;;  %v2183_v14 = vld [vmem:[#allocation3 + $0x60] sm:$0xff]  ;;  %vm7357_vm3 = vmmov %vm7356_vm0  ;;  %3288 = vmatpush.msrb.mxu2 %v4280_v58 }
 0x352   : > { %2158 = vst [vmem:[#allocation3 + $0x69] sm:$0xff] %v2138_v32  ;;  %2273 = vmatmul.f32.gmra.mxu2 %v2182_v10  ;;  %2377 = vmatmul.f32.gmra.mxu3 %v2182_v10 }
 0x353   : > { %2507 = vmatmul.f32.gmra.mxu0 %v2182_v10  ;;  %2670 = vmatmul.f32.gmra.mxu1 %v2182_v10 }
 0x354   : > { %2069 = vrot.lane.b32.xlu2 %v2029_v0, %s4533_s12 }
 0x355   : > { %v2048_v23 = vpop.permute.xlu2 %2047  ;;  %v1944_v8 = vpop.permute.xlu1 %1943 }
 0x356   : > { %v1844_v24 = vpop.permute.xlu0 %1843 }
 0x357   : > { %v2097_v31 = vsel %vm7355_vm9, %v6063_v3, %v1844_v24  ;;  %vm7358_vm9 = vmmov %vm7353_vm2 }
 0x358   : > { %v2118_v15 = vsel %vm2111_vm1, %v2097_v31, %v1944_v8 }
 0x359   : > { %v2139_v30 = vsel %vm7356_vm0, %v2118_v15, %v2044_v27  ;;  %v2184_v22 = vld [vmem:[#allocation3 + $0x68] sm:$0xff] }
 0x35a   : > { %2159 = vst [vmem:[#allocation3 + $0x71] sm:$0xff] %v2139_v30  ;;  %2276 = vmatmul.f32.gmra.mxu2 %v2183_v14  ;;  %2380 = vmatmul.f32.gmra.mxu3 %v2183_v14 }
 0x35b   : > { %2510 = vmatmul.f32.gmra.mxu0 %v2183_v14  ;;  %2673 = vmatmul.f32.gmra.mxu1 %v2183_v14 }
 0x35d   : > { %v2050_v40 = vpop.permute.xlu2 %2049  ;;  %v1946_v7 = vpop.permute.xlu1 %1945 }
 0x35e   : > { %v1846_v6 = vpop.permute.xlu0 %1845 }
 0x35f   : > { %v2098_v37 = vsel %vm7353_vm2, %v6100_v62, %v1846_v6 }
 0x360   : > { %v2119_v13 = vsel %vm2111_vm1, %v2098_v37, %v1946_v7 }
 0x361   : > { %v2140_v3 = vsel %vm7357_vm3, %v2119_v13, %v2046_v19  ;;  %v2185_v49 = vld [vmem:[#allocation3 + $0x70] sm:$0xff]  ;;  %vm7359_vm3 = vmmov %vm7356_vm0 }
 0x362   : > { %2160 = vst [vmem:[#allocation3 + $0x79] sm:$0xff] %v2140_v3  ;;  %2279 = vmatmul.f32.gmra.mxu2 %v2184_v22  ;;  %2383 = vmatmul.f32.gmra.mxu3 %v2184_v22 }
 0x363   : > { %2513 = vmatmul.f32.gmra.mxu0 %v2184_v22  ;;  %2676 = vmatmul.f32.gmra.mxu1 %v2184_v22  ;;  %v6463_v44 = vpop.f32.mrf.mxu3 }
 0x365   : > { %v1948_v16 = vpop.permute.xlu1 %1947  ;;  %v2052_v60 = vpop.permute.xlu2 %2051 }
 0x366   : > { %v1848_v17 = vpop.permute.xlu0 %1847 }
 0x367   : > { %v2099_v25 = vsel %vm7358_vm9, %v6143_v53, %v1848_v17  ;;  %vm7360_vm9 = vmmov %vm7353_vm2 }
 0x368   : > { %v2120_v48 = vsel %vm2111_vm1, %v2099_v25, %v1948_v16 }
 0x369   : > { %v2141_v62 = vsel %vm7356_vm0, %v2120_v48, %v2048_v23  ;;  %v2186_v36 = vld [vmem:[#allocation3 + $0x78] sm:$0xff] }
 0x36a   : > { %2161 = vst [vmem:[#allocation3 + $0x81] sm:$0xff] %v2141_v62  ;;  %2282 = vmatmul.f32.gmra.mxu2 %v2185_v49  ;;  %2386 = vmatmul.f32.gmra.mxu3 %v2185_v49 }
 0x36b   : > { %2516 = vmatmul.f32.gmra.mxu0 %v2185_v49  ;;  %2679 = vmatmul.f32.gmra.mxu1 %v2185_v49  ;;  %v6475_v24 = vpop.f32.mrf.mxu3 }
 0x36d   : > { %v1950_v63 = vpop.permute.xlu1 %1949  ;;  %v2054_v51 = vpop.permute.xlu2 %2053 }
 0x36e   : > { %v1850_v18 = vpop.permute.xlu0 %1849 }
 0x36f   : > { %v2100_v41 = vsel %vm7353_vm2, %v6171_v50, %v1850_v18 }
 0x370   : > { %v2121_v42 = vsel %vm2111_vm1, %v2100_v41, %v1950_v63 }
 0x371   : > { %v2142_v53 = vsel %vm7359_vm3, %v2121_v42, %v2050_v40  ;;  %v2187_v0 = vld [vmem:[#allocation3 + $0x80] sm:$0xff]  ;;  %vm7361_vm3 = vmmov %vm7356_vm0 }
 0x372   : > { %2162 = vst [vmem:[#allocation3 + $0x89] sm:$0xff] %v2142_v53  ;;  %2285 = vmatmul.f32.gmra.mxu2 %v2186_v36  ;;  %2389 = vmatmul.f32.gmra.mxu3 %v2186_v36 }
 0x373   : > { %2519 = vmatmul.f32.gmra.mxu0 %v2186_v36  ;;  %2682 = vmatmul.f32.gmra.mxu1 %v2186_v36  ;;  %v6481_v13 = vpop.f32.mrf.mxu3 }
 0x375   : > { %v1952_v27 = vpop.permute.xlu1 %1951  ;;  %v2056_v20 = vpop.permute.xlu2 %2055 }
 0x376   : > { %v1852_v33 = vpop.permute.xlu0 %1851  ;;  %v2253_v6 = vpop.f32.mrf.mxu2 }
 0x377   : > { %v2101_v29 = vsel %vm7360_vm9, %v6201_v4, %v1852_v33  ;;  %vm7362_vm9 = vmmov %vm7353_vm2 }
 0x378   : > { %v2122_v43 = vsel %vm2111_vm1, %v2101_v29, %v1952_v27 }
 0x379   : > { %v2143_v50 = vsel %vm7356_vm0, %v2122_v43, %v2052_v60  ;;  %v2188_v52 = vld [vmem:[#allocation3 + $0x88] sm:$0xff] }
 0x37a   : > { %2163 = vst [vmem:[#allocation3 + $0x91] sm:$0xff] %v2143_v50  ;;  %2288 = vmatmul.f32.gmra.mxu2 %v2187_v0  ;;  %2392 = vmatmul.f32.gmra.mxu3 %v2187_v0 }
 0x37b   : > { %2522 = vmatmul.f32.gmra.mxu0 %v2187_v0  ;;  %2685 = vmatmul.f32.gmra.mxu1 %v2187_v0  ;;  %v6489_v63 = vpop.f32.mrf.mxu3 }
 0x37d   : > { %v1954_v12 = vpop.permute.xlu1 %1953  ;;  %v2058_v39 = vpop.permute.xlu2 %2057 }
 0x37e   : > { %v1854_v1 = vpop.permute.xlu0 %1853  ;;  %v2256_v49 = vpop.f32.mrf.mxu2 }
 0x37f   : > { %v2102_v21 = vsel %vm7353_vm2, %v6230_v34, %v1854_v1  ;;  %v3182_v34 = vld [vmem:[%s7042_s6 + $0x10] sm:$0xff] }
 0x380   : > { %v2123_v19 = vsel %vm2111_vm1, %v2102_v21, %v1954_v12  ;;  %3395 = vmatpush.msrb.mxu3 %v3182_v34  ;;  %v2352_v21 = vadd.f32 %v6463_v44, %v2253_v6 }
 0x381   : > { %v2144_v4 = vsel %vm7361_vm3, %v2123_v19, %v2054_v51  ;;  %v2189_v8 = vld [vmem:[#allocation3 + $0x90] sm:$0xff]  ;;  %vm7363_vm3 = vmmov %vm7356_vm0  ;;  %v2493_v51 = vpop.f32.mrf.mxu0 }
 0x382   : > { %2164 = vst [vmem:[#allocation3 + $0x99] sm:$0xff] %v2144_v4  ;;  %2291 = vmatmul.f32.gmra.mxu2 %v2188_v52  ;;  %2395 = vmatmul.f32.gmra.mxu3 %v2188_v52 }
 0x383   : > { %2525 = vmatmul.f32.gmra.mxu0 %v2188_v52  ;;  %2688 = vmatmul.f32.gmra.mxu1 %v2188_v52  ;;  %v6497_v50 = vpop.f32.mrf.mxu3 }
 0x385   : > { %v1956_v32 = vpop.permute.xlu1 %1955  ;;  %v2060_v30 = vpop.permute.xlu2 %2059 }
 0x386   : > { %v1856_v10 = vpop.permute.xlu0 %1855  ;;  %v2259_v43 = vpop.f32.mrf.mxu2 }
 0x387   : > { %v2103_v54 = vsel %vm7362_vm9, %v6253_v61, %v1856_v10  ;;  %vm7364_vm9 = vmmov %vm7353_vm2 }
 0x388   : > { %v2124_v35 = vsel %vm2111_vm1, %v2103_v54, %v1956_v32  ;;  %v7368_v54 = vld [vmem:[#allocation5_spill] sm:$0xff] }
 0x389   : > { %v2145_v23 = vsel %vm7356_vm0, %v2124_v35, %v2056_v20  ;;  %v2190_v7 = vld [vmem:[#allocation3 + $0x98] sm:$0xff]  ;;  %v2496_v12 = vpop.f32.mrf.mxu0 }
 0x38a   : > { %2165 = vst [vmem:[#allocation3 + $0xa1] sm:$0xff] %v2145_v23  ;;  %2294 = vmatmul.f32.gmra.mxu2 %v2189_v8  ;;  %2398 = vmatmul.f32.gmra.mxu3 %v2189_v8 }
 0x38b   : > { %2528 = vmatmul.f32.gmra.mxu0 %v2189_v8  ;;  %2691 = vmatmul.f32.gmra.mxu1 %v2189_v8  ;;  %v6504_v34 = vpop.f32.mrf.mxu3 }
 0x38d   : > { %v1958_v31 = vpop.permute.xlu1 %1957  ;;  %v2062_v16 = vpop.permute.xlu2 %2061 }
 0x38e   : > { %v1858_v15 = vpop.permute.xlu0 %1857  ;;  %v2262_v58 = vpop.f32.mrf.mxu2 }
 0x38f   : > { %v2104_v14 = vsel %vm7353_vm2, %v6278_v38, %v1858_v15 }
 0x390   : > { %v2125_v61 = vsel %vm2111_vm1, %v2104_v14, %v1958_v31  ;;  %v2355_v31 = vadd.f32 %v6475_v24, %v2256_v49  ;;  %v4279_v49 = vld [vmem:[%s7042_s6 + $0x28] sm:$0xff] }
 0x391   : > { %v2146_v40 = vsel %vm7363_vm3, %v2125_v61, %v2058_v39  ;;  %v2191_v60 = vld [vmem:[#allocation3 + $0xa0] sm:$0xff]  ;;  %vm7365_vm3 = vmmov %vm7356_vm0  ;;  %v2574_v39 = vadd.f32 %v2493_v51, %v2352_v21  ;;  %3289 = vmatpush.msrb.mxu2 %v4279_v49  ;;  %v2361_v21 = vadd.f32 %v6489_v63, %v2262_v58 }
 0x392   : > { %2166 = vst [vmem:[#allocation3 + $0xa9] sm:$0xff] %v2146_v40  ;;  %2297 = vmatmul.f32.gmra.mxu2 %v2190_v7  ;;  %2401 = vmatmul.f32.gmra.mxu3 %v2190_v7 }
 0x393   : > { %2531 = vmatmul.f32.gmra.mxu0 %v2190_v7  ;;  %2694 = vmatmul.f32.gmra.mxu1 %v2190_v7  ;;  %v2575_v7 = vadd.f32 %v2496_v12, %v2355_v31 }
 0x395   : > { %v1960_v37 = vpop.permute.xlu1 %1959 }
 0x396   : > { %v1860_v3 = vpop.permute.xlu0 %1859  ;;  %v2064_v42 = vpop.permute.xlu2 %2063 }
 0x397   : > { %v2105_v22 = vsel %vm7364_vm9, %v6298_v9, %v1860_v3  ;;  %vm7366_vm9 = vmmov %vm7353_vm2 }
 0x398   : > { %v2126_v38 = vsel %vm2111_vm1, %v2105_v22, %v1960_v37 }
 0x399   : > { %v2147_v17 = vsel %vm7356_vm0, %v2126_v38, %v2060_v30  ;;  %v2192_v41 = vld [vmem:[#allocation3 + $0xa8] sm:$0xff] }
 0x39a   : > { %2167 = vst [vmem:[#allocation3 + $0xb1] sm:$0xff] %v2147_v17  ;;  %2300 = vmatmul.f32.gmra.mxu2 %v2191_v60  ;;  %2404 = vmatmul.f32.gmra.mxu3 %v2191_v60 }
 0x39b   : > { %2534 = vmatmul.f32.gmra.mxu0 %v2191_v60  ;;  %2697 = vmatmul.f32.gmra.mxu1 %v2191_v60 }
 0x39d   : > { %v1962_v25 = vpop.permute.xlu1 %1961 }
 0x39e   : > { %v1862_v48 = vpop.permute.xlu0 %1861  ;;  %v2066_v0 = vpop.permute.xlu2 %2065 }
 0x39f   : > { %v2106_v62 = vsel %vm7353_vm2, %v6321_v11, %v1862_v48 }
 0x3a0   : > { %v2127_v9 = vsel %vm2111_vm1, %v2106_v62, %v1962_v25 }
 0x3a1   : > { %v2148_v18 = vsel %vm7365_vm3, %v2127_v9, %v2062_v16  ;;  %v2193_v29 = vld [vmem:[#allocation3 + $0xb0] sm:$0xff]  ;;  %vm7367_vm3 = vmmov %vm7356_vm0  ;;  %v3181_v9 = vld [vmem:[%s7042_s6 + $0x8] sm:$0xff] }
 0x3a2   : > { %2168 = vst [vmem:[#allocation3 + $0xb9] sm:$0xff] %v2148_v18  ;;  %2303 = vmatmul.f32.gmra.mxu2 %v2192_v41  ;;  %2407 = vmatmul.f32.gmra.mxu3 %v2192_v41  ;;  %v2358_v18 = vadd.f32 %v6481_v13, %v2259_v43  ;;  %v7373_v43 = vld [vmem:[#allocation34_spill] sm:$0xff] }
 0x3a3   : > { %2537 = vmatmul.f32.gmra.mxu0 %v2192_v41  ;;  %2700 = vmatmul.f32.gmra.mxu1 %v2192_v41 }
 0x3a4   : > { %3396 = vmatpush.msrb.mxu3 %v3181_v9 }
 0x3a5   : > { %v1964_v53 = vpop.permute.xlu1 %1963 }
 0x3a6   : > { %v1864_v36 = vpop.permute.xlu0 %1863  ;;  %v2068_v10 = vpop.permute.xlu2 %2067 }
 0x3a7   : > { %v2107_v11 = vsel %vm7366_vm9, %v6341_v28, %v1864_v36  ;;  %vm7369_vm9 = vmmov %vm7353_vm2  ;;  %v7371_v36 = vld [vmem:[#allocation21_spill] sm:$0xff] }
 0x3a8   : > { %v2128_v27 = vsel %vm2111_vm1, %v2107_v11, %v1964_v53 }
 0x3a9   : > { %v2149_v33 = vsel %vm7356_vm0, %v2128_v27, %v2064_v42  ;;  %v2194_v4 = vld [vmem:[#allocation3 + $0xb8] sm:$0xff] }
 0x3aa   : > { %2169 = vst [vmem:[#allocation3 + $0xc1] sm:$0xff] %v2149_v33  ;;  %2306 = vmatmul.f32.gmra.mxu2 %v2193_v29  ;;  %2410 = vmatmul.f32.gmra.mxu3 %v2193_v29 }
 0x3ab   : > { %2540 = vmatmul.f32.gmra.mxu0 %v2193_v29  ;;  %2703 = vmatmul.f32.gmra.mxu1 %v2193_v29 }
 0x3ae   : > { %v1966_v20 = vpop.permute.xlu1 %1965  ;;  %v2070_v17 = vpop.permute.xlu2 %2069 }
 0x3af   : > { %v1866_v1 = vpop.permute.xlu0 %1865 }
 0x3b0   : > { %v2108_v28 = vsel %vm7353_vm2, %v6365_v26, %v1866_v1  ;;  %v6507_v26 = vperm.slane %v7368_v54, 0 }
 0x3b1   : > { %v2129_v19 = vsel %vm2111_vm1, %v2108_v28, %v1966_v20  ;;  %v2195_v14 = vld [vmem:[#allocation3 + $0xc0] sm:$0xff] }
 0x3b2   : > { %v2150_v52 = vsel %vm7367_vm3, %v2129_v19, %v2066_v0  ;;  %2309 = vmatmul.f32.gmra.mxu2 %v2194_v4  ;;  %2413 = vmatmul.f32.gmra.mxu3 %v2194_v4  ;;  %vm7370_vm3 = vmmov %vm7356_vm0 }
 0x3b3   : > { %2170 = vst [vmem:[#allocation3 + $0xc9] sm:$0xff] %v2150_v52  ;;  %2543 = vmatmul.f32.gmra.mxu0 %v2194_v4  ;;  %2706 = vmatmul.f32.gmra.mxu1 %v2194_v4 }
 0x3b6   : > { %v1968_v32 = vpop.permute.xlu1 %1967 }
 0x3b7   : > { %v1868_v44 = vpop.permute.xlu0 %1867 }
 0x3b8   : > { %v2499_v35 = vpop.f32.mrf.mxu0  ;;  %v2662_v23 = vpop.f32.mrf.mxu1  ;;  %v2109_v8 = vsel %vm7369_vm9, %v6384_v5, %v1868_v44  ;;  %vm7374_vm9 = vnez %v7373_v43 }
 0x3b9   : > { %v2743_v15 = vadd.f32 %v2662_v23, %v2574_v39  ;;  %v2130_v30 = vsel %vm2111_vm1, %v2109_v8, %v1968_v32  ;;  %v2576_v53 = vadd.f32 %v2499_v35, %v2358_v18  ;;  %v7376_v35 = vld [vmem:[#allocation22_spill] sm:$0xff] }
 0x3ba   : > { %v2151_v61 = vsel %vm7356_vm0, %v2130_v30, %v2068_v10  ;;  %2312 = vmatmul.f32.gmra.mxu2 %v2195_v14  ;;  %2416 = vmatmul.f32.gmra.mxu3 %v2195_v14  ;;  %v2196_v48 = vld [vmem:[#allocation3 + $0xc8] sm:$0xff]  ;;  %vm7375_vm0 = vcmask 1046528  }
 0x3bb   : > { %v2773_v40 = vadd.f32 %v6507_v26, %v2743_v15  ;;  %2171 = vst [vmem:[#allocation3 + $0xd1] sm:$0xff] %v2151_v61  ;;  %2546 = vmatmul.f32.gmra.mxu0 %v2195_v14  ;;  %2709 = vmatmul.f32.gmra.mxu1 %v2195_v14 }
 0x3bd   : > { %v6515_v6 = vpop.f32.mrf.mxu2  ;;  %v6517_v37 = vpop.f32.mrf.mxu3  ;;  %v2800_v24 = vmul.f32 0.1, %v2773_v40 }
 0x3be   : > { %v1970_v5 = vpop.permute.xlu1 %1969  ;;  %v2364_v14 = vadd.f32 %v6497_v50, %v6515_v6 }
 0x3bf   : > { %v1870_v3 = vpop.permute.xlu0 %1869 }
 0x3c0   : > { %v2502_v22 = vpop.f32.mrf.mxu0  ;;  %v2665_v38 = vpop.f32.mrf.mxu1  ;;  %v2110_v16 = vsel %vm7353_vm2, %v6403_v59, %v1870_v3  ;;  %v2827_v59 = vmax.f32 %v2773_v40, %v2800_v24  ;;  %vm7377_vm2 = vnez %v7376_v35  ;;  %v2216_v24 = vld [vmem:[#allocation3 + $0xe0] sm:$0xff] }
 0x3c1   : > { %v2744_v60 = vadd.f32 %v2665_v38, %v2575_v7  ;;  %v2131_v25 = vsel %vm2111_vm1, %v2110_v16, %v1970_v5  ;;  %vm7372_vm1 = vnez %v7371_v36  ;;  %v2577_v32 = vadd.f32 %v2502_v22, %v2361_v21  ;;  %v7379_v38 = vld [vmem:[#allocation35_spill] sm:$0xff] }
 0x3c2   : > { %v2152_v62 = vsel %vm7370_vm3, %v2131_v25, %v2070_v17  ;;  %2315 = vmatmul.f32.gmra.mxu2 %v2196_v48  ;;  %2419 = vmatmul.f32.gmra.mxu3 %v2196_v48  ;;  %v6533_v11 = vsel %vm7372_vm1, %v2827_v59, 0.0  ;;  %v2197_v12 = vld [vmem:[#allocation3 + $0xd0] sm:$0xff]  ;;  %vm7378_vm3 = vmmov %vm7375_vm0  ;;  %vm7380_vm1 = vnez %v7379_v38  ;;  %v2217_v59 = vld [vmem:[#allocation3 + $0xe8] sm:$0xff] }
 0x3c3   : > { %v2774_v41 = vadd.f32 %v6507_v26, %v2744_v60  ;;  %2172 = vst [vmem:[#allocation3 + $0xd9] sm:$0x1f] %v2152_v62  ;;  %2549 = vmatmul.f32.gmra.mxu0 %v2196_v48  ;;  %2712 = vmatmul.f32.gmra.mxu1 %v2196_v48  ;;  %v2962_v1 = vrot.slane %v6533_v11, 1 }
 0x3c5   : > { %v2801_v42 = vmul.f32 0.1, %v2774_v41  ;;  %v2268_v51 = vpop.f32.mrf.mxu2  ;;  %v6535_v33 = vpop.f32.mrf.mxu3 }
 0x3c6   : > { %v2367_v48 = vadd.f32 %v6504_v34, %v2268_v51 }
 0x3c7   : > { %v2828_v27 = vmax.f32 %v2774_v41, %v2801_v42 }
 0x3c8   : > { %v2505_v29 = vpop.f32.mrf.mxu0  ;;  %v2668_v13 = vpop.f32.mrf.mxu1 }
 0x3c9   : > { %v6539_v0 = vsel %vm7374_vm9, %v2828_v27, 0.0  ;;  %v2745_v20 = vadd.f32 %v2668_v13, %v2576_v53  ;;  %v2578_v7 = vadd.f32 %v2505_v29, %v2364_v14  ;;  %vm7381_vm9 = vmmov %vm7375_vm0  ;;  %v7382_v53 = vld [vmem:[#allocation23_spill] sm:$0xff] }
 0x3ca   : > { %2318 = vmatmul.f32.gmra.mxu2 %v2197_v12  ;;  %2422 = vmatmul.f32.gmra.mxu3 %v2197_v12  ;;  %v2963_v28 = vrot.slane %v6539_v0, 1  ;;  %v2198_v8 = vld [vmem:[#allocation3 + $0xd8] sm:$0xff] }
 0x3cb   : > { %v2775_v19 = vadd.f32 %v6507_v26, %v2745_v20  ;;  %2552 = vmatmul.f32.gmra.mxu0 %v2197_v12  ;;  %2715 = vmatmul.f32.gmra.mxu1 %v2197_v12 }
 0x3cc   : > { %v2964_v4 = vsel %vm7375_vm0, %v2962_v1, %v2963_v28  ;;  %vm7383_vm0 = vnez %v7382_v53 }
 0x3cd   : > { %v2802_v52 = vmul.f32 0.1, %v2775_v19  ;;  %3015 = vrot.lane.b32.xlu0 %v2964_v4, %s4536_s21  ;;  %v2271_v39 = vpop.f32.mrf.mxu2  ;;  %v6551_v63 = vpop.f32.mrf.mxu3  ;;  %v2456_v4 = vld [vmem:[#allocation3 + $0xf0] sm:$0xff] }
 0x3ce   : > { %v2370_v51 = vadd.f32 %v6517_v37, %v2271_v39 }
 0x3cf   : > { %v2829_v10 = vmax.f32 %v2775_v19, %v2802_v52  ;;  %v7385_v52 = vld [vmem:[#allocation36_spill] sm:$0xff] }
 0x3d0   : > { %v2508_v54 = vpop.f32.mrf.mxu0  ;;  %v2671_v44 = vpop.f32.mrf.mxu1 }
 0x3d1   : > { %v6549_v23 = vsel %vm7377_vm2, %v2829_v10, 0.0  ;;  %v2746_v58 = vadd.f32 %v2671_v44, %v2577_v32  ;;  %v2579_v9 = vadd.f32 %v2508_v54, %v2367_v48  ;;  %vm7384_vm2 = vmmov %vm7378_vm3 }
 0x3d2   : > { %2321 = vmatmul.f32.gmra.mxu2 %v2198_v8  ;;  %2425 = vmatmul.f32.gmra.mxu3 %v2198_v8  ;;  %v2965_v31 = vrot.slane %v6549_v23, 1 }
 0x3d3   : > { %v2776_v15 = vadd.f32 %v6507_v26, %v2746_v58  ;;  %2555 = vmatmul.f32.gmra.mxu0 %v2198_v8  ;;  %2718 = vmatmul.f32.gmra.mxu1 %v2198_v8 }
 0x3d4   : > { %v2966_v30 = vsel %vm7378_vm3, %v2963_v28, %v2965_v31  ;;  %vm7386_vm3 = vnez %v7385_v52 }
 0x3d5   : > { %v2803_v61 = vmul.f32 0.1, %v2776_v15  ;;  %3017 = vrot.lane.b32.xlu1 %v2966_v30, %s4536_s21  ;;  %v2274_v40 = vpop.f32.mrf.mxu2  ;;  %v6564_v25 = vpop.f32.mrf.mxu3 }
 0x3d6   : > { %v2373_v44 = vadd.f32 %v6535_v33, %v2274_v40 }
 0x3d7   : > { %v2830_v5 = vmax.f32 %v2776_v15, %v2803_v61  ;;  %v2457_v61 = vld [vmem:[#allocation3 + $0xf8] sm:$0xff] }
 0x3d8   : > { %v2511_v3 = vpop.f32.mrf.mxu0  ;;  %v2674_v22 = vpop.f32.mrf.mxu1 }
 0x3d9   : > { %v6561_v16 = vsel %vm7380_vm1, %v2830_v5, 0.0  ;;  %v2747_v17 = vadd.f32 %v2674_v22, %v2578_v7  ;;  %v2580_v1 = vadd.f32 %v2511_v3, %v2370_v51  ;;  %vm7387_vm1 = vmmov %vm7384_vm2  ;;  %v7388_v7 = vld [vmem:[#allocation24_spill] sm:$0xff] }
 0x3da   : > { %v2967_v60 = vrot.slane %v6561_v16, 1  ;;  %2324 = vmatmul.f32.gmra.mxu2 %v2216_v24 }
 0x3db   : > { %v2777_v50 = vadd.f32 %v6507_v26, %v2747_v17  ;;  %2558 = vmatmul.f32.gmra.mxu0 %v2216_v24  ;;  %2721 = vmatmul.f32.gmra.mxu1 %v2216_v24 }
 0x3dc   : > { %v2968_v6 = vsel %vm7381_vm9, %v2965_v31, %v2967_v60  ;;  %vm7389_vm9 = vnez %v7388_v7 }
 0x3dd   : > { %v2804_v62 = vmul.f32 0.1, %v2777_v50  ;;  %3019 = vrot.lane.b32.xlu2 %v2968_v6, %s4536_s21  ;;  %v2277_v49 = vpop.f32.mrf.mxu2  ;;  %v6578_v43 = vpop.f32.mrf.mxu3 }
 0x3de   : > { %v2376_v40 = vadd.f32 %v6551_v63, %v2277_v49  ;;  %v4278_v63 = vld [vmem:[%s7042_s6 + $0x20] sm:$0xff] }
 0x3df   : > { %v2831_v18 = vmax.f32 %v2777_v50, %v2804_v62  ;;  %v2625_v62 = vld [vmem:[#allocation3 + $0x100] sm:$0xff]  ;;  %3290 = vmatpush.msrb.mxu2 %v4278_v63 }
 0x3e0   : > { %v2514_v41 = vpop.f32.mrf.mxu0  ;;  %v2677_v42 = vpop.f32.mrf.mxu1  ;;  %v3180_v49 = vld [vmem:[%s7042_s6] sm:$0xff] }
 0x3e1   : > { %v6572_v36 = vsel %vm7383_vm0, %v2831_v18, 0.0  ;;  %v2748_v27 = vadd.f32 %v2677_v42, %v2579_v9  ;;  %v2581_v8 = vadd.f32 %v2514_v41, %v2373_v44  ;;  %vm7390_vm0 = vmmov %vm7387_vm1  ;;  %v7391_v18 = vld [vmem:[#allocation37_spill] sm:$0xff]  ;;  %3397 = vmatpush.msrb.mxu3 %v3180_v49 }
 0x3e2   : > { %v2969_v29 = vrot.slane %v6572_v36, 1  ;;  %2327 = vmatmul.f32.gmra.mxu2 %v2217_v59 }
 0x3e3   : > { %v2778_v13 = vadd.f32 %v6507_v26, %v2748_v27  ;;  %2561 = vmatmul.f32.gmra.mxu0 %v2217_v59  ;;  %2724 = vmatmul.f32.gmra.mxu1 %v2217_v59 }
 0x3e4   : > { %v2970_v34 = vsel %vm7384_vm2, %v2967_v60, %v2969_v29  ;;  %vm7392_vm2 = vnez %v7391_v18 }
 0x3e5   : > { %v2805_v20 = vmul.f32 0.1, %v2778_v13  ;;  %3021 = vrot.lane.b32.xlu0 %v2970_v34, %s4536_s21  ;;  %v2280_v12 = vpop.f32.mrf.mxu2  ;;  %v2384_v31 = vpop.f32.mrf.mxu3 }
 0x3e7   : > { %v2832_v28 = vmax.f32 %v2778_v13, %v2805_v20 }
 0x3e8   : > { %v2517_v21 = vpop.f32.mrf.mxu0  ;;  %v2680_v19 = vpop.f32.mrf.mxu1 }
 0x3e9   : > { %v6583_v32 = vsel %vm7386_vm3, %v2832_v28, 0.0  ;;  %v2749_v10 = vadd.f32 %v2680_v19, %v2580_v1  ;;  %v2582_v60 = vadd.f32 %v2517_v21, %v2376_v40  ;;  %vm7393_vm3 = vmmov %vm7390_vm0  ;;  %v2626_v21 = vld [vmem:[#allocation3 + $0x108] sm:$0xff] }
 0x3ea   : > { %v2971_v54 = vrot.slane %v6583_v32, 1  ;;  %v7394_v19 = vld [vmem:[#allocation25_spill] sm:$0xff] }
 0x3eb   : > { %v2779_v37 = vadd.f32 %v6507_v26, %v2749_v10  ;;  %2564 = vmatmul.f32.gmra.mxu0 %v2456_v4  ;;  %2727 = vmatmul.f32.gmra.mxu1 %v2456_v4 }
 0x3ec   : > { %v2972_v39 = vsel %vm7387_vm1, %v2969_v29, %v2971_v54  ;;  %v2379_v29 = vadd.f32 %v6564_v25, %v2280_v12  ;;  %vm7395_vm1 = vnez %v7394_v19 }
 0x3ed   : > { %v2806_v35 = vmul.f32 0.1, %v2779_v37  ;;  %3023 = vrot.lane.b32.xlu1 %v2972_v39, %s4536_s21  ;;  %v2283_v58 = vpop.f32.mrf.mxu2  ;;  %v2387_v9 = vpop.f32.mrf.mxu3 }
 0x3ee   : > { %v2382_v12 = vadd.f32 %v6578_v43, %v2283_v58 }
 0x3ef   : > { %v2833_v15 = vmax.f32 %v2779_v37, %v2806_v35 }
 0x3f0   : > { %v2520_v30 = vpop.f32.mrf.mxu0  ;;  %v2683_v14 = vpop.f32.mrf.mxu1 }
 0x3f1   : > { %v6592_v5 = vsel %vm7389_vm9, %v2833_v15, 0.0  ;;  %v2750_v24 = vadd.f32 %v2683_v14, %v2581_v8  ;;  %v2583_v51 = vadd.f32 %v2520_v30, %v2379_v29  ;;  %vm7396_vm9 = vmmov %vm7390_vm0  ;;  %v7397_v14 = vld [vmem:[#allocation38_spill] sm:$0xff] }
 0x3f2   : > { %v2973_v3 = vrot.slane %v6592_v5, 1 }
 0x3f3   : > { %v2780_v22 = vadd.f32 %v6507_v26, %v2750_v24  ;;  %2567 = vmatmul.f32.gmra.mxu0 %v2457_v61  ;;  %2730 = vmatmul.f32.gmra.mxu1 %v2457_v61 }
 0x3f4   : > { %v2974_v33 = vsel %vm7390_vm0, %v2971_v54, %v2973_v3  ;;  %vm7398_vm0 = vnez %v7397_v14 }
 0x3f5   : > { %v2807_v38 = vmul.f32 0.1, %v2780_v22  ;;  %3025 = vrot.lane.b32.xlu2 %v2974_v33, %s4536_s21  ;;  %v2286_v17 = vpop.f32.mrf.mxu2  ;;  %v2390_v54 = vpop.f32.mrf.mxu3 }
 0x3f6   : > { %v2385_v43 = vadd.f32 %v2384_v31, %v2286_v17 }
 0x3f7   : > { %v2834_v50 = vmax.f32 %v2780_v22, %v2807_v38 }
 0x3f8   : > { %v2523_v6 = vpop.f32.mrf.mxu0  ;;  %v2686_v48 = vpop.f32.mrf.mxu1 }
 0x3f9   : > { %v6601_v59 = vsel %vm7392_vm2, %v2834_v50, 0.0  ;;  %v2751_v41 = vadd.f32 %v2686_v48, %v2582_v60  ;;  %v2584_v35 = vadd.f32 %v2523_v6, %v2382_v12  ;;  %vm7399_vm2 = vmmov %vm7393_vm3  ;;  %v2199_v48 = vld [vmem:[#allocation3 + $0xe0] sm:$0x3] }
 0x3fa   : > { %v2975_v42 = vrot.slane %v6601_v59, 1  ;;  %2428 = vmatmul.f32.gmra.mxu3 %v2199_v48  ;;  %v7411_v48 = vld [vmem:[#allocation40_spill] sm:$0xff] }
 0x3fb   : > { %v2781_v53 = vadd.f32 %v6507_v26, %v2751_v41  ;;  %2733 = vmatmul.f32.gmra.mxu1 %v2625_v62  ;;  %v7400_v62 = vld [vmem:[#allocation26_spill] sm:$0xff] }
 0x3fc   : > { %v2976_v27 = vsel %vm7393_vm3, %v2973_v3, %v2975_v42  ;;  %vm7401_vm3 = vnez %v7400_v62 }
 0x3fd   : > { %v2808_v13 = vmul.f32 0.1, %v2781_v53  ;;  %3027 = vrot.lane.b32.xlu0 %v2976_v27, %s4536_s21  ;;  %v2289_v34 = vpop.f32.mrf.mxu2  ;;  %v2393_v58 = vpop.f32.mrf.mxu3 }
 0x3fe   : > { %v2388_v63 = vadd.f32 %v2387_v9, %v2289_v34 }
 0x3ff   : > { %v2835_v20 = vmax.f32 %v2781_v53, %v2808_v13 }
 0x400   : > { %v2526_v1 = vpop.f32.mrf.mxu0  ;;  %v2689_v28 = vpop.f32.mrf.mxu1 }
 0x401   : > { %v6616_v4 = vsel %vm7395_vm1, %v2835_v20, 0.0  ;;  %v2752_v52 = vadd.f32 %v2689_v28, %v2583_v51  ;;  %v2585_v38 = vadd.f32 %v2526_v1, %v2385_v43  ;;  %vm7402_vm1 = vmmov %vm7399_vm2  ;;  %v3152_v1 = vld [vmem:[#allocation4] sm:$0xff] }
 0x402   : > { %v2977_v10 = vrot.slane %v6616_v4, 1  ;;  %v7403_v28 = vld [vmem:[#allocation39_spill] sm:$0xff] }
 0x403   : > { %v2782_v37 = vadd.f32 %v6507_v26, %v2752_v52  ;;  %2736 = vmatmul.f32.gmra.mxu1 %v2626_v21 }
 0x404   : > { %v2978_v25 = vsel %vm7396_vm9, %v2975_v42, %v2977_v10  ;;  %vm7404_vm9 = vnez %v7403_v28 }
 0x405   : > { %v2809_v39 = vmul.f32 0.1, %v2782_v37  ;;  %3029 = vrot.lane.b32.xlu1 %v2978_v25, %s4536_s21  ;;  %v2292_v44 = vpop.f32.mrf.mxu2  ;;  %v2396_v27 = vpop.f32.mrf.mxu3 }
 0x407   : > { %v2836_v8 = vmax.f32 %v2782_v37, %v2809_v39 }
 0x408   : > { %v2529_v15 = vpop.f32.mrf.mxu0  ;;  %v2692_v30 = vpop.f32.mrf.mxu1 }
 0x409   : > { %v6625_v61 = vsel %vm7398_vm0, %v2836_v8, 0.0  ;;  %v2753_v7 = vadd.f32 %v2692_v30, %v2584_v35  ;;  %v2586_v29 = vadd.f32 %v2529_v15, %v2388_v63  ;;  %vm7405_vm0 = vcmask 261120   ;;  %v2218_v15 = vld [vmem:[#allocation3 + $0xf0] sm:$0x3]  ;;  %v3153_v30 = vld [vmem:[#allocation4 + $0x8] sm:$0xff] }
 0x40a   : > { %v2979_v24 = vrot.slane %v6625_v61, 1  ;;  %4310 = vmatmul.msk.f32.vlgmr.msrb.gmra.mxu3 %vm7405_vm0, %v3152_v1  ;;  %2330 = vmatmul.f32.gmra.mxu2 %v2218_v15  ;;  %v7413_v1 = vld [vmem:[#allocation28_spill] sm:$0xff] }
 0x40b   : > { %v2783_v3 = vadd.f32 %v6507_v26, %v2753_v7  ;;  %v7407_v7 = vld [vmem:[#allocation27_spill] sm:$0xff] }
 0x40c   : > { %v2980_v22 = vsel %vm7399_vm2, %v2977_v10, %v2979_v24  ;;  %vm7406_vm2 = vmmov %vm7402_vm1  ;;  %v2391_v10 = vadd.f32 %v2390_v54, %v2292_v44 }
 0x40d   : > { %v2810_v33 = vmul.f32 0.1, %v2783_v3  ;;  %3031 = vrot.lane.b32.xlu2 %v2980_v22, %s4536_s21  ;;  %v2295_v40 = vpop.f32.mrf.mxu2  ;;  %v2399_v14 = vpop.f32.mrf.mxu3 }
 0x40e   : > { %v2394_v43 = vadd.f32 %v2393_v58, %v2295_v40 }
 0x40f   : > { %v2837_v60 = vmax.f32 %v2783_v3, %v2810_v33 }
 0x410   : > { %v2532_v50 = vpop.f32.mrf.mxu0  ;;  %v2695_v6 = vpop.f32.mrf.mxu1 }
 0x411   : > { %v6633_v18 = vsel %vm7401_vm3, %v2837_v60, 0.0  ;;  %v2754_v41 = vadd.f32 %v2695_v6, %v2585_v38  ;;  %v2587_v25 = vadd.f32 %v2532_v50, %v2391_v10  ;;  %vm7408_vm3 = vnez %v7407_v7 }
 0x412   : > { %v2981_v42 = vrot.slane %v6633_v18, 1 }
 0x413   : > { %v2784_v31 = vadd.f32 %v6507_v26, %v2754_v41 }
 0x414   : > { %v2982_v17 = vsel %vm7402_vm1, %v2979_v24, %v2981_v42  ;;  %vm7409_vm1 = vmmov %vm7405_vm0  ;;  %vm7412_vm0 = vnez %v7411_v48 }
 0x415   : > { %v2811_v49 = vmul.f32 0.1, %v2784_v31  ;;  %3033 = vrot.lane.b32.xlu0 %v2982_v17, %s4536_s21  ;;  %v2298_v53 = vpop.f32.mrf.mxu2  ;;  %4311 = vmatmul.msk.f32.gmra.mxu3 %vm7409_vm1, %v3153_v30  ;;  %v2402_v17 = vpop.f32.mrf.mxu3  ;;  %vm7415_vm1 = vmmov %vm7406_vm2 }
 0x416   : > { %v2397_v40 = vadd.f32 %v2396_v27, %v2298_v53 }
 0x417   : > { %v2838_v13 = vmax.f32 %v2784_v31, %v2811_v49 }
 0x418   : > { %v2535_v51 = vpop.f32.mrf.mxu0  ;;  %v2698_v20 = vpop.f32.mrf.mxu1 }
 0x419   : > { %v6641_v21 = vsel %vm7404_vm9, %v2838_v13, 0.0  ;;  %v2755_v19 = vadd.f32 %v2698_v20, %v2586_v29  ;;  %vm7410_vm9 = vmmov %vm7406_vm2  ;;  %v2588_v38 = vadd.f32 %v2535_v51, %v2394_v43 }
 0x41a   : > { %v2983_v52 = vrot.slane %v6641_v21, 1 }
 0x41b   : > { %v2785_v9 = vadd.f32 %v6507_v26, %v2755_v19 }
 0x41c   : > { %v2984_v34 = vsel %vm7406_vm2, %v2981_v42, %v2983_v52 }
 0x41d   : > { %v2812_v37 = vmul.f32 0.1, %v2785_v9  ;;  %3035 = vrot.lane.b32.xlu1 %v2984_v34, %s4536_s21  ;;  %v2301_v39 = vpop.f32.mrf.mxu2  ;;  %v2405_v27 = vpop.f32.mrf.mxu3 }
 0x41e   : > { %v2400_v53 = vadd.f32 %v2399_v14, %v2301_v39 }
 0x41f   : > { %v2839_v12 = vmax.f32 %v2785_v9, %v2812_v37 }
 0x420   : > { %v2538_v35 = vpop.f32.mrf.mxu0  ;;  %v2701_v8 = vpop.f32.mrf.mxu1 }
 0x421   : > { %v6650_v24 = vsel %vm7408_vm3, %v2839_v12, 0.0  ;;  %v2756_v3 = vadd.f32 %v2701_v8, %v2587_v25  ;;  %v2589_v29 = vadd.f32 %v2538_v35, %v2397_v40  ;;  %vm7414_vm3 = vnez %v7413_v1 }
 0x422   : > { %v2985_v54 = vrot.slane %v6650_v24, 1 }
 0x423   : > { %v2786_v44 = vadd.f32 %v6507_v26, %v2756_v3 }
 0x424   : > { %v2986_v22 = vsel %vm7410_vm9, %v2983_v52, %v2985_v54  ;;  %vm7092_vm9 = vcmask 130048  }
 0x425   : > { %v2813_v33 = vmul.f32 0.1, %v2786_v44  ;;  %3037 = vrot.lane.b32.xlu2 %v2986_v22, %s4536_s21  ;;  %v2304_v31 = vpop.f32.mrf.mxu2 }
 0x426   : > { %v2403_v22 = vadd.f32 %v2402_v17, %v2304_v31 }
 0x427   : > { %v2840_v60 = vmax.f32 %v2786_v44, %v2813_v33  ;;  %v2408_v33 = vpop.f32.mrf.mxu3 }
 0x428   : > { %v2541_v50 = vpop.f32.mrf.mxu0  ;;  %v2704_v6 = vpop.f32.mrf.mxu1 }
 0x429   : > { %v6659_v62 = vsel %vm7412_vm0, %v2840_v60, 0.0  ;;  %v2757_v41 = vadd.f32 %v2704_v6, %v2588_v38  ;;  %v2590_v25 = vadd.f32 %v2541_v50, %v2400_v53  ;;  %vm7417_vm0 = vcmask 261120  }
 0x42a   : > { %v2987_v42 = vrot.slane %v6659_v62, 1 }
 0x42b   : > { %v2787_v63 = vadd.f32 %v6507_v26, %v2757_v41 }
 0x42c   : > { %v2988_v58 = vsel %vm7406_vm2, %v2985_v54, %v2987_v42  ;;  %vm7418_vm2 = vmmov %vm7415_vm1 }
 0x42d   : > { %v2814_v49 = vmul.f32 0.1, %v2787_v63  ;;  %3039 = vrot.lane.b32.xlu0 %v2988_v58, %s4536_s21  ;;  %v2307_v34 = vpop.f32.mrf.mxu2 }
 0x42f   : > { %v2841_v13 = vmax.f32 %v2787_v63, %v2814_v49  ;;  %v2406_v49 = vadd.f32 %v2405_v27, %v2307_v34 }
 0x430   : > { %v2544_v51 = vpop.f32.mrf.mxu0  ;;  %v2707_v20 = vpop.f32.mrf.mxu1 }
 0x431   : > { %v6667_v28 = vsel %vm7414_vm3, %v2841_v13, 0.0  ;;  %v2758_v19 = vadd.f32 %v2707_v20, %v2589_v29  ;;  %v2591_v38 = vadd.f32 %v2544_v51, %v2403_v22 }
 0x432   : > { %v2989_v52 = vrot.slane %v6667_v28, 1 }
 0x433   : > { %v2788_v9 = vadd.f32 %v6507_v26, %v2758_v19 }
 0x434   : > { %v2990_v10 = vsel %vm7415_vm1, %v2987_v42, %v2989_v52  ;;  %v7419_v42 = vld [vmem:[#allocation29_spill] sm:$0xff]  ;;  %vm7421_vm1 = vmmov %vm7417_vm0 }
 0x435   : > { %v2815_v37 = vmul.f32 0.1, %v2788_v9  ;;  %3041 = vrot.lane.b32.xlu1 %v2990_v10, %s4536_s21  ;;  %vm7420_vm3 = vnez %v7419_v42  ;;  %v7423_v10 = vld [vmem:[#allocation42_spill] sm:$0xff] }
 0x436   : > { %vm7424_vm7 = vnez %v7423_v10 }
 0x437   : > { %v2842_v12 = vmax.f32 %v2788_v9, %v2815_v37  ;;  %v3020_v35 = vpop.permute.xlu2 %3019  ;;  %v2411_v9 = vpop.f32.mrf.mxu3 }
 0x438   : > { %v3099_v8 = vsel %vm7092_vm9, %v6549_v23, %v3020_v35  ;;  %v2547_v15 = vpop.f32.mrf.mxu0  ;;  %v2710_v30 = vpop.f32.mrf.mxu1 }
 0x439   : > { %v6677_v3 = vsel %vm4893_vm8, %v2842_v12, 0.0  ;;  %3126 = vst.msk [vmem:[#allocation4 + $0x20] sm:$0xff] %vm7417_vm0, %v3099_v8  ;;  %v2759_v39 = vadd.f32 %v2710_v30, %v2590_v25  ;;  %v2310_v23 = vpop.f32.mrf.mxu2  ;;  %vm7422_vm0 = vmmov %vm7418_vm2 }
 0x43a   : > { %v2991_v14 = vrot.slane %v6677_v3, 1  ;;  %v2409_v12 = vadd.f32 %v2408_v33, %v2310_v23 }
 0x43b   : > { %v2789_v54 = vadd.f32 %v6507_v26, %v2759_v39 }
 0x43c   : > { %v2992_v44 = vsel %vm7418_vm2, %v2989_v52, %v2991_v14  ;;  %vm7425_vm2 = vmmov %vm7421_vm1 }
 0x43d   : > { %v2816_v43 = vmul.f32 0.1, %v2789_v54  ;;  %3043 = vrot.lane.b32.xlu2 %v2992_v44, %s4536_s21 }
 0x43f   : > { %v2843_v60 = vmax.f32 %v2789_v54, %v2816_v43  ;;  %v3016_v50 = vpop.permute.xlu0 %3015  ;;  %v7427_v54 = vld [vmem:[#allocation30_spill] sm:$0xff]  ;;  %v2414_v33 = vpop.f32.mrf.mxu3 }
 0x440   : > { %v3097_v6 = vsel %vm7092_vm9, %v6533_v11, %v3016_v50  ;;  %v2550_v48 = vpop.f32.mrf.mxu0  ;;  %v2713_v41 = vpop.f32.mrf.mxu1  ;;  %v2592_v11 = vadd.f32 %v2547_v15, %v2406_v49 }
 0x441   : > { %v6688_v63 = vsel %vm7420_vm3, %v2843_v60, 0.0  ;;  %3124 = vst.msk [vmem:[#allocation4 + $0x10] sm:$0xff] %vm7421_vm1, %v3097_v6  ;;  %v2760_v31 = vadd.f32 %v2713_v41, %v2591_v38  ;;  %v2313_v20 = vpop.f32.mrf.mxu2  ;;  %vm7426_vm3 = vmmov %vm7421_vm1  ;;  %v2593_v8 = vadd.f32 %v2550_v48, %v2409_v12 }
 0x442   : > { %v2993_v17 = vrot.slane %v6688_v63, 1  ;;  %v2412_v50 = vadd.f32 %v2411_v9, %v2313_v20 }
 0x443   : > { %v2790_v58 = vadd.f32 %v6507_v26, %v2760_v31 }
 0x444   : > { %v2994_v40 = vsel %vm7422_vm0, %v2991_v14, %v2993_v17 }
 0x445   : > { %v2817_v29 = vmul.f32 0.1, %v2790_v58  ;;  %3045 = vrot.lane.b32.xlu0 %v2994_v40, %s4536_s21 }
 0x447   : > { %v2844_v13 = vmax.f32 %v2790_v58, %v2817_v29  ;;  %v3018_v51 = vpop.permute.xlu1 %3017  ;;  %v3156_v58 = vld [vmem:[#allocation4 + $0x20] sm:$0xff]  ;;  %v2417_v20 = vpop.f32.mrf.mxu3 }
 0x448   : > { %v3098_v1 = vsel %vm7092_vm9, %v6539_v0, %v3018_v51  ;;  %v2716_v19 = vpop.f32.mrf.mxu1  ;;  %v3154_v52 = vld [vmem:[#allocation4 + $0x10] sm:$0xff]  ;;  %v2553_v37 = vpop.f32.mrf.mxu0 }
 0x449   : > { %v6699_v53 = vsel %vm7424_vm7, %v2844_v13, 0.0  ;;  %3125 = vst.msk [vmem:[#allocation4 + $0x18] sm:$0xff] %vm7425_vm2, %v3098_v1  ;;  %v2761_v34 = vadd.f32 %v2716_v19, %v2592_v11  ;;  %4282 = vmatmul.msk.f32.vlgmr.msrb.gmra.mxu2 %vm7426_vm3, %v3154_v52  ;;  %4312 = vmatmul.msk.f32.gmra.mxu3 %vm7421_vm1, %v3154_v52  ;;  %vm7428_vm2 = vnez %v7427_v54  ;;  %vm7429_vm3 = vmmov %vm7421_vm1  ;;  %v2316_v43 = vpop.f32.mrf.mxu2  ;;  %v2594_v48 = vadd.f32 %v2553_v37, %v2412_v50 }
 0x44a   : > { %v2995_v27 = vrot.slane %v6699_v53, 1  ;;  %v2415_v1 = vadd.f32 %v2414_v33, %v2316_v43 }
 0x44b   : > { %v2791_v25 = vadd.f32 %v6507_v26, %v2761_v34 }
 0x44c   : > { %v2996_v0 = vsel %vm7422_vm0, %v2993_v17, %v2995_v27  ;;  %vm7430_vm0 = vmmov %vm7421_vm1 }
 0x44d   : > { %v2818_v35 = vmul.f32 0.1, %v2791_v25  ;;  %3047 = vrot.lane.b32.xlu1 %v2996_v0, %s4536_s21  ;;  %v7438_v0 = vld [vmem:[#allocation31_spill] sm:$0xff] }
 0x44f   : > { %v2845_v15 = vmax.f32 %v2791_v25, %v2818_v35  ;;  %v3026_v30 = vpop.permute.xlu2 %3025 }
 0x450   : > { %v3102_v7 = vsel %vm7092_vm9, %v6583_v32, %v3026_v30  ;;  %v2719_v39 = vpop.f32.mrf.mxu1  ;;  %v3155_v14 = vld [vmem:[#allocation4 + $0x18] sm:$0xff]  ;;  %v2556_v32 = vpop.f32.mrf.mxu0  ;;  %vm7431_vm9 = vcmask 1046528  }
 0x451   : > { %v6712_v44 = vsel %vm7428_vm2, %v2845_v15, 0.0  ;;  %3129 = vst.msk [vmem:[#allocation4 + $0x38] sm:$0xff] %vm7429_vm3, %v3102_v7  ;;  %v2762_v22 = vadd.f32 %v2719_v39, %v2593_v8  ;;  %4283 = vmatmul.msk.f32.gmra.mxu2 %vm7421_vm1, %v3155_v14  ;;  %4313 = vmatmul.msk.f32.gmra.mxu3 %vm7430_vm0, %v3155_v14  ;;  %vm7432_vm2 = vcmask 130048   ;;  %vm7434_vm3 = vmmov %vm7430_vm0  ;;  %v2319_v51 = vpop.f32.mrf.mxu2  ;;  %v2595_v9 = vadd.f32 %v2556_v32, %v2415_v1  ;;  %v2420_v14 = vpop.f32.mrf.mxu3 }
 0x452   : > { %v2997_v23 = vrot.slane %v6712_v44, 1  ;;  %vm7436_vm1 = vmmov %vm7430_vm0 }
 0x453   : > { %v2792_v38 = vadd.f32 %v6507_v26, %v2762_v22 }
 0x454   : > { %v2998_v60 = vsel %vm7431_vm9, %v2995_v27, %v2997_v23  ;;  %vm7435_vm9 = vmmov %vm7430_vm0  ;;  %vm7437_vm0 = vcmask 1046528  }
 0x455   : > { %v2819_v6 = vmul.f32 0.1, %v2792_v38  ;;  %3049 = vrot.lane.b32.xlu2 %v2998_v60, %s4536_s21  ;;  %v7443_v60 = vld [vmem:[#allocation44_spill] sm:$0xff] }
 0x457   : > { %v2846_v41 = vmax.f32 %v2792_v38, %v2819_v6  ;;  %v3022_v42 = vpop.permute.xlu0 %3021 }
 0x458   : > { %v3100_v31 = vsel %vm7432_vm2, %v6561_v16, %v3022_v42  ;;  %v2722_v17 = vpop.f32.mrf.mxu1  ;;  %v2559_v52 = vpop.f32.mrf.mxu0 }
 0x459   : > { %v6725_v49 = vsel %vm4901_vm10, %v2846_v41, 0.0  ;;  %3127 = vst.msk [vmem:[#allocation4 + $0x28] sm:$0xff] %vm7434_vm3, %v3100_v31  ;;  %v2763_v29 = vadd.f32 %v2722_v17, %v2594_v48  ;;  %4284 = vmatmul.msk.f32.gmra.mxu2 %vm7435_vm9, %v3156_v58  ;;  %4314 = vmatmul.msk.f32.gmra.mxu3 %vm7436_vm1, %v3156_v58  ;;  %vm7439_vm3 = vnez %v7438_v0  ;;  %vm7440_vm9 = vmmov %vm7436_vm1  ;;  %v2322_v39 = vpop.f32.mrf.mxu2 }
 0x45a   : > { %v2999_v11 = vrot.slane %v6725_v49, 1 }
 0x45b   : > { %v2793_v13 = vadd.f32 %v6507_v26, %v2763_v29 }
 0x45c   : > { %v3000_v16 = vsel %vm7437_vm0, %v2997_v23, %v2999_v11  ;;  %vm7441_vm0 = vmmov %vm7436_vm1 }
 0x45d   : > { %v2820_v19 = vmul.f32 0.1, %v2793_v13  ;;  %3051 = vrot.lane.b32.xlu0 %v3000_v16, %s4536_s21  ;;  %v7449_v16 = vld [vmem:[#allocation32_spill] sm:$0xff] }
 0x45f   : > { %v2847_v10 = vmax.f32 %v2793_v13, %v2820_v19  ;;  %v3024_v34 = vpop.permute.xlu1 %3023  ;;  %v2423_v19 = vpop.f32.mrf.mxu3 }
 0x460   : > { %v3101_v27 = vsel %vm7432_vm2, %v6572_v36, %v3024_v34  ;;  %v2725_v37 = vpop.f32.mrf.mxu1  ;;  %v3157_v25 = vld [vmem:[#allocation4 + $0x28] sm:$0xff]  ;;  %v2418_v36 = vadd.f32 %v2417_v20, %v2319_v51  ;;  %v2562_v23 = vpop.f32.mrf.mxu0  ;;  %v3159_v51 = vld [vmem:[#allocation4 + $0x38] sm:$0xff] }
 0x461   : > { %v6738_v12 = vsel %vm7439_vm3, %v2847_v10, 0.0  ;;  %3128 = vst.msk [vmem:[#allocation4 + $0x30] sm:$0xff] %vm7440_vm9, %v3101_v27  ;;  %v2764_v35 = vadd.f32 %v2725_v37, %v2595_v9  ;;  %4285 = vmatmul.msk.f32.gmra.mxu2 %vm7436_vm1, %v3157_v25  ;;  %4315 = vmatmul.msk.f32.gmra.mxu3 %vm7441_vm0, %v3157_v25  ;;  %vm7444_vm3 = vnez %v7443_v60  ;;  %vm7446_vm9 = vmmov %vm7441_vm0  ;;  %v2325_v29 = vpop.f32.mrf.mxu2 }
 0x462   : > { %v3001_v8 = vrot.slane %v6738_v12, 1  ;;  %v2596_v54 = vadd.f32 %v2559_v52, %v2418_v36  ;;  %vm7447_vm1 = vmmov %vm7441_vm0  ;;  %v2424_v34 = vadd.f32 %v2423_v19, %v2325_v29  ;;  %v7463_v19 = vld [vmem:[#allocation46_spill] sm:$0xff] }
 0x463   : > { %v2794_v15 = vadd.f32 %v6507_v26, %v2764_v35 }
 0x464   : > { %v3002_v30 = vsel %vm7442_vm4, %v2999_v11, %v3001_v8  ;;  %vm7445_vm4 = vmmov %vm7441_vm0  ;;  %vm7448_vm0 = vcmask 1046528  }
 0x465   : > { %v2821_v7 = vmul.f32 0.1, %v2794_v15  ;;  %3053 = vrot.lane.b32.xlu1 %v3002_v30, %s4536_s21 }
 0x467   : > { %v2848_v22 = vmax.f32 %v2794_v15, %v2821_v7  ;;  %v3032_v43 = vpop.permute.xlu2 %3031 }
 0x468   : > { %v3105_v33 = vsel %vm7432_vm2, %v6616_v4, %v3032_v43  ;;  %v2728_v38 = vpop.f32.mrf.mxu1  ;;  %v3158_v32 = vld [vmem:[#allocation4 + $0x30] sm:$0xff]  ;;  %v2421_v4 = vadd.f32 %v2420_v14, %v2322_v39  ;;  %v2565_v52 = vpop.f32.mrf.mxu0 }
 0x469   : > { %v6751_v50 = vsel %vm7444_vm3, %v2848_v22, 0.0  ;;  %3132 = vst.msk [vmem:[#allocation4 + $0x50] sm:$0xff] %vm7445_vm4, %v3105_v33  ;;  %v2765_v6 = vadd.f32 %v2728_v38, %v2596_v54  ;;  %4286 = vmatmul.msk.f32.gmra.mxu2 %vm7446_vm9, %v3158_v32  ;;  %4316 = vmatmul.msk.f32.gmra.mxu3 %vm7447_vm1, %v3158_v32  ;;  %vm7450_vm3 = vnez %v7449_v16  ;;  %vm7451_vm4 = vmmov %vm7447_vm1  ;;  %v2598_v37 = vadd.f32 %v2565_v52, %v2424_v34  ;;  %v2328_v39 = vpop.f32.mrf.mxu2  ;;  %v2426_v22 = vpop.f32.mrf.mxu3 }
 0x46a   : > { %v3003_v48 = vrot.slane %v6751_v50, 1  ;;  %v2597_v17 = vadd.f32 %v2562_v23, %v2421_v4  ;;  %vm7452_vm9 = vmmov %vm7447_vm1  ;;  %v2427_v23 = vadd.f32 %v2426_v22, %v2328_v39  ;;  %v4537_v16 = vmov 0.0  }
 0x46b   : > { %v2795_v41 = vadd.f32 %v6507_v26, %v2765_v6 }
 0x46c   : > { %v3004_v42 = vsel %vm7448_vm0, %v3001_v8, %v3003_v48 }
 0x46d   : > { %v2822_v31 = vmul.f32 0.1, %v2795_v41  ;;  %3055 = vrot.lane.b32.xlu2 %v3004_v42, %s4536_s21  ;;  %v7459_v42 = vld [vmem:[#allocation33_spill] sm:$0xff] }
 0x46f   : > { %v2849_v58 = vmax.f32 %v2795_v41, %v2822_v31  ;;  %v3028_v40 = vpop.permute.xlu0 %3027 }
 0x470   : > { %v3103_v11 = vsel %vm7432_vm2, %v6592_v5, %v3028_v40  ;;  %v2731_v13 = vpop.f32.mrf.mxu1 }
 0x471   : > { %v6764_v20 = vsel %vm7450_vm3, %v2849_v58, 0.0  ;;  %3130 = vst.msk [vmem:[#allocation4 + $0x40] sm:$0xff] %vm7451_vm4, %v3103_v11  ;;  %v2766_v1 = vadd.f32 %v2731_v13, %v2597_v17  ;;  %4287 = vmatmul.msk.f32.gmra.mxu2 %vm7452_vm9, %v3159_v51  ;;  %4317 = vmatmul.msk.f32.gmra.mxu3 %vm7447_vm1, %v3159_v51  ;;  %vm7454_vm3 = vmmov %vm7447_vm1  ;;  %v3162_v51 = vld [vmem:[#allocation4 + $0x50] sm:$0xff] }
 0x472   : > { %v3005_v9 = vrot.slane %v6764_v20, 1  ;;  %vm7455_vm4 = vmmov %vm7447_vm1 }
 0x473   : > { %v2796_v10 = vadd.f32 %v6507_v26, %v2766_v1  ;;  %vm7456_vm9 = vmmov %vm7447_vm1  ;;  %v3013_v1 = vrot.slane %v4537_v16, 1 }
 0x474   : > { %v3006_v5 = vsel %vm7448_vm0, %v3003_v48, %v3005_v9  ;;  %vm7457_vm1 = vmmov %vm7448_vm0 }
 0x475   : > { %v2823_v27 = vmul.f32 0.1, %v2796_v10  ;;  %3057 = vrot.lane.b32.xlu0 %v3006_v5, %s4536_s21  ;;  %vm7458_vm0 = vmmov %vm7432_vm2 }
 0x476   : > { %vm7467_vm5 = vmmov %vm7457_vm1 }
 0x477   : > { %v2850_v25 = vmax.f32 %v2796_v10, %v2823_v27  ;;  %v3030_v0 = vpop.permute.xlu1 %3029 }
 0x478   : > { %v3104_v35 = vsel %vm7432_vm2, %v6601_v59, %v3030_v0  ;;  %v2734_v8 = vpop.f32.mrf.mxu1  ;;  %v3160_v15 = vld [vmem:[#allocation4 + $0x40] sm:$0xff]  ;;  %v2568_v59 = vpop.f32.mrf.mxu0  ;;  %vm7460_vm2 = vnez %v7459_v42 }
 0x479   : > { %v6777_v36 = vsel %vm4909_vm11, %v2850_v25, 0.0  ;;  %3131 = vst.msk [vmem:[#allocation4 + $0x48] sm:$0xff] %vm7454_vm3, %v3104_v35  ;;  %v2767_v7 = vadd.f32 %v2734_v8, %v2598_v37  ;;  %4288 = vmatmul.msk.f32.gmra.mxu2 %vm7455_vm4, %v3160_v15  ;;  %4318 = vmatmul.msk.f32.gmra.mxu3 %vm7456_vm9, %v3160_v15  ;;  %v2599_v38 = vadd.f32 %v2568_v59, %v2427_v23  ;;  %vm7461_vm4 = vmmov %vm7454_vm3 }
 0x47a   : > { %v3007_v14 = vrot.slane %v6777_v36, 1  ;;  %vm7462_vm9 = vmmov %vm7454_vm3 }
 0x47b   : > { %v2797_v54 = vadd.f32 %v6507_v26, %v2767_v7 }
 0x47c   : > { %v3008_v43 = vsel %vm7457_vm1, %v3005_v9, %v3007_v14 }
 0x47d   : > { %v2824_v33 = vmul.f32 0.1, %v2797_v54  ;;  %3059 = vrot.lane.b32.xlu1 %v3008_v43, %s4536_s21  ;;  %v2429_v27 = vpop.f32.mrf.mxu3 }
 0x47f   : > { %v2851_v32 = vmax.f32 %v2797_v54, %v2824_v33  ;;  %v3038_v60 = vpop.permute.xlu2 %3037 }
 0x480   : > { %v3108_v6 = vsel %vm7458_vm0, %v6641_v21, %v3038_v60  ;;  %v2737_v48 = vpop.f32.mrf.mxu1  ;;  %v3161_v41 = vld [vmem:[#allocation4 + $0x48] sm:$0xff] }
 0x481   : > { %v6790_v4 = vsel %vm7460_vm2, %v2851_v32, 0.0  ;;  %3135 = vst.msk [vmem:[#allocation4 + $0x68] sm:$0xff] %vm7454_vm3, %v3108_v6  ;;  %v2768_v31 = vadd.f32 %v2737_v48, %v2599_v38  ;;  %4289 = vmatmul.msk.f32.gmra.mxu2 %vm7461_vm4, %v3161_v41  ;;  %4319 = vmatmul.msk.f32.gmra.mxu3 %vm7462_vm9, %v3161_v41  ;;  %vm7464_vm2 = vnez %v7463_v19  ;;  %vm7465_vm4 = vmmov %vm7454_vm3 }
 0x482   : > { %v3009_v17 = vrot.slane %v6790_v4, 1  ;;  %vm7466_vm9 = vmmov %vm7454_vm3 }
 0x483   : > { %v2798_v58 = vadd.f32 %v6507_v26, %v2768_v31 }
 0x484   : > { %v3010_v40 = vsel %vm7457_vm1, %v3007_v14, %v3009_v17 }
 0x485   : > { %v2825_v21 = vmul.f32 0.1, %v2798_v58  ;;  %3061 = vrot.lane.b32.xlu2 %v3010_v40, %s4536_s21 }
 0x487   : > { %v2852_v29 = vmax.f32 %v2798_v58, %v2825_v21  ;;  %v3034_v11 = vpop.permute.xlu0 %3033 }
 0x488   : > { %v3106_v13 = vsel %vm7458_vm0, %v6625_v61, %v3034_v11  ;;  %v3165_v8 = vld [vmem:[#allocation4 + $0x68] sm:$0xff] }
 0x489   : > { %v6803_v52 = vsel %vm7464_vm2, %v2852_v29, 0.0  ;;  %3133 = vst.msk [vmem:[#allocation4 + $0x58] sm:$0xff] %vm7454_vm3, %v3106_v13  ;;  %4290 = vmatmul.msk.f32.gmra.mxu2 %vm7465_vm4, %v3162_v51  ;;  %4320 = vmatmul.msk.f32.gmra.mxu3 %vm7466_vm9, %v3162_v51  ;;  %vm7468_vm2 = vmmov %vm7454_vm3 }
 0x48a   : > { %v3011_v26 = vrot.slane %v6803_v52, 1  ;;  %vm7469_vm3 = vmmov %vm7468_vm2 }
 0x48b   : > { %vm7470_vm4 = vmmov %vm7468_vm2 }
 0x48c   : > { %v3014_v9 = vsel %vm7457_vm1, %v3011_v26, %v3013_v1  ;;  %v3012_v10 = vsel %vm7467_vm5, %v3009_v17, %v3011_v26  ;;  %vm7471_vm5 = vmmov %vm7458_vm0 }
 0x48d   : > { %3065 = vrot.lane.b32.xlu1 %v3014_v9, %s4536_s21  ;;  %3063 = vrot.lane.b32.xlu0 %v3012_v10, %s4536_s21  ;;  %vm7472_vm9 = vmmov %vm7468_vm2  ;;  %v2331_v15 = vpop.f32.mrf.mxu2  ;;  %v3399_v59 = vpop.f32.mrf.mxu3 }
 0x48e   : > { %3067 = vrot.lane.b32.xlu2 %v3013_v1, %s4536_s21  ;;  %vm7473_vm1 = vmmov %vm7468_vm2 }
 0x48f   : > { %v3036_v61 = vpop.permute.xlu1 %3035  ;;  %vm7474_vm6 = vmmov %vm7473_vm1 }
 0x490   : > { %v3107_v5 = vsel %vm7458_vm0, %v6633_v18, %v3036_v61  ;;  %v3163_v34 = vld [vmem:[#allocation4 + $0x58] sm:$0xff] }
 0x491   : > { %3134 = vst.msk [vmem:[#allocation4 + $0x60] sm:$0xff] %vm7468_vm2, %v3107_v5  ;;  %4291 = vmatmul.msk.f32.gmra.mxu2 %vm7469_vm3, %v3163_v34  ;;  %4321 = vmatmul.msk.f32.gmra.mxu3 %vm7470_vm4, %v3163_v34  ;;  %vm7475_vm2 = vmmov %vm7473_vm1 }
 0x492   : > { %vm7476_vm3 = vmmov %vm7473_vm1 }
 0x493   : > { %vm7477_vm4 = vmmov %vm7473_vm1 }
 0x497   : > { %v3044_v37 = vpop.permute.xlu2 %3043 }
 0x498   : > { %v3111_v25 = vsel %vm7471_vm5, %v6667_v28, %v3044_v37  ;;  %v3164_v0 = vld [vmem:[#allocation4 + $0x60] sm:$0xff]  ;;  %vm7478_vm5 = vmmov %vm7458_vm0 }
 0x499   : > { %3138 = vst.msk [vmem:[#allocation4 + $0x80] sm:$0xff] %vm7472_vm9, %v3111_v25  ;;  %4292 = vmatmul.msk.f32.gmra.mxu2 %vm7473_vm1, %v3164_v0  ;;  %4322 = vmatmul.msk.f32.gmra.mxu3 %vm7474_vm6, %v3164_v0  ;;  %vm7479_vm9 = vmmov %vm7473_vm1 }
 0x49a   : > { %vm7480_vm6 = vmmov %vm7473_vm1 }
 0x49f   : > { %v3040_v18 = vpop.permute.xlu0 %3039 }
 0x4a0   : > { %v3109_v35 = vsel %vm7458_vm0, %v6650_v24, %v3040_v18  ;;  %v3168_v22 = vld [vmem:[#allocation4 + $0x80] sm:$0xff] }
 0x4a1   : > { %3136 = vst.msk [vmem:[#allocation4 + $0x70] sm:$0xff] %vm7475_vm2, %v3109_v35  ;;  %4293 = vmatmul.msk.f32.gmra.mxu2 %vm7476_vm3, %v3165_v8  ;;  %4323 = vmatmul.msk.f32.gmra.mxu3 %vm7477_vm4, %v3165_v8  ;;  %vm7481_vm2 = vmmov %vm7473_vm1 }
 0x4a2   : > { %vm7482_vm3 = vmmov %vm7473_vm1 }
 0x4a3   : > { %vm7483_vm4 = vmmov %vm7473_vm1 }
 0x4a7   : > { %v3042_v28 = vpop.permute.xlu1 %3041 }
 0x4a8   : > { %v3110_v30 = vsel %vm7478_vm5, %v6659_v62, %v3042_v28  ;;  %v3166_v7 = vld [vmem:[#allocation4 + $0x70] sm:$0xff]  ;;  %vm7484_vm5 = vmmov %vm7458_vm0 }
 0x4a9   : > { %3137 = vst.msk [vmem:[#allocation4 + $0x78] sm:$0xff] %vm7479_vm9, %v3110_v30  ;;  %4294 = vmatmul.msk.f32.gmra.mxu2 %vm7480_vm6, %v3166_v7  ;;  %4324 = vmatmul.msk.f32.gmra.mxu3 %vm7473_vm1, %v3166_v7  ;;  %vm7485_vm9 = vmmov %vm7473_vm1 }
 0x4aa   : > { %vm7486_vm6 = vmmov %vm7473_vm1 }
 0x4af   : > { %v3050_v24 = vpop.permute.xlu2 %3049 }
 0x4b0   : > { %v3114_v39 = vsel %vm7458_vm0, %v6699_v53, %v3050_v24  ;;  %v3167_v14 = vld [vmem:[#allocation4 + $0x78] sm:$0xff] }
 0x4b1   : > { %3141 = vst.msk [vmem:[#allocation4 + $0x98] sm:$0xff] %vm7481_vm2, %v3114_v39  ;;  %4295 = vmatmul.msk.f32.gmra.mxu2 %vm7482_vm3, %v3167_v14  ;;  %4325 = vmatmul.msk.f32.gmra.mxu3 %vm7483_vm4, %v3167_v14  ;;  %vm7487_vm2 = vmmov %vm7473_vm1 }
 0x4b2   : > { %vm7488_vm3 = vmmov %vm7473_vm1 }
 0x4b3   : > { %vm7489_vm4 = vmmov %vm7473_vm1 }
 0x4b7   : > { %v3046_v54 = vpop.permute.xlu0 %3045 }
 0x4b8   : > { %v3112_v62 = vsel %vm7484_vm5, %v6677_v3, %v3046_v54  ;;  %v3402_v3 = vpop.f32.mrf.mxu3  ;;  %vm7490_vm5 = vmmov %vm7458_vm0 }
 0x4b9   : > { %3139 = vst.msk [vmem:[#allocation4 + $0x88] sm:$0xff] %vm7485_vm9, %v3112_v62  ;;  %4296 = vmatmul.msk.f32.gmra.mxu2 %vm7486_vm6, %v3168_v22  ;;  %4326 = vmatmul.msk.f32.gmra.mxu3 %vm7473_vm1, %v3168_v22  ;;  %vm7491_vm9 = vmmov %vm7473_vm1 }
 0x4ba   : > { %vm7492_vm6 = vmmov %vm7473_vm1 }
 0x4bf   : > { %v3048_v53 = vpop.permute.xlu1 %3047 }
 0x4c0   : > { %v3113_v43 = vsel %vm7458_vm0, %v6688_v63, %v3048_v53  ;;  %v3169_v23 = vld [vmem:[#allocation4 + $0x88] sm:$0xff]  ;;  %v7493_v63 = vld [vmem:[#allocation6_spill] sm:$0xff] }
 0x4c1   : > { %3140 = vst.msk [vmem:[#allocation4 + $0x90] sm:$0xff] %vm7487_vm2, %v3113_v43  ;;  %4297 = vmatmul.msk.f32.gmra.mxu2 %vm7488_vm3, %v3169_v23  ;;  %4327 = vmatmul.msk.f32.gmra.mxu3 %vm7489_vm4, %v3169_v23  ;;  %v6855_v60 = vperm.slane %v7493_v63, 0  ;;  %vm7494_vm2 = vmmov %vm7473_vm1 }
 0x4c2   : > { %vm7495_vm3 = vmmov %vm7473_vm1 }
 0x4c3   : > { %vm7496_vm4 = vmmov %vm7473_vm1 }
 0x4c7   : > { %v3056_v33 = vpop.permute.xlu2 %3055 }
 0x4c8   : > { %v3117_v38 = vsel %vm7490_vm5, %v6738_v12, %v3056_v33  ;;  %v3170_v32 = vld [vmem:[#allocation4 + $0x90] sm:$0xff]  ;;  %v3171_v12 = vld [vmem:[#allocation4 + $0x98] sm:$0xff]  ;;  %vm7497_vm5 = vmmov %vm7458_vm0 }
 0x4c9   : > { %3144 = vst.msk [vmem:[#allocation4 + $0xb0] sm:$0xff] %vm7491_vm9, %v3117_v38  ;;  %4298 = vmatmul.msk.f32.gmra.mxu2 %vm7492_vm6, %v3170_v32  ;;  %4328 = vmatmul.msk.f32.gmra.mxu3 %vm7473_vm1, %v3170_v32  ;;  %vm7498_vm9 = vmmov %vm7473_vm1 }
 0x4ca   : > { %vm7499_vm6 = vmmov %vm7473_vm1 }
 0x4cc   : > { %v3292_v6 = vpop.f32.mrf.mxu2  ;;  %v3405_v48 = vpop.f32.mrf.mxu3 }
 0x4cd   : > { %v3400_v41 = vadd.f32 %v3399_v59, %v3292_v6 }
 0x4cf   : > { %v3486_v42 = vadd.f32 %v6855_v60, %v3400_v41  ;;  %v3052_v31 = vpop.permute.xlu0 %3051 }
 0x4d0   : > { %v3115_v17 = vsel %vm7458_vm0, %v6712_v44, %v3052_v31  ;;  %v3174_v54 = vld [vmem:[#allocation4 + $0xb0] sm:$0xff] }
 0x4d1   : > { %v4338_v58 = vmul.f32 -1.442695, %v3486_v42  ;;  %3142 = vst.msk [vmem:[#allocation4 + $0xa0] sm:$0xff] %vm7494_vm2, %v3115_v17  ;;  %4299 = vmatmul.msk.f32.gmra.mxu2 %vm7495_vm3, %v3171_v12  ;;  %4329 = vmatmul.msk.f32.gmra.mxu3 %vm7496_vm4, %v3171_v12  ;;  %vm7500_vm2 = vmmov %vm7473_vm1 }
 0x4d2   : > { %vm7501_vm3 = vmmov %vm7473_vm1 }
 0x4d3   : > { %4412 = vpow2.f32 %v4338_v58  ;;  %vm7502_vm4 = vmmov %vm7473_vm1 }
 0x4d4   : > { %v3295_v40 = vpop.f32.mrf.mxu2  ;;  %v3408_v21 = vpop.f32.mrf.mxu3 }
 0x4d5   : > { %v3403_v29 = vadd.f32 %v3402_v3, %v3295_v40 }
 0x4d7   : > { %v3487_v11 = vadd.f32 %v6855_v60, %v3403_v29  ;;  %v3054_v13 = vpop.permute.xlu1 %3053 }
 0x4d8   : > { %v3116_v51 = vsel %vm7497_vm5, %v6725_v49, %v3054_v13  ;;  %v3172_v16 = vld [vmem:[#allocation4 + $0xa0] sm:$0xff] }
 0x4d9   : > { %v4413_v44 = vpop.eup %4412  ;;  %v4339_v1 = vmul.f32 -1.442695, %v3487_v11  ;;  %3143 = vst.msk [vmem:[#allocation4 + $0xa8] sm:$0xff] %vm7498_vm9, %v3116_v51  ;;  %4300 = vmatmul.msk.f32.gmra.mxu2 %vm7499_vm6, %v3172_v16  ;;  %4330 = vmatmul.msk.f32.gmra.mxu3 %vm7473_vm1, %v3172_v16  ;;  %vm7503_vm9 = vmmov %vm7458_vm0 }
 0x4da   : > { %v3598_v19 = vadd.f32 1.0, %v4413_v44 }
 0x4db   : > { %4414 = vpow2.f32 %v4339_v1 }
 0x4dc   : > { %4416 = vrcp.f32 %v3598_v19  ;;  %v3298_v26 = vpop.f32.mrf.mxu2  ;;  %v3411_v9 = vpop.f32.mrf.mxu3  ;;  %v3637_v28 = vand.u32 2147483648, %v3598_v19  ;;  %v3635_v7 = vand.u32 2147483647, %v3598_v19  ;;  %vm3631_vm6 = vweird.f32 %v3598_v19 }
 0x4dd   : > { %v3406_v10 = vadd.f32 %v3405_v48, %v3298_v26 }
 0x4df   : > { %v3488_v61 = vadd.f32 %v6855_v60, %v3406_v10  ;;  %v3062_v5 = vpop.permute.xlu2 %3061 }
 0x4e0   : > { %v3120_v49 = vsel %vm7458_vm0, %v6777_v36, %v3062_v5  ;;  %v3173_v34 = vld [vmem:[#allocation4 + $0xa8] sm:$0xff]  ;;  %vm7504_vm0 = vmmov %vm7473_vm1 }
 0x4e1   : > { %v4415_v27 = vpop.eup %4414  ;;  %v4340_v37 = vmul.f32 -1.442695, %v3488_v61  ;;  %3147 = vst.msk [vmem:[#allocation4 + $0xc8] sm:$0xff] %vm7500_vm2, %v3120_v49  ;;  %4301 = vmatmul.msk.f32.gmra.mxu2 %vm7501_vm3, %v3173_v34  ;;  %4331 = vmatmul.msk.f32.gmra.mxu3 %vm7502_vm4, %v3173_v34  ;;  %vm7505_vm2 = vmmov %vm7504_vm0  ;;  %vm7093_vm4 = vcmask 31744  }
 0x4e2   : > { %v4417_v25 = vpop.eup %4416  ;;  %v6875_v0 = vadd.f32 1.0, %v4415_v27 }
 0x4e3   : > { %v3627_v18 = vmul.f32 %v4417_v25, %v3598_v19  ;;  %4418 = vpow2.f32 %v4340_v37  ;;  %vm3632_vm5 = vweird.f32 %v4417_v25 }
 0x4e4   : > { %4420 = vrcp.f32 %v6875_v0  ;;  %v3301_v35 = vpop.f32.mrf.mxu2  ;;  %v6878_v8 = vpop.f32.mrf.mxu3  ;;  %vm3633_vm3 = vmor %vm3631_vm6, %vm3632_vm5  ;;  %v3652_v48 = vand.u32 2147483648, %v6875_v0  ;;  %v3650_v42 = vand.u32 2147483647, %v6875_v0  ;;  %vm3646_vm6 = vweird.f32 %v6875_v0 }
 0x4e5   : > { %v3628_v36 = vsub.f32 1.0, %v3627_v18  ;;  %v3409_v15 = vadd.f32 %v3408_v21, %v3301_v35 }
 0x4e6   : > { %v3653_v16 = vor.u32 1.1754944e-38, %v3652_v48 }
 0x4e7   : > { %v3629_v30 = vmul.f32 %v4417_v25, %v3628_v36  ;;  %v3489_v24 = vadd.f32 %v6855_v60, %v3409_v15  ;;  %v3058_v39 = vpop.permute.xlu0 %3057 }
 0x4e8   : > { %v3118_v14 = vsel %vm7503_vm9, %v6751_v50, %v3058_v39  ;;  %v3638_v50 = vor.u32 1.1754944e-38, %v3637_v28  ;;  %vm3636_vm9 = vcmp.eq.f32.partialorder %v3635_v7, 8.507059e+37  ;;  %v3068_v40 = vpop.permute.xlu2 %3067 }
 0x4e9   : > { %v4419_v62 = vpop.eup %4418  ;;  %v3630_v22 = vadd.f32 %v4417_v25, %v3629_v30  ;;  %v4341_v59 = vmul.f32 -1.442695, %v3489_v24  ;;  %3145 = vst.msk [vmem:[#allocation4 + $0xb8] sm:$0xff] %vm7473_vm1, %v3118_v14  ;;  %4302 = vmatmul.msk.f32.gmra.mxu2 %vm7504_vm0, %v3174_v54  ;;  %4332 = vmatmul.msk.f32.gmra.mxu3 %vm7505_vm2, %v3174_v54  ;;  %vm7506_vm1 = vcmask 130048   ;;  %vm7507_vm2 = vmmov %vm7504_vm0 }
 0x4ea   : > { %v4421_v53 = vpop.eup %4420  ;;  %v6894_v43 = vadd.f32 1.0, %v4419_v62 }
 0x4eb   : > { %v3634_v23 = vsel %vm3633_vm3, %v4417_v25, %v3630_v22  ;;  %v3642_v3 = vmul.f32 %v4421_v53, %v6875_v0  ;;  %4422 = vpow2.f32 %v4341_v59  ;;  %vm3647_vm5 = vweird.f32 %v4421_v53  ;;  %vm7508_vm3 = vmmov %vm7504_vm0 }
 0x4ec   : > { %v3639_v33 = vsel %vm3636_vm9, %v3638_v50, %v3634_v23  ;;  %4424 = vrcp.f32 %v6894_v43  ;;  %v3304_v38 = vpop.f32.mrf.mxu2  ;;  %v6898_v32 = vpop.f32.mrf.mxu3  ;;  %vm3150_vm9 = vcmask 253952   ;;  %vm3648_vm7 = vmor %vm3646_vm6, %vm3647_vm5  ;;  %v3667_v5 = vand.u32 2147483648, %v6894_v43 }
 0x4ed   : > { %4048 = vst.msk [vmem:[%s6891_s20] sm:$0xff] %vm7093_vm4, %v3639_v33  ;;  %v3643_v63 = vsub.f32 1.0, %v3642_v3  ;;  %v3412_v6 = vadd.f32 %v3411_v9, %v3304_v38  ;;  %vm7509_vm4 = vmmov %vm7506_vm1  ;;  %v3665_v34 = vand.u32 2147483647, %v6894_v43  ;;  %v3177_v3 = vld [vmem:[#allocation4 + $0xc8] sm:$0xff] }
 0x4ee   : > { %v3123_v13 = vsel %vm7509_vm4, 0.0, %v3068_v40  ;;  %vm7511_vm5 = vmmov %vm7507_vm2 }
 0x4ef   : > { %v3644_v41 = vmul.f32 %v4421_v53, %v3643_v63  ;;  %v3490_v31 = vadd.f32 %v6855_v60, %v3412_v6  ;;  %v3060_v17 = vpop.permute.xlu1 %3059  ;;  %3151 = vst.msk [vmem:[#allocation4 + $0xe0] sm:$0x1] %vm3150_vm9, %v3123_v13  ;;  %vm7512_vm6 = vmmov %vm7507_vm2 }
 0x4f0   : > { %v3119_v12 = vsel %vm7506_vm1, %v6764_v20, %v3060_v17  ;;  %v3175_v58 = vld [vmem:[#allocation4 + $0xb8] sm:$0xff]  ;;  %vm3651_vm1 = vcmp.eq.f32.partialorder %v3650_v42, 8.507059e+37 }
 0x4f1   : > { %v4423_v21 = vpop.eup %4422  ;;  %v3645_v29 = vadd.f32 %v4421_v53, %v3644_v41  ;;  %v4342_v11 = vmul.f32 -1.442695, %v3490_v31  ;;  %3146 = vst.msk [vmem:[#allocation4 + $0xc0] sm:$0xff] %vm7504_vm0, %v3119_v12  ;;  %4303 = vmatmul.msk.f32.gmra.mxu2 %vm7507_vm2, %v3175_v58  ;;  %4333 = vmatmul.msk.f32.gmra.mxu3 %vm7508_vm3, %v3175_v58  ;;  %vm7510_vm0 = vcmask 31744   ;;  %vm3666_vm3 = vcmp.eq.f32.partialorder %v3665_v34, 8.507059e+37 }
 0x4f2   : > { %v4425_v51 = vpop.eup %4424  ;;  %v6913_v20 = vadd.f32 1.0, %v4423_v21  ;;  %vm7513_vm9 = vmmov %vm7510_vm0 }
 0x4f3   : > { %v3649_v44 = vsel %vm3648_vm7, %v4421_v53, %v3645_v29  ;;  %v3657_v1 = vmul.f32 %v4425_v51, %v6894_v43  ;;  %4426 = vpow2.f32 %v4342_v11  ;;  %vm3662_vm4 = vweird.f32 %v4425_v51 }
 0x4f4   : > { %v3654_v19 = vsel %vm3651_vm1, %v3653_v16, %v3649_v44  ;;  %4428 = vrcp.f32 %v6913_v20  ;;  %v3307_v26 = vpop.f32.mrf.mxu2  ;;  %v6917_v9 = vpop.f32.mrf.mxu3  ;;  %vm3661_vm7 = vweird.f32 %v6894_v43  ;;  %v3682_v54 = vand.u32 2147483648, %v6913_v20 }
 0x4f5   : > { %4049 = vst.msk [vmem:[%s6891_s20 + $0x8] sm:$0xff] %vm7510_vm0, %v3654_v19  ;;  %v3658_v10 = vsub.f32 1.0, %v3657_v1  ;;  %v3415_v61 = vadd.f32 %v6878_v8, %v3307_v26  ;;  %vm3663_vm2 = vmor %vm3661_vm7, %vm3662_vm4  ;;  %v3668_v8 = vor.u32 1.1754944e-38, %v3667_v5  ;;  %v3680_v22 = vand.u32 2147483647, %v6913_v20 }
 0x4f6   : > { %vm7514_vm0 = vcmask 130048   ;;  %vm3676_vm7 = vweird.f32 %v6913_v20 }
 0x4f7   : > { %v3659_v49 = vmul.f32 %v4425_v51, %v3658_v10  ;;  %v3491_v27 = vadd.f32 %v6855_v60, %v3415_v61  ;;  %vm7515_vm4 = vmmov %vm7514_vm0 }
 0x4f8   : > { %v3176_v37 = vld [vmem:[#allocation4 + $0xc0] sm:$0xff] }
 0x4f9   : > { %v4427_v25 = vpop.eup %4426  ;;  %v3660_v0 = vadd.f32 %v4425_v51, %v3659_v49  ;;  %v4343_v18 = vmul.f32 -1.442695, %v3491_v27  ;;  %4304 = vmatmul.msk.f32.gmra.mxu2 %vm7511_vm5, %v3176_v37  ;;  %4334 = vmatmul.msk.f32.gmra.mxu3 %vm7512_vm6, %v3176_v37  ;;  %vm7516_vm6 = vmmov %vm7511_vm5 }
 0x4fa   : > { %v4429_v35 = vpop.eup %4428  ;;  %v6928_v36 = vadd.f32 1.0, %v4427_v25 }
 0x4fb   : > { %v3664_v15 = vsel %vm3663_vm2, %v4425_v51, %v3660_v0  ;;  %v3672_v28 = vmul.f32 %v4429_v35, %v6913_v20  ;;  %4430 = vpow2.f32 %v4343_v18  ;;  %vm3677_vm1 = vweird.f32 %v4429_v35  ;;  %vm7517_vm2 = vmmov %vm7511_vm5 }
 0x4fc   : > { %v3669_v30 = vsel %vm3666_vm3, %v3668_v8, %v3664_v15  ;;  %4432 = vrcp.f32 %v6928_v36  ;;  %v3310_v7 = vpop.f32.mrf.mxu2  ;;  %v6932_v24 = vpop.f32.mrf.mxu3  ;;  %vm3678_vm3 = vmor %vm3676_vm7, %vm3677_vm1  ;;  %v3697_v58 = vand.u32 2147483648, %v6928_v36  ;;  %v3695_v21 = vand.u32 2147483647, %v6928_v36 }
 0x4fd   : > { %4050 = vst.msk [vmem:[%s6891_s20 + $0x10] sm:$0xff] %vm7513_vm9, %v3669_v30  ;;  %v3673_v39 = vsub.f32 1.0, %v3672_v28  ;;  %v3418_v14 = vadd.f32 %v6898_v32, %v3310_v7  ;;  %vm7518_vm9 = vmmov %vm7517_vm2  ;;  %vm3691_vm7 = vweird.f32 %v6928_v36 }
 0x4fe   : > { %v3698_v44 = vor.u32 1.1754944e-38, %v3697_v58 }
 0x4ff   : > { %v3674_v62 = vmul.f32 %v4429_v35, %v3673_v39  ;;  %v3492_v59 = vadd.f32 %v6855_v60, %v3418_v14  ;;  %v3066_v53 = vpop.permute.xlu1 %3065  ;;  %v3064_v50 = vpop.permute.xlu0 %3063 }
 0x500   : > { %v3122_v43 = vsel %vm7514_vm0, %v6803_v52, %v3066_v53  ;;  %v3121_v23 = vsel %vm7515_vm4, %v6790_v4, %v3064_v50  ;;  %v3683_v52 = vor.u32 1.1754944e-38, %v3682_v54  ;;  %vm3681_vm0 = vcmp.eq.f32.partialorder %v3680_v22, 8.507059e+37 }
 0x501   : > { %v4431_v33 = vpop.eup %4430  ;;  %v3675_v38 = vadd.f32 %v4429_v35, %v3674_v62  ;;  %v4344_v32 = vmul.f32 -1.442695, %v3492_v59  ;;  %3149 = vst.msk [vmem:[#allocation4 + $0xd8] sm:$0xff] %vm7511_vm5, %v3122_v43  ;;  %4305 = vmatmul.msk.f32.gmra.mxu2 %vm7516_vm6, %v3177_v3  ;;  %4335 = vmatmul.msk.f32.gmra.mxu3 %vm7517_vm2, %v3177_v3  ;;  %vm7519_vm4 = vcmask 31744   ;;  %vm7520_vm6 = vmmov %vm7517_vm2  ;;  %v3184_v43 = vld [vmem:[#allocation4 + $0xe0] sm:$0xff] }
 0x502   : > { %v4433_v63 = vpop.eup %4432  ;;  %v3603_v6 = vadd.f32 1.0, %v4431_v33  ;;  %3148 = vst.msk [vmem:[#allocation4 + $0xd0] sm:$0xff] %vm7518_vm9, %v3121_v23  ;;  %vm7521_vm9 = vmmov %vm7519_vm4 }
 0x503   : > { %v3679_v4 = vsel %vm3678_vm3, %v4429_v35, %v3675_v38  ;;  %v3687_v48 = vmul.f32 %v4433_v63, %v6928_v36  ;;  %4434 = vpow2.f32 %v4344_v32  ;;  %vm3692_vm1 = vweird.f32 %v4433_v63 }
 0x504   : > { %v3684_v41 = vsel %vm3681_vm0, %v3683_v52, %v3679_v4  ;;  %4436 = vrcp.f32 %v3603_v6  ;;  %v3313_v42 = vpop.f32.mrf.mxu2  ;;  %v3426_v31 = vpop.f32.mrf.mxu3  ;;  %vm3693_vm5 = vmor %vm3691_vm7, %vm3692_vm1  ;;  %vm3696_vm3 = vcmp.eq.f32.partialorder %v3695_v21, 8.507059e+37  ;;  %v3712_v34 = vand.u32 2147483648, %v3603_v6  ;;  %v3185_v21 = vld [vmem:[#allocation4 + $0xe8] sm:$0xff] }
 0x505   : > { %4051 = vst.msk [vmem:[%s6891_s20 + $0x18] sm:$0xff] %vm7519_vm4, %v3684_v41  ;;  %v3688_v17 = vsub.f32 1.0, %v3687_v48  ;;  %v3421_v12 = vadd.f32 %v6917_v9, %v3313_v42  ;;  %v3710_v37 = vand.u32 2147483647, %v3603_v6  ;;  %vm3706_vm4 = vweird.f32 %v3603_v6  ;;  %vm7522_vm7 = vmmov %vm7517_vm2 }
 0x506   : > { %v3713_v15 = vor.u32 1.1754944e-38, %v3712_v34 }
 0x507   : > { %v3689_v40 = vmul.f32 %v4433_v63, %v3688_v17  ;;  %v3493_v29 = vadd.f32 %v6855_v60, %v3421_v12 }
 0x508   : > { %v3179_v8 = vld [vmem:[#allocation4 + $0xd8] sm:$0xff] }
 0x509   : > { %v4435_v11 = vpop.eup %4434  ;;  %v3690_v13 = vadd.f32 %v4433_v63, %v3689_v40  ;;  %v4345_v51 = vmul.f32 -1.442695, %v3493_v29  ;;  %v3178_v16 = vld [vmem:[#allocation4 + $0xd0] sm:$0xff] }
 0x50a   : > { %v4437_v20 = vpop.eup %4436  ;;  %v3604_v1 = vadd.f32 1.0, %v4435_v11  ;;  %4306 = vmatmul.msk.f32.gmra.mxu2 %vm7520_vm6, %v3178_v16  ;;  %4336 = vmatmul.msk.f32.gmra.mxu3 %vm7517_vm2, %v3178_v16  ;;  %vm3711_vm6 = vcmp.eq.f32.partialorder %v3710_v37, 8.507059e+37  ;;  %v2458_v37 = vld [vmem:[#allocation3 + $0x100] sm:$0x3] }
 0x50b   : > { %v3694_v19 = vsel %vm3693_vm5, %v4433_v63, %v3690_v13  ;;  %v3702_v26 = vmul.f32 %v4437_v20, %v3603_v6  ;;  %4438 = vpow2.f32 %v4345_v51  ;;  %vm3707_vm0 = vweird.f32 %v4437_v20  ;;  %vm7523_vm5 = vmmov %vm7517_vm2  ;;  %2570 = vmatmul.f32.gmra.mxu0 %v2458_v37 }
 0x50c   : > { %v3699_v9 = vsel %vm3696_vm3, %v3698_v44, %v3694_v19  ;;  %4440 = vrcp.f32 %v3604_v1  ;;  %v3316_v10 = vpop.f32.mrf.mxu2  ;;  %v3429_v61 = vpop.f32.mrf.mxu3  ;;  %vm3708_vm1 = vmor %vm3706_vm4, %vm3707_vm0  ;;  %v3727_v22 = vand.u32 2147483648, %v3604_v1  ;;  %v3725_v53 = vand.u32 2147483647, %v3604_v1 }
 0x50d   : > { %4052 = vst.msk [vmem:[%s6891_s20 + $0x20] sm:$0xff] %vm7521_vm9, %v3699_v9  ;;  %v3703_v5 = vsub.f32 1.0, %v3702_v26  ;;  %v3424_v49 = vadd.f32 %v6932_v24, %v3316_v10  ;;  %vm7524_vm2 = vmmov %vm7521_vm9  ;;  %vm3721_vm9 = vweird.f32 %v3604_v1 }
 0x50e   : > { %v3728_v32 = vor.u32 1.1754944e-38, %v3727_v22  ;;  %vm7525_vm4 = vmmov %vm7523_vm5 }
 0x50f   : > { %v3704_v27 = vmul.f32 %v4437_v20, %v3703_v5  ;;  %v3494_v25 = vadd.f32 %v6855_v60, %v3424_v49 }
 0x511   : > { %v4439_v0 = vpop.eup %4438  ;;  %v3705_v18 = vadd.f32 %v4437_v20, %v3704_v27  ;;  %v4346_v35 = vmul.f32 -1.442695, %v3494_v25  ;;  %v2627_v25 = vld [vmem:[#allocation3 + $0x110] sm:$0x3] }
 0x512   : > { %v4441_v36 = vpop.eup %4440  ;;  %v3605_v28 = vadd.f32 1.0, %v4439_v0  ;;  %4307 = vmatmul.msk.f32.gmra.mxu2 %vm7522_vm7, %v3179_v8  ;;  %4337 = vmatmul.msk.f32.gmra.mxu3 %vm7523_vm5, %v3179_v8  ;;  %vm7526_vm7 = vmmov %vm7524_vm2 }
 0x513   : > { %v3709_v30 = vsel %vm3708_vm1, %v4437_v20, %v3705_v18  ;;  %v3717_v7 = vmul.f32 %v4441_v36, %v3604_v1  ;;  %4442 = vpow2.f32 %v4346_v35  ;;  %vm3722_vm3 = vweird.f32 %v4441_v36  ;;  %2739 = vmatmul.f32.gmra.mxu1 %v2627_v25 }
 0x514   : > { %v3714_v24 = vsel %vm3711_vm6, %v3713_v15, %v3709_v30  ;;  %4444 = vrcp.f32 %v3605_v28  ;;  %v3319_v39 = vpop.f32.mrf.mxu2  ;;  %v3432_v14 = vpop.f32.mrf.mxu3  ;;  %vm3723_vm0 = vmor %vm3721_vm9, %vm3722_vm3  ;;  %vm3726_vm1 = vcmp.eq.f32.partialorder %v3725_v53, 8.507059e+37  ;;  %v3742_v17 = vand.u32 2147483648, %v3605_v28 }
 0x515   : > { %4053 = vst.msk [vmem:[%s6891_s20 + $0x28] sm:$0xff] %vm7524_vm2, %v3714_v24  ;;  %v3718_v54 = vsub.f32 1.0, %v3717_v7  ;;  %v3427_v62 = vadd.f32 %v3426_v31, %v3319_v39  ;;  %v3740_v58 = vand.u32 2147483647, %v3605_v28  ;;  %vm3736_vm6 = vweird.f32 %v3605_v28  ;;  %vm7527_vm3 = vmmov %vm7525_vm4 }
 0x516   : > { %v3743_v16 = vor.u32 1.1754944e-38, %v3742_v17 }
 0x517   : > { %v3719_v59 = vmul.f32 %v4441_v36, %v3718_v54  ;;  %v3495_v50 = vadd.f32 %v6855_v60, %v3427_v62  ;;  %vm3741_vm9 = vcmp.eq.f32.partialorder %v3740_v58, 8.507059e+37 }
 0x519   : > { %v4443_v23 = vpop.eup %4442  ;;  %v3720_v3 = vadd.f32 %v4441_v36, %v3719_v59  ;;  %v4347_v33 = vmul.f32 -1.442695, %v3495_v50 }
 0x51a   : > { %v4445_v38 = vpop.eup %4444  ;;  %v3606_v63 = vadd.f32 1.0, %v4443_v23  ;;  %4308 = vmatmul.msk.f32.gmra.mxu2 %vm7525_vm4, %v3184_v43 }
 0x51b   : > { %v3724_v52 = vsel %vm3723_vm0, %v4441_v36, %v3720_v3  ;;  %v3732_v6 = vmul.f32 %v4445_v38, %v3605_v28  ;;  %4446 = vpow2.f32 %v4347_v33  ;;  %vm3737_vm5 = vweird.f32 %v4445_v38  ;;  %vm7528_vm0 = vmmov %vm7526_vm7 }
 0x51c   : > { %v3729_v4 = vsel %vm3726_vm1, %v3728_v32, %v3724_v52  ;;  %4448 = vrcp.f32 %v3606_v63  ;;  %v3322_v48 = vpop.f32.mrf.mxu2  ;;  %v3435_v41 = vpop.f32.mrf.mxu3  ;;  %vm3738_vm2 = vmor %vm3736_vm6, %vm3737_vm5  ;;  %v3757_v5 = vand.u32 2147483648, %v3606_v63  ;;  %v3755_v34 = vand.u32 2147483647, %v3606_v63 }
 0x51d   : > { %4054 = vst.msk [vmem:[%s6891_s20 + $0x30] sm:$0xff] %vm7526_vm7, %v3729_v4  ;;  %v3733_v42 = vsub.f32 1.0, %v3732_v6  ;;  %v3430_v31 = vadd.f32 %v3429_v61, %v3322_v48  ;;  %vm3751_vm1 = vweird.f32 %v3606_v63  ;;  %vm7529_vm6 = vmmov %vm7528_vm0 }
 0x51e   : > { %v3758_v36 = vor.u32 1.1754944e-38, %v3757_v5  ;;  %vm3756_vm5 = vcmp.eq.f32.partialorder %v3755_v34, 8.507059e+37 }
 0x51f   : > { %v3734_v12 = vmul.f32 %v4445_v38, %v3733_v42  ;;  %v3496_v40 = vadd.f32 %v6855_v60, %v3430_v31 }
 0x521   : > { %v4447_v29 = vpop.eup %4446  ;;  %v3735_v11 = vadd.f32 %v4445_v38, %v3734_v12  ;;  %v4348_v13 = vmul.f32 -1.442695, %v3496_v40 }
 0x522   : > { %v4449_v51 = vpop.eup %4448  ;;  %v3607_v20 = vadd.f32 1.0, %v4447_v29  ;;  %4309 = vmatmul.msk.f32.gmra.mxu2 %vm7527_vm3, %v3185_v21 }
 0x523   : > { %v3739_v44 = vsel %vm3738_vm2, %v4445_v38, %v3735_v11  ;;  %v3747_v1 = vmul.f32 %v4449_v51, %v3606_v63  ;;  %4450 = vpow2.f32 %v4348_v13  ;;  %vm3752_vm4 = vweird.f32 %v4449_v51 }
 0x524   : > { %v3744_v19 = vsel %vm3741_vm9, %v3743_v16, %v3739_v44  ;;  %4452 = vrcp.f32 %v3607_v20  ;;  %v3325_v26 = vpop.f32.mrf.mxu2  ;;  %v3438_v9 = vpop.f32.mrf.mxu3  ;;  %vm3753_vm7 = vmor %vm3751_vm1, %vm3752_vm4  ;;  %v3772_v62 = vand.u32 2147483648, %v3607_v20  ;;  %v3770_v59 = vand.u32 2147483647, %v3607_v20 }
 0x525   : > { %4055 = vst.msk [vmem:[%s6891_s20 + $0x38] sm:$0xff] %vm7528_vm0, %v3744_v19  ;;  %v3748_v10 = vsub.f32 1.0, %v3747_v1  ;;  %v3433_v61 = vadd.f32 %v3432_v14, %v3325_v26  ;;  %vm3766_vm3 = vweird.f32 %v3607_v20  ;;  %vm7530_vm4 = vmmov %vm7529_vm6 }
 0x526   : > { %v3773_v33 = vor.u32 1.1754944e-38, %v3772_v62  ;;  %vm3771_vm0 = vcmp.eq.f32.partialorder %v3770_v59, 8.507059e+37 }
 0x527   : > { %v3749_v49 = vmul.f32 %v4449_v51, %v3748_v10  ;;  %v3497_v27 = vadd.f32 %v6855_v60, %v3433_v61 }
 0x529   : > { %v4451_v0 = vpop.eup %4450  ;;  %v3750_v18 = vadd.f32 %v4449_v51, %v3749_v49  ;;  %v4349_v35 = vmul.f32 -1.442695, %v3497_v27 }
 0x52a   : > { %v4453_v8 = vpop.eup %4452  ;;  %v3608_v15 = vadd.f32 1.0, %v4451_v0 }
 0x52b   : > { %v3754_v28 = vsel %vm3753_vm7, %v4449_v51, %v3750_v18  ;;  %v3762_v30 = vmul.f32 %v4453_v8, %v3607_v20  ;;  %4454 = vpow2.f32 %v4349_v35  ;;  %vm3767_vm2 = vweird.f32 %v4453_v8 }
 0x52c   : > { %v3759_v7 = vsel %vm3756_vm5, %v3758_v36, %v3754_v28  ;;  %4456 = vrcp.f32 %v3608_v15  ;;  %v3328_v24 = vpop.f32.mrf.mxu2  ;;  %v3441_v39 = vpop.f32.mrf.mxu3  ;;  %vm3768_vm9 = vmor %vm3766_vm3, %vm3767_vm2  ;;  %v3787_v42 = vand.u32 2147483648, %v3608_v15  ;;  %v3785_v17 = vand.u32 2147483647, %v3608_v15 }
 0x52d   : > { %4056 = vst.msk [vmem:[%s6891_s20 + $0x40] sm:$0xff] %vm7529_vm6, %v3759_v7  ;;  %v3763_v14 = vsub.f32 1.0, %v3762_v30  ;;  %v3436_v54 = vadd.f32 %v3435_v41, %v3328_v24  ;;  %vm3781_vm7 = vweird.f32 %v3608_v15  ;;  %vm7531_vm2 = vmmov %vm7530_vm4 }
 0x52e   : > { %v3788_v11 = vor.u32 1.1754944e-38, %v3787_v42  ;;  %vm3786_vm6 = vcmp.eq.f32.partialorder %v3785_v17, 8.507059e+37 }
 0x52f   : > { %v3764_v22 = vmul.f32 %v4453_v8, %v3763_v14  ;;  %v3498_v53 = vadd.f32 %v6855_v60, %v3436_v54 }
 0x531   : > { %v4455_v50 = vpop.eup %4454  ;;  %v3765_v43 = vadd.f32 %v4453_v8, %v3764_v22  ;;  %v4350_v23 = vmul.f32 -1.442695, %v3498_v53 }
 0x532   : > { %v4457_v3 = vpop.eup %4456  ;;  %v3609_v38 = vadd.f32 1.0, %v4455_v50 }
 0x533   : > { %v3769_v32 = vsel %vm3768_vm9, %v4453_v8, %v3765_v43  ;;  %v3777_v63 = vmul.f32 %v4457_v3, %v3608_v15  ;;  %4458 = vpow2.f32 %v4350_v23  ;;  %vm3782_vm1 = vweird.f32 %v4457_v3 }
 0x534   : > { %v3774_v52 = vsel %vm3771_vm0, %v3773_v33, %v3769_v32  ;;  %4460 = vrcp.f32 %v3609_v38  ;;  %v3331_v6 = vpop.f32.mrf.mxu2  ;;  %v3444_v4 = vpop.f32.mrf.mxu3  ;;  %vm3783_vm5 = vmor %vm3781_vm7, %vm3782_vm1  ;;  %v3800_v61 = vand.u32 2147483647, %v3609_v38  ;;  %vm3796_vm9 = vweird.f32 %v3609_v38 }
 0x535   : > { %4057 = vst.msk [vmem:[%s6891_s20 + $0x48] sm:$0xff] %vm7530_vm4, %v3774_v52  ;;  %v3778_v48 = vsub.f32 1.0, %v3777_v63  ;;  %v3439_v41 = vadd.f32 %v3438_v9, %v3331_v6  ;;  %v3802_v9 = vand.u32 2147483648, %v3609_v38  ;;  %vm7532_vm1 = vmmov %vm7531_vm2 }
 0x536   : > { %vm3801_vm4 = vcmp.eq.f32.partialorder %v3800_v61, 8.507059e+37 }
 0x537   : > { %v3779_v31 = vmul.f32 %v4457_v3, %v3778_v48  ;;  %v3499_v12 = vadd.f32 %v6855_v60, %v3439_v41  ;;  %v3803_v25 = vor.u32 1.1754944e-38, %v3802_v9 }
 0x539   : > { %v4459_v58 = vpop.eup %4458  ;;  %v3780_v40 = vadd.f32 %v4457_v3, %v3779_v31  ;;  %v4351_v21 = vmul.f32 -1.442695, %v3499_v12 }
 0x53a   : > { %v4461_v29 = vpop.eup %4460  ;;  %v3610_v13 = vadd.f32 1.0, %v4459_v58 }
 0x53b   : > { %v3784_v51 = vsel %vm3783_vm5, %v4457_v3, %v3780_v40  ;;  %v3792_v16 = vmul.f32 %v4461_v29, %v3609_v38  ;;  %4462 = vpow2.f32 %v4351_v21  ;;  %vm3797_vm3 = vweird.f32 %v4461_v29 }
 0x53c   : > { %v3789_v20 = vsel %vm3786_vm6, %v3788_v11, %v3784_v51  ;;  %4464 = vrcp.f32 %v3610_v13  ;;  %v3334_v44 = vpop.f32.mrf.mxu2  ;;  %v3447_v1 = vpop.f32.mrf.mxu3  ;;  %vm3798_vm0 = vmor %vm3796_vm9, %vm3797_vm3  ;;  %v3817_v7 = vand.u32 2147483648, %v3610_v13  ;;  %vm3811_vm5 = vweird.f32 %v3610_v13 }
 0x53d   : > { %4058 = vst.msk [vmem:[%s6891_s20 + $0x50] sm:$0xff] %vm7531_vm2, %v3789_v20  ;;  %v3793_v19 = vsub.f32 1.0, %v3792_v16  ;;  %v3442_v26 = vadd.f32 %v3441_v39, %v3334_v44  ;;  %v3815_v39 = vand.u32 2147483647, %v3610_v13  ;;  %vm7533_vm3 = vmmov %vm7532_vm1 }
 0x53e   : > { %v3818_v53 = vor.u32 1.1754944e-38, %v3817_v7 }
 0x53f   : > { %v3794_v10 = vmul.f32 %v4461_v29, %v3793_v19  ;;  %v3500_v5 = vadd.f32 %v6855_v60, %v3442_v26  ;;  %vm3816_vm2 = vcmp.eq.f32.partialorder %v3815_v39, 8.507059e+37 }
 0x541   : > { %v4463_v49 = vpop.eup %4462  ;;  %v3795_v34 = vadd.f32 %v4461_v29, %v3794_v10  ;;  %v4352_v27 = vmul.f32 -1.442695, %v3500_v5 }
 0x542   : > { %v4465_v37 = vpop.eup %4464  ;;  %v3611_v0 = vadd.f32 1.0, %v4463_v49 }
 0x543   : > { %v3799_v18 = vsel %vm3798_vm0, %v4461_v29, %v3795_v34  ;;  %v3807_v35 = vmul.f32 %v4465_v37, %v3610_v13  ;;  %4466 = vpow2.f32 %v4352_v27  ;;  %vm3812_vm7 = vweird.f32 %v4465_v37 }
 0x544   : > { %v3804_v8 = vsel %vm3801_vm4, %v3803_v25, %v3799_v18  ;;  %4468 = vrcp.f32 %v3611_v0  ;;  %v3337_v36 = vpop.f32.mrf.mxu2  ;;  %v3450_v15 = vpop.f32.mrf.mxu3  ;;  %vm3813_vm6 = vmor %vm3811_vm5, %vm3812_vm7  ;;  %v3832_v52 = vand.u32 2147483648, %v3611_v0  ;;  %vm3826_vm0 = vweird.f32 %v3611_v0 }
 0x545   : > { %4059 = vst.msk [vmem:[%s6891_s20 + $0x58] sm:$0xff] %vm7532_vm1, %v3804_v8  ;;  %v3808_v28 = vsub.f32 1.0, %v3807_v35  ;;  %v3445_v30 = vadd.f32 %v3444_v4, %v3337_v36  ;;  %v3830_v4 = vand.u32 2147483647, %v3611_v0  ;;  %vm7534_vm7 = vmmov %vm7533_vm3 }
 0x546   : > { %v3833_v12 = vor.u32 1.1754944e-38, %v3832_v52 }
 0x547   : > { %v3809_v24 = vmul.f32 %v4465_v37, %v3808_v28  ;;  %v3501_v14 = vadd.f32 %v6855_v60, %v3445_v30  ;;  %vm3831_vm1 = vcmp.eq.f32.partialorder %v3830_v4, 8.507059e+37 }
 0x549   : > { %v4467_v54 = vpop.eup %4466  ;;  %v3810_v62 = vadd.f32 %v4465_v37, %v3809_v24  ;;  %v4353_v22 = vmul.f32 -1.442695, %v3501_v14 }
 0x54a   : > { %v4469_v59 = vpop.eup %4468  ;;  %v3612_v50 = vadd.f32 1.0, %v4467_v54 }
 0x54b   : > { %v3814_v43 = vsel %vm3813_vm6, %v4465_v37, %v3810_v62  ;;  %v3822_v23 = vmul.f32 %v4469_v59, %v3611_v0  ;;  %4470 = vpow2.f32 %v4353_v22  ;;  %vm3827_vm9 = vweird.f32 %v4469_v59 }
 0x54c   : > { %v3819_v3 = vsel %vm3816_vm2, %v3818_v53, %v3814_v43  ;;  %4472 = vrcp.f32 %v3612_v50  ;;  %v3340_v33 = vpop.f32.mrf.mxu2  ;;  %v3453_v38 = vpop.f32.mrf.mxu3  ;;  %vm3828_vm4 = vmor %vm3826_vm0, %vm3827_vm9  ;;  %v3847_v20 = vand.u32 2147483648, %v3612_v50  ;;  %vm3841_vm6 = vweird.f32 %v3612_v50 }
 0x54d   : > { %4060 = vst.msk [vmem:[%s6891_s20 + $0x60] sm:$0xff] %vm7533_vm3, %v3819_v3  ;;  %v3823_v32 = vsub.f32 1.0, %v3822_v23  ;;  %v3448_v63 = vadd.f32 %v3447_v1, %v3340_v33  ;;  %v3845_v1 = vand.u32 2147483647, %v3612_v50  ;;  %vm7535_vm9 = vmmov %vm7534_vm7 }
 0x54e   : > { %v3848_v5 = vor.u32 1.1754944e-38, %v3847_v20 }
 0x54f   : > { %v3824_v6 = vmul.f32 %v4469_v59, %v3823_v32  ;;  %v3502_v48 = vadd.f32 %v6855_v60, %v3448_v63  ;;  %vm3846_vm3 = vcmp.eq.f32.partialorder %v3845_v1, 8.507059e+37 }
 0x551   : > { %v4471_v41 = vpop.eup %4470  ;;  %v3825_v42 = vadd.f32 %v4469_v59, %v3824_v6  ;;  %v4354_v31 = vmul.f32 -1.442695, %v3502_v48 }
 0x552   : > { %v4473_v17 = vpop.eup %4472  ;;  %v3613_v58 = vadd.f32 1.0, %v4471_v41 }
 0x553   : > { %v3829_v40 = vsel %vm3828_vm4, %v4469_v59, %v3825_v42  ;;  %v3837_v21 = vmul.f32 %v4473_v17, %v3612_v50  ;;  %4474 = vpow2.f32 %v4354_v31  ;;  %vm3842_vm5 = vweird.f32 %v4473_v17 }
 0x554   : > { %v3834_v29 = vsel %vm3831_vm1, %v3833_v12, %v3829_v40  ;;  %4476 = vrcp.f32 %v3613_v58  ;;  %v3343_v11 = vpop.f32.mrf.mxu2  ;;  %v3456_v16 = vpop.f32.mrf.mxu3  ;;  %vm3843_vm2 = vmor %vm3841_vm6, %vm3842_vm5  ;;  %v3862_v35 = vand.u32 2147483648, %v3613_v58  ;;  %v3860_v36 = vand.u32 2147483647, %v3613_v58 }
 0x555   : > { %4061 = vst.msk [vmem:[%s6891_s20 + $0x68] sm:$0xff] %vm7534_vm7, %v3834_v29  ;;  %v3838_v13 = vsub.f32 1.0, %v3837_v21  ;;  %v3451_v51 = vadd.f32 %v3450_v15, %v3343_v11  ;;  %vm3856_vm4 = vweird.f32 %v3613_v58  ;;  %vm7536_vm5 = vmmov %vm7535_vm9 }
 0x556   : > { %v3863_v14 = vor.u32 1.1754944e-38, %v3862_v35  ;;  %vm3861_vm7 = vcmp.eq.f32.partialorder %v3860_v36, 8.507059e+37 }
 0x557   : > { %v3839_v44 = vmul.f32 %v4473_v17, %v3838_v13  ;;  %v3503_v19 = vadd.f32 %v6855_v60, %v3451_v51 }
 0x559   : > { %v4475_v26 = vpop.eup %4474  ;;  %v3840_v9 = vadd.f32 %v4473_v17, %v3839_v44  ;;  %v4355_v10 = vmul.f32 -1.442695, %v3503_v19 }
 0x55a   : > { %v4477_v61 = vpop.eup %4476  ;;  %v3614_v49 = vadd.f32 1.0, %v4475_v26 }
 0x55b   : > { %v3844_v34 = vsel %vm3843_vm2, %v4473_v17, %v3840_v9  ;;  %v3852_v27 = vmul.f32 %v4477_v61, %v3613_v58  ;;  %4478 = vpow2.f32 %v4355_v10  ;;  %vm3857_vm0 = vweird.f32 %v4477_v61 }
 0x55c   : > { %v3849_v37 = vsel %vm3846_vm3, %v3848_v5, %v3844_v34  ;;  %4480 = vrcp.f32 %v3614_v49  ;;  %v3346_v25 = vpop.f32.mrf.mxu2  ;;  %v3459_v28 = vpop.f32.mrf.mxu3  ;;  %vm3858_vm1 = vmor %vm3856_vm4, %vm3857_vm0  ;;  %v3877_v23 = vand.u32 2147483648, %v3614_v49  ;;  %v3875_v33 = vand.u32 2147483647, %v3614_v49 }
 0x55d   : > { %4062 = vst.msk [vmem:[%s6891_s20 + $0x70] sm:$0xff] %vm7535_vm9, %v3849_v37  ;;  %v3853_v0 = vsub.f32 1.0, %v3852_v27  ;;  %v3454_v18 = vadd.f32 %v3453_v38, %v3346_v25  ;;  %vm3871_vm2 = vweird.f32 %v3614_v49  ;;  %vm7537_vm0 = vmmov %vm7536_vm5 }
 0x55e   : > { %v3878_v48 = vor.u32 1.1754944e-38, %v3877_v23  ;;  %vm3876_vm9 = vcmp.eq.f32.partialorder %v3875_v33, 8.507059e+37 }
 0x55f   : > { %v3854_v8 = vmul.f32 %v4477_v61, %v3853_v0  ;;  %v3504_v15 = vadd.f32 %v6855_v60, %v3454_v18 }
 0x561   : > { %v4479_v30 = vpop.eup %4478  ;;  %v3855_v7 = vadd.f32 %v4477_v61, %v3854_v8  ;;  %v4356_v24 = vmul.f32 -1.442695, %v3504_v15 }
 0x562   : > { %v4481_v39 = vpop.eup %4480  ;;  %v3615_v54 = vadd.f32 1.0, %v4479_v30 }
 0x563   : > { %v3859_v62 = vsel %vm3858_vm1, %v4477_v61, %v3855_v7  ;;  %v3867_v22 = vmul.f32 %v4481_v39, %v3614_v49  ;;  %4482 = vpow2.f32 %v4356_v24  ;;  %vm3872_vm6 = vweird.f32 %v4481_v39 }
 0x564   : > { %v3864_v59 = vsel %vm3861_vm7, %v3863_v14, %v3859_v62  ;;  %4484 = vrcp.f32 %v3615_v54  ;;  %v3349_v53 = vpop.f32.mrf.mxu2  ;;  %v3462_v6 = vpop.f32.mrf.mxu3  ;;  %vm3873_vm3 = vmor %vm3871_vm2, %vm3872_vm6  ;;  %v3892_v21 = vand.u32 2147483648, %v3615_v54  ;;  %v3890_v11 = vand.u32 2147483647, %v3615_v54 }
 0x565   : > { %4063 = vst.msk [vmem:[%s6891_s20 + $0x78] sm:$0xff] %vm7536_vm5, %v3864_v59  ;;  %v3868_v50 = vsub.f32 1.0, %v3867_v22  ;;  %v3457_v43 = vadd.f32 %v3456_v16, %v3349_v53  ;;  %vm3886_vm1 = vweird.f32 %v3615_v54  ;;  %vm7538_vm6 = vmmov %vm7537_vm0 }
 0x566   : > { %v3893_v1 = vor.u32 1.1754944e-38, %v3892_v21  ;;  %vm3891_vm5 = vcmp.eq.f32.partialorder %v3890_v11, 8.507059e+37 }
 0x567   : > { %v3869_v3 = vmul.f32 %v4481_v39, %v3868_v50  ;;  %v3505_v38 = vadd.f32 %v6855_v60, %v3457_v43 }
 0x569   : > { %v4483_v32 = vpop.eup %4482  ;;  %v3870_v63 = vadd.f32 %v4481_v39, %v3869_v3  ;;  %v4357_v52 = vmul.f32 -1.442695, %v3505_v38 }
 0x56a   : > { %v4485_v4 = vpop.eup %4484  ;;  %v3616_v41 = vadd.f32 1.0, %v4483_v32 }
 0x56b   : > { %v3874_v42 = vsel %vm3873_vm3, %v4481_v39, %v3870_v63  ;;  %v3882_v31 = vmul.f32 %v4485_v4, %v3615_v54  ;;  %4486 = vpow2.f32 %v4357_v52  ;;  %vm3887_vm4 = vweird.f32 %v4485_v4 }
 0x56c   : > { %v3879_v17 = vsel %vm3876_vm9, %v3878_v48, %v3874_v42  ;;  %4488 = vrcp.f32 %v3616_v41  ;;  %v3352_v12 = vpop.f32.mrf.mxu2  ;;  %vm3888_vm7 = vmor %vm3886_vm1, %vm3887_vm4  ;;  %v3465_v10 = vpop.f32.mrf.mxu3  ;;  %v3907_v27 = vand.u32 2147483648, %v3616_v41  ;;  %v3905_v25 = vand.u32 2147483647, %v3616_v41 }
 0x56d   : > { %4064 = vst.msk [vmem:[%s6891_s20 + $0x80] sm:$0xff] %vm7537_vm0, %v3879_v17  ;;  %v3883_v58 = vsub.f32 1.0, %v3882_v31  ;;  %v3460_v40 = vadd.f32 %v3459_v28, %v3352_v12  ;;  %vm3901_vm3 = vweird.f32 %v3616_v41  ;;  %vm7539_vm4 = vmmov %vm7538_vm6 }
 0x56e   : > { %v3908_v15 = vor.u32 1.1754944e-38, %v3907_v27  ;;  %vm3906_vm0 = vcmp.eq.f32.partialorder %v3905_v25, 8.507059e+37 }
 0x56f   : > { %v3884_v29 = vmul.f32 %v4485_v4, %v3883_v58  ;;  %v3506_v13 = vadd.f32 %v6855_v60, %v3460_v40 }
 0x571   : > { %v4487_v51 = vpop.eup %4486  ;;  %v3885_v16 = vadd.f32 %v4485_v4, %v3884_v29  ;;  %v4358_v20 = vmul.f32 -1.442695, %v3506_v13 }
 0x572   : > { %v4489_v44 = vpop.eup %4488  ;;  %v3617_v19 = vadd.f32 1.0, %v4487_v51 }
 0x573   : > { %v3889_v26 = vsel %vm3888_vm7, %v4485_v4, %v3885_v16  ;;  %v3897_v9 = vmul.f32 %v4489_v44, %v3616_v41  ;;  %4490 = vpow2.f32 %v4358_v20  ;;  %vm3902_vm2 = vweird.f32 %v4489_v44 }
 0x574   : > { %v3894_v61 = vsel %vm3891_vm5, %v3893_v1, %v3889_v26  ;;  %4492 = vrcp.f32 %v3617_v19  ;;  %v3355_v5 = vpop.f32.mrf.mxu2  ;;  %vm3903_vm9 = vmor %vm3901_vm3, %vm3902_vm2  ;;  %v3468_v54 = vpop.f32.mrf.mxu3  ;;  %v3922_v22 = vand.u32 2147483648, %v3617_v19  ;;  %v3920_v53 = vand.u32 2147483647, %v3617_v19 }
 0x575   : > { %4065 = vst.msk [vmem:[%s6891_s20 + $0x88] sm:$0xff] %vm7538_vm6, %v3894_v61  ;;  %v3898_v49 = vsub.f32 1.0, %v3897_v9  ;;  %v3463_v34 = vadd.f32 %v3462_v6, %v3355_v5  ;;  %vm3916_vm7 = vweird.f32 %v3617_v19  ;;  %vm7540_vm2 = vmmov %vm7539_vm4 }
 0x576   : > { %v3923_v38 = vor.u32 1.1754944e-38, %v3922_v22  ;;  %vm3921_vm6 = vcmp.eq.f32.partialorder %v3920_v53, 8.507059e+37 }
 0x577   : > { %v3899_v37 = vmul.f32 %v4489_v44, %v3898_v49  ;;  %v3507_v0 = vadd.f32 %v6855_v60, %v3463_v34 }
 0x579   : > { %v4491_v18 = vpop.eup %4490  ;;  %v3900_v35 = vadd.f32 %v4489_v44, %v3899_v37  ;;  %v4359_v8 = vmul.f32 -1.442695, %v3507_v0 }
 0x57a   : > { %v4493_v36 = vpop.eup %4492  ;;  %v3618_v28 = vadd.f32 1.0, %v4491_v18 }
 0x57b   : > { %v3904_v30 = vsel %vm3903_vm9, %v4489_v44, %v3900_v35  ;;  %v3912_v7 = vmul.f32 %v4493_v36, %v3617_v19  ;;  %4494 = vpow2.f32 %v4359_v8  ;;  %vm3917_vm1 = vweird.f32 %v4493_v36 }
 0x57c   : > { %v3909_v24 = vsel %vm3906_vm0, %v3908_v15, %v3904_v30  ;;  %4496 = vrcp.f32 %v3618_v28  ;;  %v3358_v39 = vpop.f32.mrf.mxu2  ;;  %vm3918_vm5 = vmor %vm3916_vm7, %vm3917_vm1  ;;  %v3937_v42 = vand.u32 2147483648, %v3618_v28  ;;  %v3935_v17 = vand.u32 2147483647, %v3618_v28  ;;  %v3471_v12 = vpop.f32.mrf.mxu3 }
 0x57d   : > { %4066 = vst.msk [vmem:[%s6891_s20 + $0x90] sm:$0xff] %vm7539_vm4, %v3909_v24  ;;  %v3913_v14 = vsub.f32 1.0, %v3912_v7  ;;  %v3466_v62 = vadd.f32 %v3465_v10, %v3358_v39  ;;  %vm3931_vm9 = vweird.f32 %v3618_v28  ;;  %vm7541_vm1 = vmmov %vm7540_vm2 }
 0x57e   : > { %v3938_v13 = vor.u32 1.1754944e-38, %v3937_v42  ;;  %vm3936_vm4 = vcmp.eq.f32.partialorder %v3935_v17, 8.507059e+37 }
 0x57f   : > { %v3914_v59 = vmul.f32 %v4493_v36, %v3913_v14  ;;  %v3508_v50 = vadd.f32 %v6855_v60, %v3466_v62 }
 0x581   : > { %v4495_v43 = vpop.eup %4494  ;;  %v3915_v23 = vadd.f32 %v4493_v36, %v3914_v59  ;;  %v4360_v3 = vmul.f32 -1.442695, %v3508_v50 }
 0x582   : > { %v4497_v33 = vpop.eup %4496  ;;  %v3619_v32 = vadd.f32 1.0, %v4495_v43 }
 0x583   : > { %v3919_v63 = vsel %vm3918_vm5, %v4493_v36, %v3915_v23  ;;  %v3927_v52 = vmul.f32 %v4497_v33, %v3618_v28  ;;  %4498 = vpow2.f32 %v4360_v3  ;;  %vm3932_vm3 = vweird.f32 %v4497_v33 }
 0x584   : > { %v3924_v6 = vsel %vm3921_vm6, %v3923_v38, %v3919_v63  ;;  %4500 = vrcp.f32 %v3619_v32  ;;  %v3361_v4 = vpop.f32.mrf.mxu2  ;;  %vm3933_vm0 = vmor %vm3931_vm9, %vm3932_vm3  ;;  %v3952_v26 = vand.u32 2147483648, %v3619_v32  ;;  %v3950_v61 = vand.u32 2147483647, %v3619_v32  ;;  %v3474_v27 = vpop.f32.mrf.mxu3 }
 0x585   : > { %4067 = vst.msk [vmem:[%s6891_s20 + $0x98] sm:$0xff] %vm7540_vm2, %v3924_v6  ;;  %v3928_v48 = vsub.f32 1.0, %v3927_v52  ;;  %v3469_v41 = vadd.f32 %v3468_v54, %v3361_v4  ;;  %vm3946_vm5 = vweird.f32 %v3619_v32  ;;  %vm7542_vm3 = vmmov %vm7541_vm1 }
 0x586   : > { %v3953_v25 = vor.u32 1.1754944e-38, %v3952_v26  ;;  %vm3951_vm2 = vcmp.eq.f32.partialorder %v3950_v61, 8.507059e+37 }
 0x587   : > { %v3929_v31 = vmul.f32 %v4497_v33, %v3928_v48  ;;  %v3509_v58 = vadd.f32 %v6855_v60, %v3469_v41 }
 0x589   : > { %v4499_v40 = vpop.eup %4498  ;;  %v3930_v21 = vadd.f32 %v4497_v33, %v3929_v31  ;;  %v4361_v29 = vmul.f32 -1.442695, %v3509_v58 }
 0x58a   : > { %v4501_v11 = vpop.eup %4500  ;;  %v3620_v51 = vadd.f32 1.0, %v4499_v40 }
 0x58b   : > { %v3934_v16 = vsel %vm3933_vm0, %v4497_v33, %v3930_v21  ;;  %v3942_v20 = vmul.f32 %v4501_v11, %v3619_v32  ;;  %4502 = vpow2.f32 %v4361_v29  ;;  %vm3947_vm7 = vweird.f32 %v4501_v11 }
 0x58c   : > { %v3939_v44 = vsel %vm3936_vm4, %v3938_v13, %v3934_v16  ;;  %4504 = vrcp.f32 %v3620_v51  ;;  %vm3948_vm6 = vmor %vm3946_vm5, %vm3947_vm7  ;;  %v3967_v30 = vand.u32 2147483648, %v3620_v51  ;;  %v3965_v39 = vand.u32 2147483647, %v3620_v51  ;;  %v2571_v16 = vpop.f32.mrf.mxu0 }
 0x58d   : > { %4068 = vst.msk [vmem:[%s6891_s20 + $0xa0] sm:$0xff] %vm7541_vm1, %v3939_v44  ;;  %v3943_v1 = vsub.f32 1.0, %v3942_v20  ;;  %v3364_v19 = vpop.f32.mrf.mxu2  ;;  %vm3961_vm0 = vweird.f32 %v3620_v51  ;;  %v3477_v23 = vpop.f32.mrf.mxu3  ;;  %vm7543_vm7 = vmmov %vm7542_vm3 }
 0x58e   : > { %v3472_v9 = vadd.f32 %v3471_v12, %v3364_v19  ;;  %v3968_v22 = vor.u32 1.1754944e-38, %v3967_v30  ;;  %vm3966_vm1 = vcmp.eq.f32.partialorder %v3965_v39, 8.507059e+37 }
 0x58f   : > { %v3944_v10 = vmul.f32 %v4501_v11, %v3943_v1 }
 0x590   : > { %v3510_v5 = vadd.f32 %v6855_v60, %v3472_v9  ;;  %v2740_v20 = vpop.f32.mrf.mxu1 }
 0x591   : > { %v4503_v49 = vpop.eup %4502  ;;  %v3945_v34 = vadd.f32 %v4501_v11, %v3944_v10 }
 0x592   : > { %v4505_v37 = vpop.eup %4504  ;;  %v3621_v0 = vadd.f32 1.0, %v4503_v49  ;;  %v4362_v18 = vmul.f32 -1.442695, %v3510_v5 }
 0x593   : > { %v3949_v35 = vsel %vm3948_vm6, %v4501_v11, %v3945_v34  ;;  %v3957_v8 = vmul.f32 %v4505_v37, %v3620_v51  ;;  %vm3962_vm9 = vweird.f32 %v4505_v37 }
 0x594   : > { %v3954_v36 = vsel %vm3951_vm2, %v3953_v25, %v3949_v35  ;;  %4506 = vrcp.f32 %v3621_v0  ;;  %vm3963_vm4 = vmor %vm3961_vm0, %vm3962_vm9  ;;  %v3982_v63 = vand.u32 2147483648, %v3621_v0  ;;  %v3980_v6 = vand.u32 2147483647, %v3621_v0 }
 0x595   : > { %4069 = vst.msk [vmem:[%s6891_s20 + $0xa8] sm:$0xff] %vm7542_vm3, %v3954_v36  ;;  %v3958_v15 = vsub.f32 1.0, %v3957_v8  ;;  %4508 = vpow2.f32 %v4362_v18  ;;  %v3367_v28 = vpop.f32.mrf.mxu2  ;;  %vm3976_vm6 = vweird.f32 %v3621_v0  ;;  %vm7544_vm9 = vmmov %vm7543_vm7  ;;  %v3480_v11 = vpop.f32.mrf.mxu3 }
 0x596   : > { %v3475_v7 = vadd.f32 %v3474_v27, %v3367_v28  ;;  %v3983_v31 = vor.u32 1.1754944e-38, %v3982_v63  ;;  %vm3981_vm3 = vcmp.eq.f32.partialorder %v3980_v6, 8.507059e+37 }
 0x597   : > { %v3959_v24 = vmul.f32 %v4505_v37, %v3958_v15 }
 0x598   : > { %v3511_v14 = vadd.f32 %v6855_v60, %v3475_v7 }
 0x599   : > { %v3960_v54 = vadd.f32 %v4505_v37, %v3959_v24 }
 0x59a   : > { %v4507_v62 = vpop.eup %4506  ;;  %v4363_v59 = vmul.f32 -1.442695, %v3511_v14 }
 0x59b   : > { %v4509_v53 = vpop.eup %4508  ;;  %v3964_v50 = vsel %vm3963_vm4, %v4505_v37, %v3960_v54  ;;  %v3972_v43 = vmul.f32 %v4507_v62, %v3621_v0  ;;  %vm3977_vm5 = vweird.f32 %v4507_v62 }
 0x59c   : > { %v3969_v3 = vsel %vm3966_vm1, %v3968_v22, %v3964_v50  ;;  %v3622_v33 = vadd.f32 1.0, %v4509_v53  ;;  %4510 = vpow2.f32 %v4363_v59  ;;  %vm3978_vm2 = vmor %vm3976_vm6, %vm3977_vm5 }
 0x59d   : > { %4070 = vst.msk [vmem:[%s6891_s20 + $0xb0] sm:$0xff] %vm7543_vm7, %v3969_v3  ;;  %v3973_v38 = vsub.f32 1.0, %v3972_v43  ;;  %v3370_v32 = vpop.f32.mrf.mxu2  ;;  %vm7545_vm5 = vmmov %vm7544_vm9 }
 0x59e   : > { %4512 = vrcp.f32 %v3622_v33  ;;  %v3478_v4 = vadd.f32 %v3477_v23, %v3370_v32  ;;  %v3997_v1 = vand.u32 2147483648, %v3622_v33  ;;  %v3995_v9 = vand.u32 2147483647, %v3622_v33 }
 0x59f   : > { %v3974_v52 = vmul.f32 %v4507_v62, %v3973_v38  ;;  %vm3991_vm4 = vweird.f32 %v3622_v33 }
 0x5a0   : > { %v3512_v41 = vadd.f32 %v6855_v60, %v3478_v4  ;;  %v3998_v34 = vor.u32 1.1754944e-38, %v3997_v1  ;;  %vm3996_vm7 = vcmp.eq.f32.partialorder %v3995_v9, 8.507059e+37 }
 0x5a1   : > { %v3975_v48 = vadd.f32 %v4507_v62, %v3974_v52 }
 0x5a2   : > { %v4511_v42 = vpop.eup %4510  ;;  %v4364_v58 = vmul.f32 -1.442695, %v3512_v41 }
 0x5a3   : > { %v3979_v17 = vsel %vm3978_vm2, %v4507_v62, %v3975_v48  ;;  %v3623_v12 = vadd.f32 1.0, %v4511_v42 }
 0x5a4   : > { %v4513_v40 = vpop.eup %4512  ;;  %v3984_v21 = vsel %vm3981_vm3, %v3983_v31, %v3979_v17 }
 0x5a5   : > { %4071 = vst.msk [vmem:[%s6891_s20 + $0xb8] sm:$0xff] %vm7544_vm9, %v3984_v21  ;;  %v3987_v29 = vmul.f32 %v4513_v40, %v3622_v33  ;;  %4514 = vrcp.f32 %v3623_v12  ;;  %v3373_v13 = vpop.f32.mrf.mxu2  ;;  %vm3992_vm0 = vweird.f32 %v4513_v40  ;;  %v4010_v8 = vand.u32 2147483647, %v3623_v12 }
 0x5a6   : > { %4516 = vpow2.f32 %v4364_v58  ;;  %v3481_v51 = vadd.f32 %v3480_v11, %v3373_v13  ;;  %vm3993_vm1 = vmor %vm3991_vm4, %vm3992_vm0  ;;  %vm4006_vm2 = vweird.f32 %v3623_v12 }
 0x5a7   : > { %v3988_v44 = vsub.f32 1.0, %v3987_v29  ;;  %vm4011_vm9 = vcmp.eq.f32.partialorder %v4010_v8, 8.507059e+37  ;;  %vm7546_vm0 = vmmov %vm7545_vm5 }
 0x5a8   : > { %v3513_v19 = vadd.f32 %v6855_v60, %v3481_v51  ;;  %v4012_v60 = vand.u32 2147483648, %v3623_v12 }
 0x5a9   : > { %v3989_v26 = vmul.f32 %v4513_v40, %v3988_v44 }
 0x5aa   : > { %v4365_v10 = vmul.f32 -1.442695, %v3513_v19  ;;  %v4013_v28 = vor.u32 1.1754944e-38, %v4012_v60 }
 0x5ab   : > { %v4515_v61 = vpop.eup %4514  ;;  %v3990_v5 = vadd.f32 %v4513_v40, %v3989_v26 }
 0x5ac   : > { %v4517_v49 = vpop.eup %4516  ;;  %v4002_v27 = vmul.f32 %v4515_v61, %v3623_v12  ;;  %4518 = vpow2.f32 %v4365_v10  ;;  %vm4007_vm6 = vweird.f32 %v4515_v61 }
 0x5ad   : > { %v3994_v37 = vsel %vm3993_vm1, %v4513_v40, %v3990_v5  ;;  %v3624_v25 = vadd.f32 1.0, %v4517_v49  ;;  %vm4008_vm3 = vmor %vm4006_vm2, %vm4007_vm6 }
 0x5ae   : > { %v3999_v0 = vsel %vm3996_vm7, %v3998_v34, %v3994_v37  ;;  %v4003_v18 = vsub.f32 1.0, %v4002_v27  ;;  %vm7547_vm6 = vmmov %vm7546_vm0 }
 0x5af   : > { %4072 = vst.msk [vmem:[%s6891_s20 + $0xc0] sm:$0xff] %vm7545_vm5, %v3999_v0  ;;  %4520 = vrcp.f32 %v3624_v25  ;;  %v4027_v62 = vand.u32 2147483648, %v3624_v25  ;;  %v4025_v59 = vand.u32 2147483647, %v3624_v25  ;;  %vm4021_vm1 = vweird.f32 %v3624_v25 }
 0x5b0   : > { %v4004_v35 = vmul.f32 %v4515_v61, %v4003_v18 }
 0x5b1   : > { %v4028_v23 = vor.u32 1.1754944e-38, %v4027_v62  ;;  %vm4026_vm5 = vcmp.eq.f32.partialorder %v4025_v59, 8.507059e+37 }
 0x5b2   : > { %v4519_v36 = vpop.eup %4518  ;;  %v4005_v15 = vadd.f32 %v4515_v61, %v4004_v35 }
 0x5b3   : > { %v3625_v30 = vadd.f32 1.0, %v4519_v36 }
 0x5b4   : > { %v4009_v7 = vsel %vm4008_vm3, %v4515_v61, %v4005_v15 }
 0x5b5   : > { %v4521_v24 = vpop.eup %4520  ;;  %v4014_v39 = vsel %vm4011_vm9, %v4013_v28, %v4009_v7  ;;  %4522 = vrcp.f32 %v3625_v30  ;;  %v4042_v32 = vand.u32 2147483648, %v3625_v30  ;;  %v4040_v52 = vand.u32 2147483647, %v3625_v30 }
 0x5b6   : > { %4073 = vst.msk [vmem:[%s6891_s20 + $0xc8] sm:$0xff] %vm7546_vm0, %v4014_v39  ;;  %v4017_v14 = vmul.f32 %v4521_v24, %v3624_v25  ;;  %vm4022_vm4 = vweird.f32 %v4521_v24  ;;  %vm4036_vm3 = vweird.f32 %v3625_v30 }
 0x5b7   : > { %vm4023_vm7 = vmor %vm4021_vm1, %vm4022_vm4  ;;  %v4043_v4 = vor.u32 1.1754944e-38, %v4042_v32  ;;  %vm4041_vm0 = vcmp.eq.f32.partialorder %v4040_v52, 8.507059e+37 }
 0x5b8   : > { %v4018_v54 = vsub.f32 1.0, %v4017_v14  ;;  %vm7548_vm4 = vmmov %vm7547_vm6 }
 0x5ba   : > { %v4019_v22 = vmul.f32 %v4521_v24, %v4018_v54 }
 0x5bb   : > { %v4523_v53 = vpop.eup %4522 }
 0x5bc   : > { %v4020_v50 = vadd.f32 %v4521_v24, %v4019_v22  ;;  %v4032_v43 = vmul.f32 %v4523_v53, %v3625_v30  ;;  %vm4037_vm2 = vweird.f32 %v4523_v53 }
 0x5bd   : > { %vm4038_vm9 = vmor %vm4036_vm3, %vm4037_vm2 }
 0x5be   : > { %v4024_v3 = vsel %vm4023_vm7, %v4521_v24, %v4020_v50  ;;  %v4033_v33 = vsub.f32 1.0, %v4032_v43 }
 0x5bf   : > { %v4029_v38 = vsel %vm4026_vm5, %v4028_v23, %v4024_v3 }
 0x5c0   : > { %4074 = vst.msk [vmem:[%s6891_s20 + $0xd0] sm:$0xff] %vm7547_vm6, %v4029_v38  ;;  %v4034_v63 = vmul.f32 %v4523_v53, %v4033_v33 }
 0x5c2   : > { %v4035_v6 = vadd.f32 %v4523_v53, %v4034_v63  ;;  %306 = sbr.rel (!%p304_p0) target bundleno = 61 (0x3d), region = 72 }
 0x5c4   : > { %v4039_v48 = vsel %vm4038_vm9, %v4523_v53, %v4035_v6 }
 0x5c5   : > { %v4044_v41 = vsel %vm4041_vm0, %v4043_v4, %v4039_v48 }
 0x5c6   : > { %4075 = vst.msk [vmem:[%s6891_s20 + $0xd8] sm:$0xff] %vm7548_vm4, %v4044_v41 }

</bundles_post_ra>
